<compile_context>
chip_gen: v7x
topology: tpu7x:2x2x1
jax: 0.10.0
libtpu: 0.0.40
codegen_flags: <defaults>
</compile_context>

<pallas_src>
import jax
import jax.numpy as jnp
import numpy as np
from jax.experimental import pallas as pl
from jax.experimental.pallas import tpu as pltpu

LANE = 128
HEAD_ROWS = 8               # sublane-aligned row block used for the (1x1-spatial) head matmuls
_COMPUTE_DTYPE = jnp.float32   # set to jnp.bfloat16 on v6e/v7x for ~2x MXU throughput
                               # (f32 accumulation / bias / ELU kept; relax the test tolerance)


def _round_up(a, b):
    return (a + b - 1) // b * b


def _cpad(c):
    return _round_up(max(c, LANE), LANE)


# ----------------------------------------------------------------------------
# Static per-config plan: layout widths, valid extents and flattened row counts
# ----------------------------------------------------------------------------
def _build_plan(model_params):
    cin0, H, W = model_params["input_shape"]
    filters = list(model_params["filters"])
    pool_positions = list(model_params["pool_positions"])
    pf = int(model_params["pool_factor"])

    ops = []
    prev_c = cin0
    lay_w, hv, wv = W, H, W
    block_idx, pool_idx = 0, 0
    for i, f in enumerate(filters):
        ops.append(dict(kind="conv", idx=i, W=lay_w, Hv=hv, Wv=wv,
                        cin=prev_c, cout=f, cin_p=_cpad(prev_c), cout_p=_cpad(f)))
        hv, wv = hv - 2, wv - 2
        block_idx += 1
        if pool_idx < len(pool_positions) and block_idx == pool_positions[pool_idx]:
            hp, wp = hv // pf, wv // pf
            wn = _round_up(wp, 8)     # sublane-aligned pooled layout width
            ops.append(dict(kind="pool", W=lay_w, pf=pf, Hp=hp, Wp=wp, Wn=wn, cop=_cpad(f)))
            hv, wv, lay_w = hp, wp, wn
            pool_idx += 1
            block_idx += 1
        prev_c = f
    assert (hv, wv) == (1, 1), "head flatten assumes the conv stack reduces spatial dims to 1x1"

    # Backward pass over required flattened-row counts (all multiples of 8).
    req = HEAD_ROWS
    for op in reversed(ops):
        if op["kind"] == "conv":
            hov, wov = op["Hv"] - 2, op["Wv"] - 2
            rout = _round_up(max(req, (hov - 1) * op["W"] + wov), 8)
            op["rout"] = rout
            req = _round_up(rout + 2 * op["W"] + 2, 8)
            op["rin"] = req
        else:
            op["rows_out"] = req
            rm = _round_up((op["Hp"] - 1) * op["pf"] * op["W"]
                           + (op["Wn"] - 1) * op["pf"] + 1, 8)
            op["Rm"] = rm
            req = _round_up(rm + (op["pf"] - 1) * (op["W"] + 1), 8)

    # pool scratch buffers hold the preceding conv's full output block
    for i, op in enumerate(ops):
        if op["kind"] == "pool":
            op["buf_rows"] = ops[i - 1]["rout"]
    return ops, ops[0]["rin"]


# ----------------------------------------------------------------------------
# Fused kernel: all convs + ELU + pools + head, one image per grid step
# ----------------------------------------------------------------------------
def _make_fused_kernel(plan, n_conv, alpha):
    def elu(z):
        return jnp.where(z > 0, z, alpha * (jnp.exp(z) - 1.0))

    def kernel(*refs):
        x_ref = refs[0]
        conv_refs = refs[1:1 + 2 * n_conv]
        w1_ref, b1_ref, w2_ref, b2_ref = refs[1 + 2 * n_conv:5 + 2 * n_conv]
        o_ref = refs[5 + 2 * n_conv]
        pool_refs = refs[6 + 2 * n_conv:]

        src = x_ref            # first conv slides directly over the input block (ref slices)
        conv_i = 0
        pool_i = 0
        for op_i, op in enumerate(plan):
            if op["kind"] == "conv":
                W, rout, cop = op["W"], op["rout"], op["cout_p"]
                w_ref = conv_refs[2 * conv_i]
                b_ref = conv_refs[2 * conv_i + 1]
                conv_i += 1
                acc = jnp.zeros((rout, cop), jnp.float32)
                # TODO(synk): pack the 9 taps into the MXU K dimension (K = 9*Cin) if this
                # ever becomes MXU-bound at larger batch/filters; today launch/HBM dominate.
                for dy in range(3):
                    for dx in range(3):
                        s = dy * W + dx
                        xs = src[s:s + rout, :]
                        acc = acc + jnp.dot(xs.astype(w_ref.dtype), w_ref[dy * 3 + dx],
                                            preferred_element_type=jnp.float32)
                y = elu(acc + b_ref[...])
                if op_i + 1 < len(plan) and plan[op_i + 1]["kind"] == "pool":
                    buf = pool_refs[pool_i]
                    buf[...] = y       # park in VMEM scratch so the pool can ref-slice it
                    src = buf
                else:
                    src = y
            else:
                # fused pf x pf / stride pf max-pool: no pf^2 HBM materialization
                W, pf = op["W"], op["pf"]
                Hp, Wn, Rm = op["Hp"], op["Wn"], op["Rm"]
                rows_out, cop = op["rows_out"], op["cop"]
                buf = pool_refs[pool_i]
                pool_i += 1
                # max over the pf x pf window anchored at every flattened row
                m = src[0:Rm, :]
                for dy in range(pf):
                    for dx in range(pf):
                        if dy == 0 and dx == 0:
                            continue
                        s = dy * W + dx
                        m = jnp.maximum(m, src[s:s + Rm, :])
                buf[0:Rm, :] = m
                # decimate rows/cols by pf: pooled (hp, wp) lives at m[hp*pf*W + wp*pf]
                parts = [buf[pl.ds(hp * pf * W, Wn, stride=pf), :] for hp in range(Hp)]
                pooled = jnp.concatenate(parts, axis=0) if len(parts) > 1 else parts[0]
                if rows_out <= Hp * Wn:
                    src = pooled[0:rows_out, :]
                else:
                    src = jnp.concatenate(
                        [pooled, jnp.zeros((rows_out - Hp * Wn, cop), pooled.dtype)], axis=0)

        # fused head: (lin + ELU) -> clf on the 1x1-spatial features (row 0 is the valid one)
        feat = src[0:HEAD_ROWS, :]
        h = jnp.dot(feat.astype(w1_ref.dtype), w1_ref[...],
                    preferred_element_type=jnp.float32) + b1_ref[...]
        h = elu(h)
        logits = jnp.dot(h.astype(w2_ref.dtype), w2_ref[...],
                         preferred_element_type=jnp.float32) + b2_ref[...]
        o_ref[...] = logits.astype(o_ref.dtype)

    return kernel


# ----------------------------------------------------------------------------
# Weight-norm reparameterization (parameter setup, plain XLA)
# ----------------------------------------------------------------------------
def weight_norm_conv(v, g):
    # v: (Cout, Cin, kh, kw), g: (Cout,); norm over all dims but 0 (PyTorch default dim=0)
    norm = jnp.sqrt(jnp.sum(v * v, axis=(1, 2, 3), keepdims=True))
    return v * (g.reshape(-1, 1, 1, 1) / norm)


def weight_norm_linear(v, g):
    # v: (out, in), g: (out,)
    norm = jnp.sqrt(jnp.sum(v * v, axis=1, keepdims=True))
    return v * (g.reshape(-1, 1) / norm)


# ----------------------------------------------------------------------------
# Model forward (single fused pallas_call) and parameter init
# ----------------------------------------------------------------------------
def wn_vgglike_forward(x_nchw, params, model_params):
    alpha = float(model_params["elu_alpha"])
    classes = int(model_params["classes_nb"])
    filters = list(model_params["filters"])
    plan, rin0 = _build_plan(model_params)
    n_conv = sum(1 for op in plan if op["kind"] == "conv")

    N, Cin, H, W = x_nchw.shape
    cin_p0 = plan[0]["cin_p"]

    # One-time layout change: NCHW -> lane-dense zero channel-padded flattened rows per image.
    x = jnp.transpose(x_nchw, (0, 2, 3, 1))
    x = jnp.pad(x, ((0, 0), (0, 0), (0, 0), (0, cin_p0 - Cin)))
    x = x.reshape(N, H * W, cin_p0)
    x = jnp.pad(x, ((0, 0), (0, rin0 - H * W), (0, 0)))
    x = x.reshape(N * rin0, cin_p0).astype(_COMPUTE_DTYPE)

    inputs = [x]
    in_specs = [pl.BlockSpec((rin0, cin_p0), lambda n: (n, 0))]

    # Conv weights: per-tap (Cin_p, Cout_p) matrices, zero-padded to lane width (resident).
    # TODO(synk): mark resident weight/bias blocks pipeline_mode=pl.Buffered(1) if VMEM
    # headroom is ever needed at larger filter counts on v7x (64 MiB VMEM).
    for op in plan:
        if op["kind"] != "conv":
            continue
        layer = params["conv"][op["idx"]]
        w = weight_norm_conv(layer["v"], layer["g"]) if layer["weight_norm"] else layer["v"]
        cin, cout, cin_p, cout_p = op["cin"], op["cout"], op["cin_p"], op["cout_p"]
        w_shift = jnp.transpose(w, (2, 3, 1, 0)).reshape(9, cin, cout)
        w_shift = jnp.pad(w_shift, ((0, 0), (0, cin_p - cin), (0, cout_p - cout)))
        b_pad = jnp.pad(layer["b"], (0, cout_p - cout)).reshape(1, cout_p)
        inputs += [w_shift.astype(_COMPUTE_DTYPE), b_pad]
        in_specs += [pl.BlockSpec((9, cin_p, cout_p), lambda n: (0, 0, 0)),
                     pl.BlockSpec((1, cout_p), lambda n: (0, 0))]

    # Head weights (weight-normalized, transposed to (in, out), zero-padded to lane width).
    d = filters[-1]
    cop_last = _cpad(d)
    dp = _cpad(d)
    cp = _cpad(classes)
    w1 = weight_norm_linear(params["head"]["lin"]["v"], params["head"]["lin"]["g"]).T
    w2 = weight_norm_linear(params["head"]["clf"]["v"], params["head"]["clf"]["g"]).T
    w1p = jnp.pad(w1, ((0, cop_last - d), (0, dp - d)))
    w2p = jnp.pad(w2, ((0, dp - d), (0, cp - classes)))
    b1p = jnp.pad(params["head"]["lin"]["b"], (0, dp - d)).reshape(1, dp)
    b2p = jnp.pad(params["head"]["clf"]["b"], (0, cp - classes)).reshape(1, cp)
    inputs += [w1p.astype(_COMPUTE_DTYPE), b1p, w2p.astype(_COMPUTE_DTYPE), b2p]
    in_specs += [pl.BlockSpec((cop_last, dp), lambda n: (0, 0)),
                 pl.BlockSpec((1, dp), lambda n: (0, 0)),
                 pl.BlockSpec((dp, cp), lambda n: (0, 0)),
                 pl.BlockSpec((1, cp), lambda n: (0, 0))]

    scratch_shapes = [pltpu.VMEM((op["buf_rows"], op["cop"]), jnp.float32)
                      for op in plan if op["kind"] == "pool"]

    # Cost estimate with REAL (unpadded) channel counts.
    flops, trans, wbytes = 0, 0, 0
    for op in plan:
        if op["kind"] == "conv":
            hov, wov = op["Hv"] - 2, op["Wv"] - 2
            flops += 2 * hov * wov * 9 * op["cin"] * op["cout"]
            trans += hov * wov * op["cout"]
            wbytes += 4 * (9 * op["cin"] * op["cout"] + op["cout"])
    flops += 2 * (d * d + d * classes)
    trans += d
    wbytes += 4 * (d * d + d + d * classes + classes)
    cost = pl.CostEstimate(
        flops=N * flops,
        transcendentals=N * trans,
        bytes_accessed=4 * N * (Cin * H * W + classes) + wbytes,
    )

    kernel = _make_fused_kernel(plan, n_conv, alpha)
    out = pl.pallas_call(
        kernel,
        out_shape=jax.ShapeDtypeStruct((N * HEAD_ROWS, cp), jnp.float32),
        grid=(N,),
        in_specs=in_specs,
        out_specs=pl.BlockSpec((HEAD_ROWS, cp), lambda n: (n, 0)),
        scratch_shapes=scratch_shapes,
        compiler_params=pltpu.CompilerParams(
            dimension_semantics=("parallel",),      # per-image steps split across TCs
            vmem_limit_bytes=32 * 1024 * 1024,      # sized against v7x's 64 MiB VMEM
        ),
        cost_estimate=cost,
    )(*inputs)

    return out.reshape(N, HEAD_ROWS, cp)[:, 0, :classes]


def init_params(key, model_params):
    filters = model_params["filters"]
    prev = model_params["input_shape"][0]
    params = {"conv": [], "head": {}}
    for i, f in enumerate(filters):
        key, k1, k2, k3 = jax.random.split(key, 4)
        layer = {
            "v": jax.random.normal(k1, (f, prev, 3, 3), jnp.float32) * 0.1,
            "b": jax.random.normal(k3, (f,), jnp.float32) * 0.1,
            "weight_norm": i < 4,
        }
        if i < 4:
            layer["g"] = jax.random.uniform(k2, (f,), jnp.float32, 0.5, 1.5)
        params["conv"].append(layer)
        prev = f
    d = filters[-1]
    c = model_params["classes_nb"]
    key, k1, k2, k3 = jax.random.split(key, 4)
    params["head"]["lin"] = {
        "v": jax.random.normal(k1, (d, d), jnp.float32) * 0.1,
        "g": jax.random.uniform(k2, (d,), jnp.float32, 0.5, 1.5),
        "b": jax.random.normal(k3, (d,), jnp.float32) * 0.1,
    }
    key, k1, k2, k3 = jax.random.split(key, 4)
    params["head"]["clf"] = {
        "v": jax.random.normal(k1, (c, d), jnp.float32) * 0.1,
        "g": jax.random.uniform(k2, (c,), jnp.float32, 0.5, 1.5),
        "b": jax.random.normal(k3, (c,), jnp.float32) * 0.1,
    }
    return params


# ----------------------------------------------------------------------------
# Pure-JAX reference (correctness check)
# ----------------------------------------------------------------------------
def reference_forward(x, params, model_params):
    alpha = float(model_params["elu_alpha"])
    pf = model_params["pool_factor"]
    pool_positions = list(model_params["pool_positions"])
    pool_idx, block_idx = 0, 0

    def elu(z):
        return jnp.where(z > 0, z, alpha * (jnp.exp(z) - 1.0))

    for layer in params["conv"]:
        w = weight_norm_conv(layer["v"], layer["g"]) if layer["weight_norm"] else layer["v"]
        x = jax.lax.conv_general_dilated(
            x, w, (1, 1), "VALID", dimension_numbers=("NCHW", "OIHW", "NCHW"))
        x = elu(x + layer["b"].reshape(1, -1, 1, 1))
        block_idx += 1
        if pool_idx < len(pool_positions) and block_idx == pool_positions[pool_idx]:
            x = jax.lax.reduce_window(
                x, -jnp.inf, jax.lax.max, (1, 1, pf, pf), (1, 1, pf, pf), "VALID")
            pool_idx += 1
            block_idx += 1

    x = x.reshape(x.shape[0], -1)
    w_lin = weight_norm_linear(params["head"]["lin"]["v"], params["head"]["lin"]["g"])
    x = elu(x @ w_lin.T + params["head"]["lin"]["b"])
    w_clf = weight_norm_linear(params["head"]["clf"]["v"], params["head"]["clf"]["g"])
    x = x @ w_clf.T + params["head"]["clf"]["b"]
    return x


# ----------------------------------------------------------------------------
if __name__ == "__main__":
    # conv(12->10) -> pool(->5) -> conv(->3) -> conv(->1) => flatten dim == filters[-1]
    model_params = {
        "input_shape": (4, 12, 12),
        "filters": [8, 16, 16],
        "pool_positions": [1],
        "pool_factor": 2,
        "elu_alpha": 1.0,
        "classes_nb": 10,
    }

    key = jax.random.PRNGKey(0)
    key, kx = jax.random.split(key)
    x = jax.random.normal(kx, (2,) + model_params["input_shape"], jnp.float32)
    params = init_params(key, model_params)

    out = wn_vgglike_forward(x, params, model_params)
    out = jax.block_until_ready(out)

    ref = reference_forward(x, params, model_params)
    assert out.shape == (2, model_params["classes_nb"])
    np.testing.assert_allclose(np.asarray(out), np.asarray(ref), rtol=1e-3, atol=1e-3)

    print("KERNEL_OK")
</pallas_src>

<mosaic_0001>
module attributes {stable_mosaic.version = 11 : i64} {
  func.func @kernel(%arg0: i32, %arg1: memref<160x128xf32, #tpu.memory_space<vmem>>, %arg2: memref<9x128x128xf32, #tpu.memory_space<vmem>>, %arg3: memref<1x128xf32, #tpu.memory_space<vmem>>, %arg4: memref<9x128x128xf32, #tpu.memory_space<vmem>>, %arg5: memref<1x128xf32, #tpu.memory_space<vmem>>, %arg6: memref<9x128x128xf32, #tpu.memory_space<vmem>>, %arg7: memref<1x128xf32, #tpu.memory_space<vmem>>, %arg8: memref<128x128xf32, #tpu.memory_space<vmem>>, %arg9: memref<1x128xf32, #tpu.memory_space<vmem>>, %arg10: memref<128x128xf32, #tpu.memory_space<vmem>>, %arg11: memref<1x128xf32, #tpu.memory_space<vmem>>, %arg12: memref<8x128xf32, #tpu.memory_space<vmem>>, %arg13: memref<128x128xf32, #tpu.memory_space<vmem>>) attributes {dimension_semantics = [#tpu.dimension_semantics<parallel>], iteration_bounds = array<i64: 2>, scalar_prefetch = 0 : i64, scratch_operands = 1 : i64, tpu.core_type = #tpu.core_type<tc>, window_params = [{transform_indices = @transform_0, window_bounds = array<i64: 160, 128>}, {pipeline_mode = #tpu.pipeline_mode<synchronous>, transform_indices = @transform_1, window_bounds = array<i64: 9, 128, 128>}, {pipeline_mode = #tpu.pipeline_mode<synchronous>, transform_indices = @transform_2, window_bounds = array<i64: 1, 128>}, {pipeline_mode = #tpu.pipeline_mode<synchronous>, transform_indices = @transform_3, window_bounds = array<i64: 9, 128, 128>}, {pipeline_mode = #tpu.pipeline_mode<synchronous>, transform_indices = @transform_4, window_bounds = array<i64: 1, 128>}, {pipeline_mode = #tpu.pipeline_mode<synchronous>, transform_indices = @transform_5, window_bounds = array<i64: 9, 128, 128>}, {pipeline_mode = #tpu.pipeline_mode<synchronous>, transform_indices = @transform_6, window_bounds = array<i64: 1, 128>}, {pipeline_mode = #tpu.pipeline_mode<synchronous>, transform_indices = @transform_7, window_bounds = array<i64: 128, 128>}, {pipeline_mode = #tpu.pipeline_mode<synchronous>, transform_indices = @transform_8, window_bounds = array<i64: 1, 128>}, {pipeline_mode = #tpu.pipeline_mode<synchronous>, transform_indices = @transform_9, window_bounds = array<i64: 128, 128>}, {pipeline_mode = #tpu.pipeline_mode<synchronous>, transform_indices = @transform_10, window_bounds = array<i64: 1, 128>}, {transform_indices = @transform_11, window_bounds = array<i64: 8, 128>}]} {
    %cst = arith.constant 0.000000e+00 : f32
    %0 = vector.broadcast %cst : f32 to vector<128x128xf32>
    %c0 = arith.constant 0 : index
    %c0_0 = arith.constant 0 : index
    %1 = vector.load %arg1[%c0, %c0_0] : memref<160x128xf32, #tpu.memory_space<vmem>>, vector<128x128xf32>
    %c0_1 = arith.constant 0 : index
    %c0_2 = arith.constant 0 : index
    %c0_3 = arith.constant 0 : index
    %2 = vector.load %arg2[%c0_1, %c0_2, %c0_3] : memref<9x128x128xf32, #tpu.memory_space<vmem>>, vector<1x128x128xf32>
    %3 = vector.shape_cast %2 : vector<1x128x128xf32> to vector<128x128xf32>
    %cst_4 = arith.constant dense<0.000000e+00> : vector<128x128xf32>
    %4 = tpu.matmul %1, %3, %cst_4 {dimension_numbers = #tpu.dot_dimension_numbers<[1], [0], [0], [1], [0, 0, 1, 1], [], []>} : vector<128x128xf32>, vector<128x128xf32>, vector<128x128xf32> -> vector<128x128xf32>
    %5 = arith.addf %0, %4 : vector<128x128xf32>
    %c1 = arith.constant 1 : index
    %c0_5 = arith.constant 0 : index
    %6 = vector.load %arg1[%c1, %c0_5] : memref<160x128xf32, #tpu.memory_space<vmem>>, vector<128x128xf32>
    %c1_6 = arith.constant 1 : index
    %c0_7 = arith.constant 0 : index
    %c0_8 = arith.constant 0 : index
    %7 = vector.load %arg2[%c1_6, %c0_7, %c0_8] : memref<9x128x128xf32, #tpu.memory_space<vmem>>, vector<1x128x128xf32>
    %8 = vector.shape_cast %7 : vector<1x128x128xf32> to vector<128x128xf32>
    %cst_9 = arith.constant dense<0.000000e+00> : vector<128x128xf32>
    %9 = tpu.matmul %6, %8, %cst_9 {dimension_numbers = #tpu.dot_dimension_numbers<[1], [0], [0], [1], [0, 0, 1, 1], [], []>} : vector<128x128xf32>, vector<128x128xf32>, vector<128x128xf32> -> vector<128x128xf32>
    %10 = arith.addf %5, %9 : vector<128x128xf32>
    %c2 = arith.constant 2 : index
    %c0_10 = arith.constant 0 : index
    %11 = vector.load %arg1[%c2, %c0_10] : memref<160x128xf32, #tpu.memory_space<vmem>>, vector<128x128xf32>
    %c2_11 = arith.constant 2 : index
    %c0_12 = arith.constant 0 : index
    %c0_13 = arith.constant 0 : index
    %12 = vector.load %arg2[%c2_11, %c0_12, %c0_13] : memref<9x128x128xf32, #tpu.memory_space<vmem>>, vector<1x128x128xf32>
    %13 = vector.shape_cast %12 : vector<1x128x128xf32> to vector<128x128xf32>
    %cst_14 = arith.constant dense<0.000000e+00> : vector<128x128xf32>
    %14 = tpu.matmul %11, %13, %cst_14 {dimension_numbers = #tpu.dot_dimension_numbers<[1], [0], [0], [1], [0, 0, 1, 1], [], []>} : vector<128x128xf32>, vector<128x128xf32>, vector<128x128xf32> -> vector<128x128xf32>
    %15 = arith.addf %10, %14 : vector<128x128xf32>
    %c12 = arith.constant 12 : index
    %c0_15 = arith.constant 0 : index
    %16 = vector.load %arg1[%c12, %c0_15] : memref<160x128xf32, #tpu.memory_space<vmem>>, vector<128x128xf32>
    %c3 = arith.constant 3 : index
    %c0_16 = arith.constant 0 : index
    %c0_17 = arith.constant 0 : index
    %17 = vector.load %arg2[%c3, %c0_16, %c0_17] : memref<9x128x128xf32, #tpu.memory_space<vmem>>, vector<1x128x128xf32>
    %18 = vector.shape_cast %17 : vector<1x128x128xf32> to vector<128x128xf32>
    %cst_18 = arith.constant dense<0.000000e+00> : vector<128x128xf32>
    %19 = tpu.matmul %16, %18, %cst_18 {dimension_numbers = #tpu.dot_dimension_numbers<[1], [0], [0], [1], [0, 0, 1, 1], [], []>} : vector<128x128xf32>, vector<128x128xf32>, vector<128x128xf32> -> vector<128x128xf32>
    %20 = arith.addf %15, %19 : vector<128x128xf32>
    %c13 = arith.constant 13 : index
    %c0_19 = arith.constant 0 : index
    %21 = vector.load %arg1[%c13, %c0_19] : memref<160x128xf32, #tpu.memory_space<vmem>>, vector<128x128xf32>
    %c4 = arith.constant 4 : index
    %c0_20 = arith.constant 0 : index
    %c0_21 = arith.constant 0 : index
    %22 = vector.load %arg2[%c4, %c0_20, %c0_21] : memref<9x128x128xf32, #tpu.memory_space<vmem>>, vector<1x128x128xf32>
    %23 = vector.shape_cast %22 : vector<1x128x128xf32> to vector<128x128xf32>
    %cst_22 = arith.constant dense<0.000000e+00> : vector<128x128xf32>
    %24 = tpu.matmul %21, %23, %cst_22 {dimension_numbers = #tpu.dot_dimension_numbers<[1], [0], [0], [1], [0, 0, 1, 1], [], []>} : vector<128x128xf32>, vector<128x128xf32>, vector<128x128xf32> -> vector<128x128xf32>
    %25 = arith.addf %20, %24 : vector<128x128xf32>
    %c14 = arith.constant 14 : index
    %c0_23 = arith.constant 0 : index
    %26 = vector.load %arg1[%c14, %c0_23] : memref<160x128xf32, #tpu.memory_space<vmem>>, vector<128x128xf32>
    %c5 = arith.constant 5 : index
    %c0_24 = arith.constant 0 : index
    %c0_25 = arith.constant 0 : index
    %27 = vector.load %arg2[%c5, %c0_24, %c0_25] : memref<9x128x128xf32, #tpu.memory_space<vmem>>, vector<1x128x128xf32>
    %28 = vector.shape_cast %27 : vector<1x128x128xf32> to vector<128x128xf32>
    %cst_26 = arith.constant dense<0.000000e+00> : vector<128x128xf32>
    %29 = tpu.matmul %26, %28, %cst_26 {dimension_numbers = #tpu.dot_dimension_numbers<[1], [0], [0], [1], [0, 0, 1, 1], [], []>} : vector<128x128xf32>, vector<128x128xf32>, vector<128x128xf32> -> vector<128x128xf32>
    %30 = arith.addf %25, %29 : vector<128x128xf32>
    %c24 = arith.constant 24 : index
    %c0_27 = arith.constant 0 : index
    %31 = vector.load %arg1[%c24, %c0_27] : memref<160x128xf32, #tpu.memory_space<vmem>>, vector<128x128xf32>
    %c6 = arith.constant 6 : index
    %c0_28 = arith.constant 0 : index
    %c0_29 = arith.constant 0 : index
    %32 = vector.load %arg2[%c6, %c0_28, %c0_29] : memref<9x128x128xf32, #tpu.memory_space<vmem>>, vector<1x128x128xf32>
    %33 = vector.shape_cast %32 : vector<1x128x128xf32> to vector<128x128xf32>
    %cst_30 = arith.constant dense<0.000000e+00> : vector<128x128xf32>
    %34 = tpu.matmul %31, %33, %cst_30 {dimension_numbers = #tpu.dot_dimension_numbers<[1], [0], [0], [1], [0, 0, 1, 1], [], []>} : vector<128x128xf32>, vector<128x128xf32>, vector<128x128xf32> -> vector<128x128xf32>
    %35 = arith.addf %30, %34 : vector<128x128xf32>
    %c25 = arith.constant 25 : index
    %c0_31 = arith.constant 0 : index
    %36 = vector.load %arg1[%c25, %c0_31] : memref<160x128xf32, #tpu.memory_space<vmem>>, vector<128x128xf32>
    %c7 = arith.constant 7 : index
    %c0_32 = arith.constant 0 : index
    %c0_33 = arith.constant 0 : index
    %37 = vector.load %arg2[%c7, %c0_32, %c0_33] : memref<9x128x128xf32, #tpu.memory_space<vmem>>, vector<1x128x128xf32>
    %38 = vector.shape_cast %37 : vector<1x128x128xf32> to vector<128x128xf32>
    %cst_34 = arith.constant dense<0.000000e+00> : vector<128x128xf32>
    %39 = tpu.matmul %36, %38, %cst_34 {dimension_numbers = #tpu.dot_dimension_numbers<[1], [0], [0], [1], [0, 0, 1, 1], [], []>} : vector<128x128xf32>, vector<128x128xf32>, vector<128x128xf32> -> vector<128x128xf32>
    %40 = arith.addf %35, %39 : vector<128x128xf32>
    %c26 = arith.constant 26 : index
    %c0_35 = arith.constant 0 : index
    %41 = vector.load %arg1[%c26, %c0_35] : memref<160x128xf32, #tpu.memory_space<vmem>>, vector<128x128xf32>
    %c8 = arith.constant 8 : index
    %c0_36 = arith.constant 0 : index
    %c0_37 = arith.constant 0 : index
    %42 = vector.load %arg2[%c8, %c0_36, %c0_37] : memref<9x128x128xf32, #tpu.memory_space<vmem>>, vector<1x128x128xf32>
    %43 = vector.shape_cast %42 : vector<1x128x128xf32> to vector<128x128xf32>
    %cst_38 = arith.constant dense<0.000000e+00> : vector<128x128xf32>
    %44 = tpu.matmul %41, %43, %cst_38 {dimension_numbers = #tpu.dot_dimension_numbers<[1], [0], [0], [1], [0, 0, 1, 1], [], []>} : vector<128x128xf32>, vector<128x128xf32>, vector<128x128xf32> -> vector<128x128xf32>
    %45 = arith.addf %40, %44 : vector<128x128xf32>
    %c0_39 = arith.constant 0 : index
    %c0_40 = arith.constant 0 : index
    %46 = vector.load %arg3[%c0_39, %c0_40] : memref<1x128xf32, #tpu.memory_space<vmem>>, vector<1x128xf32>
    %47 = vector.broadcast %46 : vector<1x128xf32> to vector<128x128xf32>
    %48 = arith.addf %45, %47 : vector<128x128xf32>
    %cst_41 = arith.constant 0.000000e+00 : f32
    %49 = vector.broadcast %cst_41 : f32 to vector<128x128xf32>
    %50 = arith.cmpf ogt, %48, %49 : vector<128x128xf32>
    %51 = math.exp %48 : vector<128x128xf32>
    %cst_42 = arith.constant 1.000000e+00 : f32
    %52 = vector.broadcast %cst_42 : f32 to vector<128x128xf32>
    %53 = arith.subf %51, %52 : vector<128x128xf32>
    %cst_43 = arith.constant 1.000000e+00 : f32
    %54 = vector.broadcast %cst_43 : f32 to vector<128x128xf32>
    %55 = arith.mulf %54, %53 : vector<128x128xf32>
    %56 = arith.select %50, %48, %55 : vector<128x128xi1>, vector<128x128xf32>
    %c0_44 = arith.constant 0 : index
    %c0_45 = arith.constant 0 : index
    %57 = vector.load %arg13[%c0_44, %c0_45] : memref<128x128xf32, #tpu.memory_space<vmem>>, vector<128x128xf32>
    tpu.vector_store %arg13[%c0_44, %c0_45], %56 {strides = array<i32>} : memref<128x128xf32, #tpu.memory_space<vmem>>, vector<128x128xf32>,
    %c0_46 = arith.constant 0 : index
    %c0_47 = arith.constant 0 : index
    %58 = vector.load %arg13[%c0_46, %c0_47] : memref<128x128xf32, #tpu.memory_space<vmem>>, vector<112x128xf32>
    %c1_48 = arith.constant 1 : index
    %c0_49 = arith.constant 0 : index
    %59 = vector.load %arg13[%c1_48, %c0_49] : memref<128x128xf32, #tpu.memory_space<vmem>>, vector<112x128xf32>
    %60 = arith.maximumf %58, %59 : vector<112x128xf32>
    %c12_50 = arith.constant 12 : index
    %c0_51 = arith.constant 0 : index
    %61 = vector.load %arg13[%c12_50, %c0_51] : memref<128x128xf32, #tpu.memory_space<vmem>>, vector<112x128xf32>
    %62 = arith.maximumf %60, %61 : vector<112x128xf32>
    %c13_52 = arith.constant 13 : index
    %c0_53 = arith.constant 0 : index
    %63 = vector.load %arg13[%c13_52, %c0_53] : memref<128x128xf32, #tpu.memory_space<vmem>>, vector<112x128xf32>
    %64 = arith.maximumf %62, %63 : vector<112x128xf32>
    %c0_54 = arith.constant 0 : index
    %c0_55 = arith.constant 0 : index
    %65 = vector.load %arg13[%c0_54, %c0_55] : memref<128x128xf32, #tpu.memory_space<vmem>>, vector<112x128xf32>
    tpu.vector_store %arg13[%c0_54, %c0_55], %64 {strides = array<i32>} : memref<128x128xf32, #tpu.memory_space<vmem>>, vector<112x128xf32>,
    %c0_56 = arith.constant 0 : index
    %c0_57 = arith.constant 0 : index
    %66 = tpu.strided_load %arg13[%c0_56, %c0_57] {strides = array<i32: 2, 1>} : memref<128x128xf32, #tpu.memory_space<vmem>>, vector<8x128xf32>
    %c24_58 = arith.constant 24 : index
    %c0_59 = arith.constant 0 : index
    %67 = tpu.strided_load %arg13[%c24_58, %c0_59] {strides = array<i32: 2, 1>} : memref<128x128xf32, #tpu.memory_space<vmem>>, vector<8x128xf32>
    %c48 = arith.constant 48 : index
    %c0_60 = arith.constant 0 : index
    %68 = tpu.strided_load %arg13[%c48, %c0_60] {strides = array<i32: 2, 1>} : memref<128x128xf32, #tpu.memory_space<vmem>>, vector<8x128xf32>
    %c72 = arith.constant 72 : index
    %c0_61 = arith.constant 0 : index
    %69 = tpu.strided_load %arg13[%c72, %c0_61] {strides = array<i32: 2, 1>} : memref<128x128xf32, #tpu.memory_space<vmem>>, vector<8x128xf32>
    %c96 = arith.constant 96 : index
    %c0_62 = arith.constant 0 : index
    %70 = tpu.strided_load %arg13[%c96, %c0_62] {strides = array<i32: 2, 1>} : memref<128x128xf32, #tpu.memory_space<vmem>>, vector<8x128xf32>
    %71 = tpu.concatenate %66, %67, %68, %69, %70 in 0 : vector<8x128xf32>, vector<8x128xf32>, vector<8x128xf32>, vector<8x128xf32>, vector<8x128xf32> -> vector<40x128xf32>
    %cst_63 = arith.constant 0.000000e+00 : f32
    %72 = vector.broadcast %cst_63 : f32 to vector<16x128xf32>
    %73 = tpu.concatenate %71, %72 in 0 : vector<40x128xf32>, vector<16x128xf32> -> vector<56x128xf32>
    %cst_64 = arith.constant 0.000000e+00 : f32
    %74 = vector.broadcast %cst_64 : f32 to vector<32x128xf32>
    %75 = vector.extract_strided_slice %73 {offsets = [0, 0], sizes = [32, 128], strides = [1, 1]} : vector<56x128xf32> to vector<32x128xf32>
    %c0_65 = arith.constant 0 : index
    %c0_66 = arith.constant 0 : index
    %c0_67 = arith.constant 0 : index
    %76 = vector.load %arg4[%c0_65, %c0_66, %c0_67] : memref<9x128x128xf32, #tpu.memory_space<vmem>>, vector<1x128x128xf32>
    %77 = vector.shape_cast %76 : vector<1x128x128xf32> to vector<128x128xf32>
    %cst_68 = arith.constant dense<0.000000e+00> : vector<32x128xf32>
    %78 = tpu.matmul %75, %77, %cst_68 {dimension_numbers = #tpu.dot_dimension_numbers<[1], [0], [0], [1], [0, 0, 1, 1], [], []>} : vector<32x128xf32>, vector<128x128xf32>, vector<32x128xf32> -> vector<32x128xf32>
    %79 = arith.addf %74, %78 : vector<32x128xf32>
    %80 = vector.extract_strided_slice %73 {offsets = [1, 0], sizes = [32, 128], strides = [1, 1]} : vector<56x128xf32> to vector<32x128xf32>
    %c1_69 = arith.constant 1 : index
    %c0_70 = arith.constant 0 : index
    %c0_71 = arith.constant 0 : index
    %81 = vector.load %arg4[%c1_69, %c0_70, %c0_71] : memref<9x128x128xf32, #tpu.memory_space<vmem>>, vector<1x128x128xf32>
    %82 = vector.shape_cast %81 : vector<1x128x128xf32> to vector<128x128xf32>
    %cst_72 = arith.constant dense<0.000000e+00> : vector<32x128xf32>
    %83 = tpu.matmul %80, %82, %cst_72 {dimension_numbers = #tpu.dot_dimension_numbers<[1], [0], [0], [1], [0, 0, 1, 1], [], []>} : vector<32x128xf32>, vector<128x128xf32>, vector<32x128xf32> -> vector<32x128xf32>
    %84 = arith.addf %79, %83 : vector<32x128xf32>
    %85 = vector.extract_strided_slice %73 {offsets = [2, 0], sizes = [32, 128], strides = [1, 1]} : vector<56x128xf32> to vector<32x128xf32>
    %c2_73 = arith.constant 2 : index
    %c0_74 = arith.constant 0 : index
    %c0_75 = arith.constant 0 : index
    %86 = vector.load %arg4[%c2_73, %c0_74, %c0_75] : memref<9x128x128xf32, #tpu.memory_space<vmem>>, vector<1x128x128xf32>
    %87 = vector.shape_cast %86 : vector<1x128x128xf32> to vector<128x128xf32>
    %cst_76 = arith.constant dense<0.000000e+00> : vector<32x128xf32>
    %88 = tpu.matmul %85, %87, %cst_76 {dimension_numbers = #tpu.dot_dimension_numbers<[1], [0], [0], [1], [0, 0, 1, 1], [], []>} : vector<32x128xf32>, vector<128x128xf32>, vector<32x128xf32> -> vector<32x128xf32>
    %89 = arith.addf %84, %88 : vector<32x128xf32>
    %90 = vector.extract_strided_slice %73 {offsets = [8, 0], sizes = [32, 128], strides = [1, 1]} : vector<56x128xf32> to vector<32x128xf32>
    %c3_77 = arith.constant 3 : index
    %c0_78 = arith.constant 0 : index
    %c0_79 = arith.constant 0 : index
    %91 = vector.load %arg4[%c3_77, %c0_78, %c0_79] : memref<9x128x128xf32, #tpu.memory_space<vmem>>, vector<1x128x128xf32>
    %92 = vector.shape_cast %91 : vector<1x128x128xf32> to vector<128x128xf32>
    %cst_80 = arith.constant dense<0.000000e+00> : vector<32x128xf32>
    %93 = tpu.matmul %90, %92, %cst_80 {dimension_numbers = #tpu.dot_dimension_numbers<[1], [0], [0], [1], [0, 0, 1, 1], [], []>} : vector<32x128xf32>, vector<128x128xf32>, vector<32x128xf32> -> vector<32x128xf32>
    %94 = arith.addf %89, %93 : vector<32x128xf32>
    %95 = vector.extract_strided_slice %73 {offsets = [9, 0], sizes = [32, 128], strides = [1, 1]} : vector<56x128xf32> to vector<32x128xf32>
    %c4_81 = arith.constant 4 : index
    %c0_82 = arith.constant 0 : index
    %c0_83 = arith.constant 0 : index
    %96 = vector.load %arg4[%c4_81, %c0_82, %c0_83] : memref<9x128x128xf32, #tpu.memory_space<vmem>>, vector<1x128x128xf32>
    %97 = vector.shape_cast %96 : vector<1x128x128xf32> to vector<128x128xf32>
    %cst_84 = arith.constant dense<0.000000e+00> : vector<32x128xf32>
    %98 = tpu.matmul %95, %97, %cst_84 {dimension_numbers = #tpu.dot_dimension_numbers<[1], [0], [0], [1], [0, 0, 1, 1], [], []>} : vector<32x128xf32>, vector<128x128xf32>, vector<32x128xf32> -> vector<32x128xf32>
    %99 = arith.addf %94, %98 : vector<32x128xf32>
    %100 = vector.extract_strided_slice %73 {offsets = [10, 0], sizes = [32, 128], strides = [1, 1]} : vector<56x128xf32> to vector<32x128xf32>
    %c5_85 = arith.constant 5 : index
    %c0_86 = arith.constant 0 : index
    %c0_87 = arith.constant 0 : index
    %101 = vector.load %arg4[%c5_85, %c0_86, %c0_87] : memref<9x128x128xf32, #tpu.memory_space<vmem>>, vector<1x128x128xf32>
    %102 = vector.shape_cast %101 : vector<1x128x128xf32> to vector<128x128xf32>
    %cst_88 = arith.constant dense<0.000000e+00> : vector<32x128xf32>
    %103 = tpu.matmul %100, %102, %cst_88 {dimension_numbers = #tpu.dot_dimension_numbers<[1], [0], [0], [1], [0, 0, 1, 1], [], []>} : vector<32x128xf32>, vector<128x128xf32>, vector<32x128xf32> -> vector<32x128xf32>
    %104 = arith.addf %99, %103 : vector<32x128xf32>
    %105 = vector.extract_strided_slice %73 {offsets = [16, 0], sizes = [32, 128], strides = [1, 1]} : vector<56x128xf32> to vector<32x128xf32>
    %c6_89 = arith.constant 6 : index
    %c0_90 = arith.constant 0 : index
    %c0_91 = arith.constant 0 : index
    %106 = vector.load %arg4[%c6_89, %c0_90, %c0_91] : memref<9x128x128xf32, #tpu.memory_space<vmem>>, vector<1x128x128xf32>
    %107 = vector.shape_cast %106 : vector<1x128x128xf32> to vector<128x128xf32>
    %cst_92 = arith.constant dense<0.000000e+00> : vector<32x128xf32>
    %108 = tpu.matmul %105, %107, %cst_92 {dimension_numbers = #tpu.dot_dimension_numbers<[1], [0], [0], [1], [0, 0, 1, 1], [], []>} : vector<32x128xf32>, vector<128x128xf32>, vector<32x128xf32> -> vector<32x128xf32>
    %109 = arith.addf %104, %108 : vector<32x128xf32>
    %110 = vector.extract_strided_slice %73 {offsets = [17, 0], sizes = [32, 128], strides = [1, 1]} : vector<56x128xf32> to vector<32x128xf32>
    %c7_93 = arith.constant 7 : index
    %c0_94 = arith.constant 0 : index
    %c0_95 = arith.constant 0 : index
    %111 = vector.load %arg4[%c7_93, %c0_94, %c0_95] : memref<9x128x128xf32, #tpu.memory_space<vmem>>, vector<1x128x128xf32>
    %112 = vector.shape_cast %111 : vector<1x128x128xf32> to vector<128x128xf32>
    %cst_96 = arith.constant dense<0.000000e+00> : vector<32x128xf32>
    %113 = tpu.matmul %110, %112, %cst_96 {dimension_numbers = #tpu.dot_dimension_numbers<[1], [0], [0], [1], [0, 0, 1, 1], [], []>} : vector<32x128xf32>, vector<128x128xf32>, vector<32x128xf32> -> vector<32x128xf32>
    %114 = arith.addf %109, %113 : vector<32x128xf32>
    %115 = vector.extract_strided_slice %73 {offsets = [18, 0], sizes = [32, 128], strides = [1, 1]} : vector<56x128xf32> to vector<32x128xf32>
    %c8_97 = arith.constant 8 : index
    %c0_98 = arith.constant 0 : index
    %c0_99 = arith.constant 0 : index
    %116 = vector.load %arg4[%c8_97, %c0_98, %c0_99] : memref<9x128x128xf32, #tpu.memory_space<vmem>>, vector<1x128x128xf32>
    %117 = vector.shape_cast %116 : vector<1x128x128xf32> to vector<128x128xf32>
    %cst_100 = arith.constant dense<0.000000e+00> : vector<32x128xf32>
    %118 = tpu.matmul %115, %117, %cst_100 {dimension_numbers = #tpu.dot_dimension_numbers<[1], [0], [0], [1], [0, 0, 1, 1], [], []>} : vector<32x128xf32>, vector<128x128xf32>, vector<32x128xf32> -> vector<32x128xf32>
    %119 = arith.addf %114, %118 : vector<32x128xf32>
    %c0_101 = arith.constant 0 : index
    %c0_102 = arith.constant 0 : index
    %120 = vector.load %arg5[%c0_101, %c0_102] : memref<1x128xf32, #tpu.memory_space<vmem>>, vector<1x128xf32>
    %121 = vector.broadcast %120 : vector<1x128xf32> to vector<32x128xf32>
    %122 = arith.addf %119, %121 : vector<32x128xf32>
    %cst_103 = arith.constant 0.000000e+00 : f32
    %123 = vector.broadcast %cst_103 : f32 to vector<32x128xf32>
    %124 = arith.cmpf ogt, %122, %123 : vector<32x128xf32>
    %125 = math.exp %122 : vector<32x128xf32>
    %cst_104 = arith.constant 1.000000e+00 : f32
    %126 = vector.broadcast %cst_104 : f32 to vector<32x128xf32>
    %127 = arith.subf %125, %126 : vector<32x128xf32>
    %cst_105 = arith.constant 1.000000e+00 : f32
    %128 = vector.broadcast %cst_105 : f32 to vector<32x128xf32>
    %129 = arith.mulf %128, %127 : vector<32x128xf32>
    %130 = arith.select %124, %122, %129 : vector<32x128xi1>, vector<32x128xf32>
    %cst_106 = arith.constant 0.000000e+00 : f32
    %131 = vector.broadcast %cst_106 : f32 to vector<8x128xf32>
    %132 = vector.extract_strided_slice %130 {offsets = [0, 0], sizes = [8, 128], strides = [1, 1]} : vector<32x128xf32> to vector<8x128xf32>
    %c0_107 = arith.constant 0 : index
    %c0_108 = arith.constant 0 : index
    %c0_109 = arith.constant 0 : index
    %133 = vector.load %arg6[%c0_107, %c0_108, %c0_109] : memref<9x128x128xf32, #tpu.memory_space<vmem>>, vector<1x128x128xf32>
    %134 = vector.shape_cast %133 : vector<1x128x128xf32> to vector<128x128xf32>
    %cst_110 = arith.constant dense<0.000000e+00> : vector<8x128xf32>
    %135 = tpu.matmul %132, %134, %cst_110 {dimension_numbers = #tpu.dot_dimension_numbers<[1], [0], [0], [1], [0, 0, 1, 1], [], []>} : vector<8x128xf32>, vector<128x128xf32>, vector<8x128xf32> -> vector<8x128xf32>
    %136 = arith.addf %131, %135 : vector<8x128xf32>
    %137 = vector.extract_strided_slice %130 {offsets = [1, 0], sizes = [8, 128], strides = [1, 1]} : vector<32x128xf32> to vector<8x128xf32>
    %c1_111 = arith.constant 1 : index
    %c0_112 = arith.constant 0 : index
    %c0_113 = arith.constant 0 : index
    %138 = vector.load %arg6[%c1_111, %c0_112, %c0_113] : memref<9x128x128xf32, #tpu.memory_space<vmem>>, vector<1x128x128xf32>
    %139 = vector.shape_cast %138 : vector<1x128x128xf32> to vector<128x128xf32>
    %cst_114 = arith.constant dense<0.000000e+00> : vector<8x128xf32>
    %140 = tpu.matmul %137, %139, %cst_114 {dimension_numbers = #tpu.dot_dimension_numbers<[1], [0], [0], [1], [0, 0, 1, 1], [], []>} : vector<8x128xf32>, vector<128x128xf32>, vector<8x128xf32> -> vector<8x128xf32>
    %141 = arith.addf %136, %140 : vector<8x128xf32>
    %142 = vector.extract_strided_slice %130 {offsets = [2, 0], sizes = [8, 128], strides = [1, 1]} : vector<32x128xf32> to vector<8x128xf32>
    %c2_115 = arith.constant 2 : index
    %c0_116 = arith.constant 0 : index
    %c0_117 = arith.constant 0 : index
    %143 = vector.load %arg6[%c2_115, %c0_116, %c0_117] : memref<9x128x128xf32, #tpu.memory_space<vmem>>, vector<1x128x128xf32>
    %144 = vector.shape_cast %143 : vector<1x128x128xf32> to vector<128x128xf32>
    %cst_118 = arith.constant dense<0.000000e+00> : vector<8x128xf32>
    %145 = tpu.matmul %142, %144, %cst_118 {dimension_numbers = #tpu.dot_dimension_numbers<[1], [0], [0], [1], [0, 0, 1, 1], [], []>} : vector<8x128xf32>, vector<128x128xf32>, vector<8x128xf32> -> vector<8x128xf32>
    %146 = arith.addf %141, %145 : vector<8x128xf32>
    %147 = vector.extract_strided_slice %130 {offsets = [8, 0], sizes = [8, 128], strides = [1, 1]} : vector<32x128xf32> to vector<8x128xf32>
    %c3_119 = arith.constant 3 : index
    %c0_120 = arith.constant 0 : index
    %c0_121 = arith.constant 0 : index
    %148 = vector.load %arg6[%c3_119, %c0_120, %c0_121] : memref<9x128x128xf32, #tpu.memory_space<vmem>>, vector<1x128x128xf32>
    %149 = vector.shape_cast %148 : vector<1x128x128xf32> to vector<128x128xf32>
    %cst_122 = arith.constant dense<0.000000e+00> : vector<8x128xf32>
    %150 = tpu.matmul %147, %149, %cst_122 {dimension_numbers = #tpu.dot_dimension_numbers<[1], [0], [0], [1], [0, 0, 1, 1], [], []>} : vector<8x128xf32>, vector<128x128xf32>, vector<8x128xf32> -> vector<8x128xf32>
    %151 = arith.addf %146, %150 : vector<8x128xf32>
    %152 = vector.extract_strided_slice %130 {offsets = [9, 0], sizes = [8, 128], strides = [1, 1]} : vector<32x128xf32> to vector<8x128xf32>
    %c4_123 = arith.constant 4 : index
    %c0_124 = arith.constant 0 : index
    %c0_125 = arith.constant 0 : index
    %153 = vector.load %arg6[%c4_123, %c0_124, %c0_125] : memref<9x128x128xf32, #tpu.memory_space<vmem>>, vector<1x128x128xf32>
    %154 = vector.shape_cast %153 : vector<1x128x128xf32> to vector<128x128xf32>
    %cst_126 = arith.constant dense<0.000000e+00> : vector<8x128xf32>
    %155 = tpu.matmul %152, %154, %cst_126 {dimension_numbers = #tpu.dot_dimension_numbers<[1], [0], [0], [1], [0, 0, 1, 1], [], []>} : vector<8x128xf32>, vector<128x128xf32>, vector<8x128xf32> -> vector<8x128xf32>
    %156 = arith.addf %151, %155 : vector<8x128xf32>
    %157 = vector.extract_strided_slice %130 {offsets = [10, 0], sizes = [8, 128], strides = [1, 1]} : vector<32x128xf32> to vector<8x128xf32>
    %c5_127 = arith.constant 5 : index
    %c0_128 = arith.constant 0 : index
    %c0_129 = arith.constant 0 : index
    %158 = vector.load %arg6[%c5_127, %c0_128, %c0_129] : memref<9x128x128xf32, #tpu.memory_space<vmem>>, vector<1x128x128xf32>
    %159 = vector.shape_cast %158 : vector<1x128x128xf32> to vector<128x128xf32>
    %cst_130 = arith.constant dense<0.000000e+00> : vector<8x128xf32>
    %160 = tpu.matmul %157, %159, %cst_130 {dimension_numbers = #tpu.dot_dimension_numbers<[1], [0], [0], [1], [0, 0, 1, 1], [], []>} : vector<8x128xf32>, vector<128x128xf32>, vector<8x128xf32> -> vector<8x128xf32>
    %161 = arith.addf %156, %160 : vector<8x128xf32>
    %162 = vector.extract_strided_slice %130 {offsets = [16, 0], sizes = [8, 128], strides = [1, 1]} : vector<32x128xf32> to vector<8x128xf32>
    %c6_131 = arith.constant 6 : index
    %c0_132 = arith.constant 0 : index
    %c0_133 = arith.constant 0 : index
    %163 = vector.load %arg6[%c6_131, %c0_132, %c0_133] : memref<9x128x128xf32, #tpu.memory_space<vmem>>, vector<1x128x128xf32>
    %164 = vector.shape_cast %163 : vector<1x128x128xf32> to vector<128x128xf32>
    %cst_134 = arith.constant dense<0.000000e+00> : vector<8x128xf32>
    %165 = tpu.matmul %162, %164, %cst_134 {dimension_numbers = #tpu.dot_dimension_numbers<[1], [0], [0], [1], [0, 0, 1, 1], [], []>} : vector<8x128xf32>, vector<128x128xf32>, vector<8x128xf32> -> vector<8x128xf32>
    %166 = arith.addf %161, %165 : vector<8x128xf32>
    %167 = vector.extract_strided_slice %130 {offsets = [17, 0], sizes = [8, 128], strides = [1, 1]} : vector<32x128xf32> to vector<8x128xf32>
    %c7_135 = arith.constant 7 : index
    %c0_136 = arith.constant 0 : index
    %c0_137 = arith.constant 0 : index
    %168 = vector.load %arg6[%c7_135, %c0_136, %c0_137] : memref<9x128x128xf32, #tpu.memory_space<vmem>>, vector<1x128x128xf32>
    %169 = vector.shape_cast %168 : vector<1x128x128xf32> to vector<128x128xf32>
    %cst_138 = arith.constant dense<0.000000e+00> : vector<8x128xf32>
    %170 = tpu.matmul %167, %169, %cst_138 {dimension_numbers = #tpu.dot_dimension_numbers<[1], [0], [0], [1], [0, 0, 1, 1], [], []>} : vector<8x128xf32>, vector<128x128xf32>, vector<8x128xf32> -> vector<8x128xf32>
    %171 = arith.addf %166, %170 : vector<8x128xf32>
    %172 = vector.extract_strided_slice %130 {offsets = [18, 0], sizes = [8, 128], strides = [1, 1]} : vector<32x128xf32> to vector<8x128xf32>
    %c8_139 = arith.constant 8 : index
    %c0_140 = arith.constant 0 : index
    %c0_141 = arith.constant 0 : index
    %173 = vector.load %arg6[%c8_139, %c0_140, %c0_141] : memref<9x128x128xf32, #tpu.memory_space<vmem>>, vector<1x128x128xf32>
    %174 = vector.shape_cast %173 : vector<1x128x128xf32> to vector<128x128xf32>
    %cst_142 = arith.constant dense<0.000000e+00> : vector<8x128xf32>
    %175 = tpu.matmul %172, %174, %cst_142 {dimension_numbers = #tpu.dot_dimension_numbers<[1], [0], [0], [1], [0, 0, 1, 1], [], []>} : vector<8x128xf32>, vector<128x128xf32>, vector<8x128xf32> -> vector<8x128xf32>
    %176 = arith.addf %171, %175 : vector<8x128xf32>
    %c0_143 = arith.constant 0 : index
    %c0_144 = arith.constant 0 : index
    %177 = vector.load %arg7[%c0_143, %c0_144] : memref<1x128xf32, #tpu.memory_space<vmem>>, vector<1x128xf32>
    %178 = vector.broadcast %177 : vector<1x128xf32> to vector<8x128xf32>
    %179 = arith.addf %176, %178 : vector<8x128xf32>
    %cst_145 = arith.constant 0.000000e+00 : f32
    %180 = vector.broadcast %cst_145 : f32 to vector<8x128xf32>
    %181 = arith.cmpf ogt, %179, %180 : vector<8x128xf32>
    %182 = math.exp %179 : vector<8x128xf32>
    %cst_146 = arith.constant 1.000000e+00 : f32
    %183 = vector.broadcast %cst_146 : f32 to vector<8x128xf32>
    %184 = arith.subf %182, %183 : vector<8x128xf32>
    %cst_147 = arith.constant 1.000000e+00 : f32
    %185 = vector.broadcast %cst_147 : f32 to vector<8x128xf32>
    %186 = arith.mulf %185, %184 : vector<8x128xf32>
    %187 = arith.select %181, %179, %186 : vector<8x128xi1>, vector<8x128xf32>
    %c0_148 = arith.constant 0 : index
    %c0_149 = arith.constant 0 : index
    %188 = vector.load %arg8[%c0_148, %c0_149] : memref<128x128xf32, #tpu.memory_space<vmem>>, vector<128x128xf32>
    %cst_150 = arith.constant dense<0.000000e+00> : vector<8x128xf32>
    %189 = tpu.matmul %187, %188, %cst_150 {dimension_numbers = #tpu.dot_dimension_numbers<[1], [0], [0], [1], [0, 0, 1, 1], [], []>} : vector<8x128xf32>, vector<128x128xf32>, vector<8x128xf32> -> vector<8x128xf32>
    %c0_151 = arith.constant 0 : index
    %c0_152 = arith.constant 0 : index
    %190 = vector.load %arg9[%c0_151, %c0_152] : memref<1x128xf32, #tpu.memory_space<vmem>>, vector<1x128xf32>
    %191 = vector.broadcast %190 : vector<1x128xf32> to vector<8x128xf32>
    %192 = arith.addf %189, %191 : vector<8x128xf32>
    %cst_153 = arith.constant 0.000000e+00 : f32
    %193 = vector.broadcast %cst_153 : f32 to vector<8x128xf32>
    %194 = arith.cmpf ogt, %192, %193 : vector<8x128xf32>
    %195 = math.exp %192 : vector<8x128xf32>
    %cst_154 = arith.constant 1.000000e+00 : f32
    %196 = vector.broadcast %cst_154 : f32 to vector<8x128xf32>
    %197 = arith.subf %195, %196 : vector<8x128xf32>
    %cst_155 = arith.constant 1.000000e+00 : f32
    %198 = vector.broadcast %cst_155 : f32 to vector<8x128xf32>
    %199 = arith.mulf %198, %197 : vector<8x128xf32>
    %200 = arith.select %194, %192, %199 : vector<8x128xi1>, vector<8x128xf32>
    %c0_156 = arith.constant 0 : index
    %c0_157 = arith.constant 0 : index
    %201 = vector.load %arg10[%c0_156, %c0_157] : memref<128x128xf32, #tpu.memory_space<vmem>>, vector<128x128xf32>
    %cst_158 = arith.constant dense<0.000000e+00> : vector<8x128xf32>
    %202 = tpu.matmul %200, %201, %cst_158 {dimension_numbers = #tpu.dot_dimension_numbers<[1], [0], [0], [1], [0, 0, 1, 1], [], []>} : vector<8x128xf32>, vector<128x128xf32>, vector<8x128xf32> -> vector<8x128xf32>
    %c0_159 = arith.constant 0 : index
    %c0_160 = arith.constant 0 : index
    %203 = vector.load %arg11[%c0_159, %c0_160] : memref<1x128xf32, #tpu.memory_space<vmem>>, vector<1x128xf32>
    %204 = vector.broadcast %203 : vector<1x128xf32> to vector<8x128xf32>
    %205 = arith.addf %202, %204 : vector<8x128xf32>
    %c0_161 = arith.constant 0 : index
    %c0_162 = arith.constant 0 : index
    %206 = vector.load %arg12[%c0_161, %c0_162] : memref<8x128xf32, #tpu.memory_space<vmem>>, vector<8x128xf32>
    tpu.vector_store %arg12[%c0_161, %c0_162], %205 {strides = array<i32>} : memref<8x128xf32, #tpu.memory_space<vmem>>, vector<8x128xf32>,
    return
  }
  func.func @transform_0(%arg0: i32) -> (i32, i32) {
    %c0_i32 = arith.constant 0 : i32
    %c0_i32_0 = arith.constant 0 : i32
    return %arg0, %c0_i32 : i32, i32
  }
  func.func @transform_1(%arg0: i32) -> (i32, i32, i32) {
    %c0_i32 = arith.constant 0 : i32
    %c0_i32_0 = arith.constant 0 : i32
    %c0_i32_1 = arith.constant 0 : i32
    %c0_i32_2 = arith.constant 0 : i32
    return %c0_i32, %c0_i32_0, %c0_i32_1 : i32, i32, i32
  }
  func.func @transform_2(%arg0: i32) -> (i32, i32) {
    %c0_i32 = arith.constant 0 : i32
    %c0_i32_0 = arith.constant 0 : i32
    %c0_i32_1 = arith.constant 0 : i32
    return %c0_i32, %c0_i32_0 : i32, i32
  }
  func.func @transform_3(%arg0: i32) -> (i32, i32, i32) {
    %c0_i32 = arith.constant 0 : i32
    %c0_i32_0 = arith.constant 0 : i32
    %c0_i32_1 = arith.constant 0 : i32
    %c0_i32_2 = arith.constant 0 : i32
    return %c0_i32, %c0_i32_0, %c0_i32_1 : i32, i32, i32
  }
  func.func @transform_4(%arg0: i32) -> (i32, i32) {
    %c0_i32 = arith.constant 0 : i32
    %c0_i32_0 = arith.constant 0 : i32
    %c0_i32_1 = arith.constant 0 : i32
    return %c0_i32, %c0_i32_0 : i32, i32
  }
  func.func @transform_5(%arg0: i32) -> (i32, i32, i32) {
    %c0_i32 = arith.constant 0 : i32
    %c0_i32_0 = arith.constant 0 : i32
    %c0_i32_1 = arith.constant 0 : i32
    %c0_i32_2 = arith.constant 0 : i32
    return %c0_i32, %c0_i32_0, %c0_i32_1 : i32, i32, i32
  }
  func.func @transform_6(%arg0: i32) -> (i32, i32) {
    %c0_i32 = arith.constant 0 : i32
    %c0_i32_0 = arith.constant 0 : i32
    %c0_i32_1 = arith.constant 0 : i32
    return %c0_i32, %c0_i32_0 : i32, i32
  }
  func.func @transform_7(%arg0: i32) -> (i32, i32) {
    %c0_i32 = arith.constant 0 : i32
    %c0_i32_0 = arith.constant 0 : i32
    %c0_i32_1 = arith.constant 0 : i32
    return %c0_i32, %c0_i32_0 : i32, i32
  }
  func.func @transform_8(%arg0: i32) -> (i32, i32) {
    %c0_i32 = arith.constant 0 : i32
    %c0_i32_0 = arith.constant 0 : i32
    %c0_i32_1 = arith.constant 0 : i32
    return %c0_i32, %c0_i32_0 : i32, i32
  }
  func.func @transform_9(%arg0: i32) -> (i32, i32) {
    %c0_i32 = arith.constant 0 : i32
    %c0_i32_0 = arith.constant 0 : i32
    %c0_i32_1 = arith.constant 0 : i32
    return %c0_i32, %c0_i32_0 : i32, i32
  }
  func.func @transform_10(%arg0: i32) -> (i32, i32) {
    %c0_i32 = arith.constant 0 : i32
    %c0_i32_0 = arith.constant 0 : i32
    %c0_i32_1 = arith.constant 0 : i32
    return %c0_i32, %c0_i32_0 : i32, i32
  }
  func.func @transform_11(%arg0: i32) -> (i32, i32) {
    %c0_i32 = arith.constant 0 : i32
    %c0_i32_0 = arith.constant 0 : i32
    return %arg0, %c0_i32 : i32, i32
  }
}

</mosaic_0001>

<bundles_post_ra>
// kernel: tpu_custom_call.1
= control target key start
LH: loop header
LB: loop body
LE: loop exit
PB: predicated region body
PF: predicated region fallthrough
CT: control target
= control target key end

     0   :  { %s8972_s0 = inlined_call_operand.hbm [shape: f32[320,128], index: 0, kind: input, shape index: {}]   ;;  %s8973_s1 = inlined_call_operand.hbm [shape: f32[9,128,128], index: 1, kind: input, shape index: {}]   ;;  %s8974_s2 = inlined_call_operand.vmem [shape: f32[1,128], index: 2, kind: input, shape index: {}]   ;;  %s8975_s3 = inlined_call_operand.hbm [shape: f32[9,128,128], index: 3, kind: input, shape index: {}]   ;;  %s8976_s4 = inlined_call_operand.vmem [shape: f32[1,128], index: 4, kind: input, shape index: {}]   ;;  %s8977_s5 = inlined_call_operand.hbm [shape: f32[9,128,128], index: 5, kind: input, shape index: {}]   ;;  %s8978_s6 = inlined_call_operand.vmem [shape: f32[1,128], index: 6, kind: input, shape index: {}]   ;;  %s8979_s7 = inlined_call_operand.hbm [shape: f32[128,128], index: 7, kind: input, shape index: {}]   ;;  %s8980_s8 = inlined_call_operand.vmem [shape: f32[1,128], index: 8, kind: input, shape index: {}]   ;;  %s8981_s9 = inlined_call_operand.hbm [shape: f32[128,128], index: 9, kind: input, shape index: {}]   ;;  %s8982_s10 = inlined_call_operand.vmem [shape: f32[1,128], index: 10, kind: input, shape index: {}]   ;;  %s8983_s11 = inlined_call_operand.hbm [shape: f32[16,128], index: 11, kind: output, shape index: {}]  }
   0x1   :  { %8990 = sst [smem:[#allocation20_spill]] %s8973_s1 }
   0x2   :  { %8991 = sst [smem:[#allocation21_spill]] %s8975_s3 }
   0x3   :  { %8992 = sst [smem:[#allocation22_spill]] %s8980_s8 }
   0x4   :  { %8993 = sst [smem:[#allocation23_spill]] %s8982_s10 }
   0x5   :  { %8994 = sst [smem:[#allocation24_spill]] %s8983_s11 }
   0x6   :  { %16 = vsyncpa [#allocation4], 0 }
   0x7   :  { %18 = vsyncpa [#allocation4 + $0x1], 0 }
   0x8   :  { %19 = vsyncpa [#allocation7], 0 }
   0x9   :  { %20 = vsyncpa [#allocation10], 0 }
   0xa   :  { %21 = vsyncpa [#allocation13], 0 }
   0xb   :  { %22 = vsyncpa [#allocation5], 0 }
   0xc   :  { %24 = vsyncpa [#allocation5 + $0x1], 0  ;;  %s8006_s17 = smov 0   ;;  %s8008_s18 = smov 0  }
   0xd   :  { %s8010_s19 = smov 0   ;;  %s8012_s20 = smov 0  }
   0xe LB: > { %s7934_s21 = smov [#allocation6]   ;;  %s8027_s23 = sadd.s32 4294967295, %s7932_s20   ;;  %s7932_s20 = sphi %s8012_s20, %s9023_s20   ;;  %s7928_s19 = sphi %s8010_s19, %s9022_s19   ;;  %s7924_s18 = sphi %s8008_s18, %s9021_s18   ;;  %s7920_s17 = sphi %s8006_s17, %s9020_s17  }
   0xf   : > { %s309_s22 = sshll.u32 %s7934_s21, 4  ;;  %p4603_p0 = scmp.ge.s32.totalorder %s7932_s20, 1  ;;  %s8032_s22 = int_to_ptr.vmem [resolvable:$true] %s309_s22 }
  0x10   : > { %p8985_p1 = scmp.eq.s32.totalorder %s8027_s23, 0  ;;  %p297_p2 = scmp.lt.s32.totalorder %s7932_s20, 3 }
  0x11   : > { %s7935_s25 = smov [#allocation9]   ;;  %s7936_s28 = smov [#allocation8]  }
  0x12   : > { %p8034_p3 = pnand %p4603_p0, %p297_p2  ;;  %s341_s26 = sshll.u32 %s7935_s25, 4  ;;  %s8047_s26 = int_to_ptr.vmem [resolvable:$true] %s341_s26 }
  0x13   : > { %s325_s29 = sshll.u32 %s7936_s28, 4  ;;  %s8997_s1 = sld [smem:[#allocation20_spill]]  ;;  %s8049_s29 = int_to_ptr.vmem [resolvable:$true] %s325_s29 }
  0x14   : > { %s8995_s24 = scalar_select %p8034_p3, 1, 0 }
  0x15   : > { %p7562_p5 = pneg %p8034_p3 }
  0x17   : > { %p8043_p6 = pnand %p7562_p5, %p8985_p1 }
  0x19   : > { %s7684_s13 = scalar_lea.hbm %s8997_s1, 18432  ;;  %p8059_p8 = pneg %p8043_p6 }
  0x1a   : > { %p7685_p7 = scmp.ne.s32.totalorder %s8997_s1, %s7684_s13  ;;  %p7691_p11 = scmp.lt.u32.totalorder %s7684_s13, %s8997_s1 }
  0x1c   : > { %p7687_p9 = pnand %p8059_p8, %p7685_p7 }
  0x1e   : > { %p7688_p10 = pneg %p7687_p9 }
  0x20   : > { %p7693_p12 = pnand %p7691_p11, %p7688_p10 }
  0x22   : > { %7696 = shalt.err (!%p7693_p12)
}
  0x23   : > { %s7697_s28 = scalar_lea.vmem %s8032_s22, 18432  ;;  %p7705_p5 = scmp.lt.s32.totalorder %s8032_s22, %s8032_s22 }
  0x24   : > { %p7698_p13 = scmp.ne.s32.totalorder %s8032_s22, %s7697_s28  ;;  %p7706_p4 = scmp.lt.s32.totalorder %s7697_s28, %s7697_s28 }
  0x26   : > { %p7700_p0 = pnand %p7698_p13, %p8059_p8  ;;  %p7707_p7 = por %p7706_p4, %p7705_p5 }
  0x28   : > { %p7701_p2 = pneg %p7700_p0 }
  0x2a   : > { %p7708_p9 = pnand %p7707_p7, %p7701_p2 }
  0x2c   : > { %7711 = shalt.err (!%p7708_p9)
}
  0x2d   : > { %s8987_s30 = smov 128   ;;  %s8988_s12 = smov 8  }
  0x2e   : > { %7565 = dma.hbm_to_vmem [thread:$0]  (!%p8043_p6), %s8997_s1, 18432, %s8032_s22, [#allocation7], %s8987_s30, %s8987_s30, %s8988_s12  }
  0x2f   : > { %s7712_s25 = scalar_lea.hbm %s8977_s5, 18432 }
  0x30   : > { %p7713_p4 = scmp.ne.s32.totalorder %s8977_s5, %s7712_s25  ;;  %p7719_p12 = scmp.lt.u32.totalorder %s7712_s25, %s8977_s5 }
  0x32   : > { %p7715_p10 = pnand %p7713_p4, %p8059_p8 }
  0x34   : > { %p7716_p11 = pneg %p7715_p10 }
  0x36   : > { %p7721_p13 = pnand %p7719_p12, %p7716_p11 }
  0x38   : > { %7724 = shalt.err (!%p7721_p13)
}
  0x39   : > { %s7725_s22 = scalar_lea.vmem %s8047_s26, 18432  ;;  %p7733_p7 = scmp.lt.s32.totalorder %s8047_s26, %s8047_s26 }
  0x3a   : > { %p7726_p0 = scmp.ne.s32.totalorder %s8047_s26, %s7725_s22  ;;  %p7734_p9 = scmp.lt.s32.totalorder %s7725_s22, %s7725_s22 }
  0x3c   : > { %p7728_p2 = pnand %p7726_p0, %p8059_p8  ;;  %p7735_p4 = por %p7734_p9, %p7733_p7 }
  0x3e   : > { %p7729_p5 = pneg %p7728_p2 }
  0x40   : > { %p7736_p10 = pnand %p7735_p4, %p7729_p5 }
  0x42   : > { %7739 = shalt.err (!%p7736_p10)
}
  0x43   : > { %7571 = dma.hbm_to_vmem [thread:$0]  (!%p8043_p6), %s8977_s5, 18432, %s8047_s26, [#allocation10], %s8987_s30, %s8987_s30, %s8988_s12  }
  0x44   : > { %s8999_s3 = sld [smem:[#allocation21_spill]] }
  0x4a   : > { %s7740_s14 = scalar_lea.hbm %s8999_s3, 18432 }
  0x4b   : > { %p7741_p11 = scmp.ne.s32.totalorder %s8999_s3, %s7740_s14  ;;  %p7747_p0 = scmp.lt.u32.totalorder %s7740_s14, %s8999_s3 }
  0x4d   : > { %p7743_p12 = pnand %p7741_p11, %p8059_p8 }
  0x4f   : > { %p7744_p13 = pneg %p7743_p12 }
  0x51   : > { %p7749_p2 = pnand %p7747_p0, %p7744_p13 }
  0x53   : > { %7752 = shalt.err (!%p7749_p2)
}
  0x54   : > { %s7753_s26 = scalar_lea.vmem %s8049_s29, 18432  ;;  %p7761_p4 = scmp.lt.s32.totalorder %s8049_s29, %s8049_s29 }
  0x55   : > { %p7754_p5 = scmp.ne.s32.totalorder %s8049_s29, %s7753_s26  ;;  %p7762_p10 = scmp.lt.s32.totalorder %s7753_s26, %s7753_s26 }
  0x57   : > { %p7756_p7 = pnand %p7754_p5, %p8059_p8  ;;  %p7763_p11 = por %p7762_p10, %p7761_p4 }
  0x59   : > { %p7757_p9 = pneg %p7756_p7 }
  0x5b   : > { %p7764_p12 = pnand %p7763_p11, %p7757_p9 }
  0x5d   : > { %7767 = shalt.err (!%p7764_p12)
}
  0x5e   : > { %7568 = dma.hbm_to_vmem [thread:$0]  (!%p8043_p6), %s8999_s3, 18432, %s8049_s29, [#allocation7], %s8987_s30, %s8987_s30, %s8988_s12  }
  0x5f   : > { %s7939_s10 = smov [#allocation11]   ;;  %s7940_s13 = smov [#allocation12]  }
  0x60   : > { %s357_s11 = sshll.u32 %s7939_s10, 4  ;;  %s373_s14 = sshll.u32 %s7940_s13, 4  ;;  %s358_s11 = int_to_ptr.vmem [resolvable:$true] %s357_s11  ;;  %s374_s14 = int_to_ptr.vmem [resolvable:$true] %s373_s14 }
  0x61   : > { %s7768_s25 = scalar_lea.hbm %s8979_s7, 2048 }
  0x62   : > { %p7769_p13 = scmp.ne.s32.totalorder %s8979_s7, %s7768_s25  ;;  %p7775_p5 = scmp.lt.u32.totalorder %s7768_s25, %s8979_s7 }
  0x64   : > { %p7771_p0 = pnand %p7769_p13, %p8059_p8 }
  0x66   : > { %p7772_p2 = pneg %p7771_p0 }
  0x68   : > { %p7777_p7 = pnand %p7775_p5, %p7772_p2 }
  0x6a   : > { %7780 = shalt.err (!%p7777_p7)
}
  0x6b   : > { %s7781_s29 = scalar_lea.vmem %s358_s11, 2048  ;;  %p7789_p11 = scmp.lt.s32.totalorder %s358_s11, %s358_s11 }
  0x6c   : > { %p7782_p9 = scmp.ne.s32.totalorder %s358_s11, %s7781_s29  ;;  %p7790_p12 = scmp.lt.s32.totalorder %s7781_s29, %s7781_s29 }
  0x6e   : > { %p7784_p4 = pnand %p7782_p9, %p8059_p8  ;;  %p7791_p1 = por %p7790_p12, %p7789_p11 }
  0x70   : > { %p7785_p10 = pneg %p7784_p4 }
  0x72   : > { %p7792_p3 = pnand %p7791_p1, %p7785_p10 }
  0x74   : > { %7795 = shalt.err (!%p7792_p3)
}
  0x75   : > { %7574 = dma.hbm_to_vmem [thread:$0]  (!%p8043_p6), %s8979_s7, 2048, %s358_s11, [#allocation10], %s8987_s30, %s8987_s30, %s8988_s12  }
  0x76   : > { %s7796_s15 = scalar_lea.hbm %s8981_s9, 2048 }
  0x77   : > { %p7797_p1 = scmp.ne.s32.totalorder %s8981_s9, %s7796_s15  ;;  %p7803_p0 = scmp.lt.u32.totalorder %s7796_s15, %s8981_s9 }
  0x79   : > { %p7799_p3 = pnand %p7797_p1, %p8059_p8 }
  0x7b   : > { %p7800_p13 = pneg %p7799_p3 }
  0x7d   : > { %p7805_p2 = pnand %p7803_p0, %p7800_p13 }
  0x7f   : > { %7808 = shalt.err (!%p7805_p2)
}
  0x80   : > { %s7809_s22 = scalar_lea.vmem %s374_s14, 2048  ;;  %p7817_p4 = scmp.lt.s32.totalorder %s374_s14, %s374_s14 }
  0x81   : > { %p7810_p5 = scmp.ne.s32.totalorder %s374_s14, %s7809_s22  ;;  %p7818_p10 = scmp.lt.s32.totalorder %s7809_s22, %s7809_s22 }
  0x83   : > { %p7812_p7 = pnand %p7810_p5, %p8059_p8  ;;  %p7819_p11 = por %p7818_p10, %p7817_p4 }
  0x85   : > { %p7813_p9 = pneg %p7812_p7 }
  0x87   : > { %p7820_p12 = pnand %p7819_p11, %p7813_p9 }
  0x89   : > { %7823 = shalt.err (!%p7820_p12)
}
  0x8a   : > { %7577 = dma.hbm_to_vmem [thread:$0]  (!%p8043_p6), %s8981_s9, 2048, %s374_s14, [#allocation13], %s8987_s30, %s8987_s30, %s8988_s12  }
  0x8b   : > { %s4602_s27 = sadd.s32 4294967294, %s7932_s20   ;;  %s8179_s16 = sadd.s32 1, %s7932_s20  }
  0x8c   : > { %s37_s1 = sadd.s32 1, %s7928_s19  ;;  %s34_s8 = ssub.s32 %s7932_s20, %s8179_s16 }
  0x8d   : > { %p44_p8 = scmp.ne.s32.totalorder %s7928_s19, %s7924_s18  ;;  %p35_p1 = scmp.eq.s32.totalorder %s34_s8, 0 }
  0x8e   : > { %p45_p3 = scmp.eq.s32.totalorder %s7932_s20, 0  ;;  %p50_p13 = scmp.ne.s32.totalorder %s7924_s18, %s7920_s17 }
  0x8f   : > { %p284_p0 = scmp.eq.s32.totalorder %s8027_s23, 1  ;;  %p9000_p5 = scmp.eq.s32.totalorder %s8027_s23, 0 }
  0x90   : > { %s8191_s10 = scalar_select %p35_p1, %s7928_s19, %s37_s1  }
  0x91   : > { %p46_p2 = por %p45_p3, %p44_p8  ;;  %p8195_p7 = por %p9000_p5, %p50_p13 }
  0x92   : > { %p8199_p6 = por %p284_p0, %p44_p8  ;;  %p290_p9 = scmp.eq.s32.totalorder %s4602_s27, 1 }
  0x93   : > { %p7591_p4 = scmp.lt.s32.totalorder %s7932_s20, 2  ;;  %s390_s15 = sand.u32 1, %s7928_s19  }
  0x94   : > { %s9002_s14 = scalar_select %p8199_p6, 1, 0 }
  0x95   : > { %p8205_p10 = por %p290_p9, %p50_p13  ;;  %s7536_s25 = smul.u32 160, %s390_s15 }
  0x96   : > { %p8209_p11 = pnand %p7591_p4, %p46_p2  ;;  %s4649_s26 = smul.u32 2560, %s7932_s20 }
  0x97   : > { %s9003_s21 = scalar_select %p8205_p10, 1, 0 }
  0x98   : > { %s8217_s29 = scalar_lea.hbm %s8972_s0, %s4649_s26  ;;  %s394_s27 = scalar_lea.vmem [#allocation3], %s7536_s25 }
  0x99   : > { %s401_s1 = sshll.u32 %s394_s27, 4  ;;  %s8221_s8 = scalar_lea.sflag [#allocation4], %s390_s15  ;;  %s8219_s1 = int_to_ptr.vmem [resolvable:$true] %s401_s1 }
  0x9a   : > { %s7824_s30 = scalar_lea.hbm %s8217_s29, 2560  ;;  %p7826_p8 = pneg %p8209_p11 }
  0x9b   : > { %p7825_p12 = scmp.ne.s32.totalorder %s8217_s29, %s7824_s30  ;;  %s7829_s11 = scalar_lea.hbm %s8972_s0, 5120 }
  0x9c   : > { %p7830_p13 = scmp.lt.u32.totalorder %s8217_s29, %s8972_s0  ;;  %p7831_p0 = scmp.lt.u32.totalorder %s7829_s11, %s7824_s30 }
  0x9d   : > { %p7827_p1 = pnand %p7826_p8, %p7825_p12  ;;  %p7833_p5 = scmp.lt.u32.totalorder %s7824_s30, %s8217_s29 }
  0x9e   : > { %p7832_p2 = por %p7831_p0, %p7830_p13 }
  0x9f   : > { %p7828_p3 = pneg %p7827_p1 }
  0xa0   : > { %p7834_p9 = por %p7833_p5, %p7832_p2 }
  0xa2   : > { %p7835_p4 = pnand %p7834_p9, %p7828_p3 }
  0xa4   : > { %7838 = shalt.err (!%p7835_p4)
}
  0xa5   : > { %s7839_s15 = scalar_lea.vmem %s8219_s1, 2560  ;;  %s7941_s25 = smov [#allocation3]  }
  0xa6   : > { %p7840_p12 = scmp.ne.s32.totalorder %s8219_s1, %s7839_s15  ;;  %s7844_s27 = sshll.u32 %s7941_s25, 4  ;;  %s7845_s27 = int_to_ptr.vmem [resolvable:$false] %s7844_s27 }
  0xa7   : > { %s7846_s3 = scalar_lea.vmem %s7845_s27, 5120  ;;  %p7847_p6 = scmp.lt.s32.totalorder %s8219_s1, %s7845_s27 }
  0xa8   : > { %p7842_p1 = pnand %p7840_p12, %p7826_p8  ;;  %p7848_p13 = scmp.lt.s32.totalorder %s7846_s3, %s7839_s15 }
  0xaa   : > { %p7843_p10 = pneg %p7842_p1  ;;  %p7849_p0 = por %p7848_p13, %p7847_p6 }
  0xac   : > { %p7850_p2 = pnand %p7849_p0, %p7843_p10 }
  0xae   : > { %7853 = shalt.err (!%p7850_p2)
}
  0xaf   : > { %s9005_s30 = smov 8   ;;  %s9006_s12 = smov 128  }
  0xb0   : > { %7581 = dma.hbm_to_vmem [thread:$0]  (!%p8209_p11), %s8217_s29, 2560, %s8219_s1, %s8221_s8, %s9006_s12, %s9006_s12, %s9005_s30  }
  0xb1   : > { %p9007_p8 = scmp.ne.s32.totalorder %s8995_s24, 0 }
  0xb2   : > { %s8255_s26 = sand.u32 (!%p9007_p8), 1, %s7924_s18  }
  0xb3   : > { %413 = sbr.rel (%p9007_p8) target bundleno = 2068 (0x814), region = 64  ;;  %s416_s11 = scalar_lea.sflag (!%p9007_p8), [#allocation4], %s8255_s26 }
  0xb4   : > { %s7537_s22 = smul.u32 (!%p9007_p8), 160, %s8255_s26 }
  0xb6   : > { %s8259_s15 = scalar_lea.vmem (!%p9007_p8), [#allocation3], %s7537_s22 }
  0xba   : > { %7899 = dma.done.wait (%p8195_p7), %s416_s11, 2560  }
  0xbb   : > { %7901 = vsyncadd (%p8195_p7), %s416_s11, 4294964736  ;;  %p9008_p6 = scmp.eq.s32.totalorder %s8027_s23, 0 }
  0xbd   : > { %7903 = dma.done.wait (%p9008_p6), [#allocation7], 36864   ;;  %p9009_p10 = pmov %p9008_p6 }
  0xbe   : > { %p9010_p11 = pmov %p9008_p6 }
  0xbf   : > { %7905 = vsyncadd (%p9009_p10), [#allocation7], 4294930432 }
  0xc0   : > { %7907 = dma.done.wait (%p9010_p11), [#allocation10], 20480   ;;  %p9011_p3 = pmov %p9008_p6 }
  0xc2   : > { %7909 = vsyncadd (%p9011_p3), [#allocation10], 4294946816  ;;  %p9012_p5 = pmov %p9011_p3 }
  0xc3   : > { %p9013_p9 = pmov %p9011_p3 }
  0xc4   : > { %7911 = dma.done.wait (%p9012_p5), [#allocation13], 2048  }
  0xc5   : > { %7913 = vsyncadd (%p9013_p9), [#allocation13], 4294965248  ;;  %v528_v0 = vld [vmem:[#allocation6 + $0x80] sm:$0xff]  ;;  %v529_v1 = vld [vmem:[#allocation6 + $0x88] sm:$0xff]  ;;  %s9014_s3 = sld [smem:[#allocation22_spill]]  ;;  %s4617_s30 = sshll.u32 %s8255_s26, 3 }
  0xc6   : > { %v530_v2 = vld [vmem:[#allocation6 + $0x90] sm:$0xff]  ;;  %v6536_v3 = vpack.c.bf16 %v529_v1, %v528_v0  ;;  %v531_v4 = vld [vmem:[#allocation6 + $0x98] sm:$0xff]  ;;  %v532_v6 = vld [vmem:[#allocation6 + $0xa0] sm:$0xff]  ;;  %s9015_s11 = sld [smem:[#allocation23_spill]]  ;;  %s477_s24 = scalar_lea.vmem [#allocation14], %s4617_s30 }
  0xc7   : > { %v6540_v5 = vpack.c.bf16 %v531_v4, %v530_v2  ;;  %v533_v7 = vld [vmem:[#allocation6 + $0xa8] sm:$0xff]  ;;  %v534_v10 = vld [vmem:[#allocation6 + $0xb0] sm:$0xff]  ;;  %v535_v11 = vld [vmem:[#allocation6 + $0xb8] sm:$0xff]  ;;  %s4484_s13 = sshll.u32 %s477_s24, 4  ;;  %s9016_s1 = sld [smem:[#allocation24_spill]]  ;;  %s8930_s13 = int_to_ptr.vmem [resolvable:$true] %s4484_s13 }
  0xc8   : > { %6537 = vmatprep.subr.bf16.mxu0 %v6536_v3  ;;  %v6544_v8 = vpack.c.bf16 %v533_v7, %v532_v6  ;;  %v511_v9 = vld [vmem:[%s8259_s15 + $0x1] sm:$0xff]  ;;  %v6548_v12 = vpack.c.bf16 %v535_v11, %v534_v10  ;;  %v538_v16 = vld [vmem:[#allocation6 + $0xd0] sm:$0xff]  ;;  %v539_v17 = vld [vmem:[#allocation6 + $0xd8] sm:$0xff]  ;;  %s4471_s25 = scalar_lea.sflag [#allocation5], %s8255_s26  ;;  %s7854_s27 = scalar_lea.vmem %s8930_s13, 128 }
  0xc9   : > { %6539 = vmatpush3.bf16.msra.mxu0 %v6536_v3  ;;  %5337 = vmatprep.mubr.f32.mxu0 %v511_v9  ;;  %v536_v13 = vld [vmem:[#allocation6 + $0xc0] sm:$0xff]  ;;  %v537_v14 = vld [vmem:[#allocation6 + $0xc8] sm:$0xff]  ;;  %v6556_v18 = vpack.c.bf16 %v539_v17, %v538_v16  ;;  %v542_v22 = vld [vmem:[#allocation6 + $0xf0] sm:$0xff]  ;;  %p7855_p7 = scmp.ne.s32.totalorder %s8930_s13, %s7854_s27  ;;  %p9017_p4 = scmp.ne.s32.totalorder %s9002_s14, 0 }
  0xca   : > { %6541 = vmatprep.subr.bf16.mxu0 %v6540_v5  ;;  %v6552_v15 = vpack.c.bf16 %v537_v14, %v536_v13  ;;  %v540_v19 = vld [vmem:[#allocation6 + $0xe0] sm:$0xff]  ;;  %v541_v20 = vld [vmem:[#allocation6 + $0xe8] sm:$0xff]  ;;  %v543_v23 = vld [vmem:[#allocation6 + $0xf8] sm:$0xff] }
  0xcb   : > { %v6560_v21 = vpack.c.bf16 %v541_v20, %v540_v19  ;;  %v6564_v24 = vpack.c.bf16 %v543_v23, %v542_v22  ;;  %v495_v25 = vld [vmem:[#allocation6] sm:$0xff]  ;;  %v496_v26 = vld [vmem:[#allocation6 + $0x8] sm:$0xff]  ;;  %v497_v28 = vld [vmem:[#allocation6 + $0x10] sm:$0xff]  ;;  %p7856_p12 = pnand %p7855_p7, %p9017_p4 }
  0xcc   : > { %v6568_v27 = vpack.c.bf16 %v496_v26, %v495_v25  ;;  %v498_v29 = vld [vmem:[#allocation6 + $0x18] sm:$0xff]  ;;  %v512_v30 = vld [vmem:[%s8259_s15 + $0x9] sm:$0xff]  ;;  %v499_v33 = vld [vmem:[#allocation6 + $0x20] sm:$0xff] }
  0xcd   : > { %6543 = vmatpush3.bf16.msra.mxu0 %v6540_v5  ;;  %v513_v31 = vld [vmem:[%s8259_s15 + $0x11] sm:$0xff]  ;;  %v6572_v32 = vpack.c.bf16 %v498_v29, %v497_v28  ;;  %v500_v34 = vld [vmem:[#allocation6 + $0x28] sm:$0xff]  ;;  %v8281_v35 = vld [vmem:[%s8259_s15 + $0x19] sm:$0xff]  ;;  %p7857_p1 = pneg %p7856_p12 }
  0xce   : > { %6545 = vmatprep.subr.bf16.mxu0 %v6544_v8  ;;  %v8284_v36 = vld [vmem:[%s8259_s15 + $0x21] sm:$0xff]  ;;  %v6576_v37 = vpack.c.bf16 %v500_v34, %v499_v33  ;;  %v501_v38 = vld [vmem:[#allocation6 + $0x30] sm:$0xff]  ;;  %v502_v39 = vld [vmem:[#allocation6 + $0x38] sm:$0xff] }
  0xcf   : > { %v8289_v40 = vld [vmem:[%s8259_s15 + $0x29] sm:$0xff]  ;;  %v8292_v41 = vld [vmem:[%s8259_s15 + $0x31] sm:$0xff]  ;;  %v6580_v42 = vpack.c.bf16 %v502_v39, %v501_v38  ;;  %v503_v43 = vld [vmem:[#allocation6 + $0x40] sm:$0xff] }
  0xd0   : > { %v504_v44 = vld [vmem:[#allocation6 + $0x48] sm:$0xff]  ;;  %v8297_v45 = vld [vmem:[%s8259_s15 + $0x39] sm:$0xff]  ;;  %v505_v48 = vld [vmem:[#allocation6 + $0x50] sm:$0xff] }
  0xd1   : > { %6547 = vmatpush3.bf16.msra.mxu0 %v6544_v8  ;;  %v8300_v46 = vld [vmem:[%s8259_s15 + $0x41] sm:$0xff]  ;;  %v6584_v47 = vpack.c.bf16 %v504_v44, %v503_v43  ;;  %v506_v49 = vld [vmem:[#allocation6 + $0x58] sm:$0xff]  ;;  %v8305_v50 = vld [vmem:[%s8259_s15 + $0x49] sm:$0xff] }
  0xd2   : > { %6549 = vmatprep.subr.bf16.mxu0 %v6548_v12  ;;  %v8308_v51 = vld [vmem:[%s8259_s15 + $0x51] sm:$0xff]  ;;  %v6588_v52 = vpack.c.bf16 %v506_v49, %v505_v48  ;;  %v507_v53 = vld [vmem:[#allocation6 + $0x60] sm:$0xff]  ;;  %v508_v54 = vld [vmem:[#allocation6 + $0x68] sm:$0xff] }
  0xd3   : > { %v8313_v55 = vld [vmem:[%s8259_s15 + $0x59] sm:$0xff]  ;;  %v8316_v56 = vld [vmem:[%s8259_s15 + $0x61] sm:$0xff]  ;;  %v6592_v57 = vpack.c.bf16 %v508_v54, %v507_v53  ;;  %v509_v58 = vld [vmem:[#allocation6 + $0x70] sm:$0xff] }
  0xd4   : > { %v510_v59 = vld [vmem:[#allocation6 + $0x78] sm:$0xff]  ;;  %v8321_v60 = vld [vmem:[%s8259_s15 + $0x69] sm:$0xff]  ;;  %v851_v63 = vld [vmem:[#allocation6 + $0x100] sm:$0xff] }
  0xd5   : > { %6551 = vmatpush3.bf16.msra.mxu0 %v6548_v12  ;;  %v8324_v61 = vld [vmem:[%s8259_s15 + $0x71] sm:$0xff]  ;;  %v6596_v62 = vpack.c.bf16 %v510_v59, %v509_v58  ;;  %v852_v0 = vld [vmem:[#allocation6 + $0x108] sm:$0xff]  ;;  %v8329_v1 = vld [vmem:[%s8259_s15 + $0x79] sm:$0xff] }
  0xd6   : > { %6553 = vmatprep.subr.bf16.mxu0 %v6552_v15  ;;  %v479_v2 = vld [vmem:[%s8259_s15] sm:$0xff]  ;;  %v6600_v3 = vpack.c.bf16 %v852_v0, %v851_v63  ;;  %v853_v4 = vld [vmem:[#allocation6 + $0x110] sm:$0xff]  ;;  %v854_v5 = vld [vmem:[#allocation6 + $0x118] sm:$0xff] }
  0xd7   : > { %v480_v6 = vld [vmem:[%s8259_s15 + $0x8] sm:$0xff]  ;;  %v481_v7 = vld [vmem:[%s8259_s15 + $0x10] sm:$0xff]  ;;  %v6604_v8 = vpack.c.bf16 %v854_v5, %v853_v4  ;;  %v855_v9 = vld [vmem:[#allocation6 + $0x120] sm:$0xff] }
  0xd8   : > { %v856_v10 = vld [vmem:[#allocation6 + $0x128] sm:$0xff]  ;;  %v8336_v11 = vld [vmem:[%s8259_s15 + $0x18] sm:$0xff]  ;;  %v8339_v12 = vld [vmem:[%s8259_s15 + $0x20] sm:$0xff] }
  0xd9   : > { %6555 = vmatpush3.bf16.msra.mxu0 %v6552_v15  ;;  %v6608_v13 = vpack.c.bf16 %v856_v10, %v855_v9  ;;  %v857_v14 = vld [vmem:[#allocation6 + $0x130] sm:$0xff]  ;;  %v858_v15 = vld [vmem:[#allocation6 + $0x138] sm:$0xff]  ;;  %v8344_v16 = vld [vmem:[%s8259_s15 + $0x28] sm:$0xff] }
  0xda   : > { %6557 = vmatprep.subr.bf16.mxu0 %v6556_v18  ;;  %v8347_v17 = vld [vmem:[%s8259_s15 + $0x30] sm:$0xff]  ;;  %v859_v19 = vld [vmem:[#allocation6 + $0x140] sm:$0xff]  ;;  %v860_v20 = vld [vmem:[#allocation6 + $0x148] sm:$0xff] }
  0xdb   : > { %v8355_v22 = vld [vmem:[%s8259_s15 + $0x40] sm:$0xff]  ;;  %v6616_v23 = vpack.c.bf16 %v860_v20, %v859_v19  ;;  %v862_v25 = vld [vmem:[#allocation6 + $0x158] sm:$0xff]  ;;  %v8360_v26 = vld [vmem:[%s8259_s15 + $0x48] sm:$0xff] }
  0xdc   : > { %v863_v29 = vld [vmem:[#allocation6 + $0x160] sm:$0xff]  ;;  %v865_v34 = vld [vmem:[#allocation6 + $0x170] sm:$0xff]  ;;  %v8376_v38 = vld [vmem:[%s8259_s15 + $0x68] sm:$0xff] }
  0xdd   : > { %6559 = vmatpush3.bf16.msra.mxu0 %v6556_v18  ;;  %v6612_v18 = vpack.c.bf16 %v858_v15, %v857_v14  ;;  %v8379_v39 = vld [vmem:[%s8259_s15 + $0x70] sm:$0xff]  ;;  %v1045_v43 = vld [vmem:[#allocation6 + $0x180] sm:$0xff]  ;;  %v1046_v44 = vld [vmem:[#allocation6 + $0x188] sm:$0xff] }
  0xde   : > { %6561 = vmatprep.subr.bf16.mxu0 %v6560_v21  ;;  %v834_v48 = vld [vmem:[%s8259_s15 + $0x2] sm:$0xff]  ;;  %v6632_v49 = vpack.c.bf16 %v1046_v44, %v1045_v43  ;;  %v1048_v53 = vld [vmem:[#allocation6 + $0x198] sm:$0xff]  ;;  %v835_v54 = vld [vmem:[%s8259_s15 + $0xa] sm:$0xff] }
  0xdf   : > { %v1049_v59 = vld [vmem:[#allocation6 + $0x1a0] sm:$0xff]  ;;  %v1052_v4 = vld [vmem:[#allocation6 + $0x1b8] sm:$0xff]  ;;  %v8399_v5 = vld [vmem:[%s8259_s15 + $0x2a] sm:$0xff] }
  0xe0   : > { %v8391_v63 = vld [vmem:[%s8259_s15 + $0x1a] sm:$0xff]  ;;  %v8394_v0 = vld [vmem:[%s8259_s15 + $0x22] sm:$0xff]  ;;  %v1055_v15 = vld [vmem:[#allocation6 + $0x1d0] sm:$0xff] }
  0xe1   : > { %6563 = vmatpush3.bf16.msra.mxu0 %v6560_v21  ;;  %v8352_v21 = vld [vmem:[%s8259_s15 + $0x38] sm:$0xff]  ;;  %v1054_v9 = vld [vmem:[#allocation6 + $0x1c8] sm:$0xff]  ;;  %v1239_v44 = vld [vmem:[#allocation6 + $0x200] sm:$0xff] }
  0xe2   : > { %6565 = vmatprep.subr.bf16.mxu0 %v6564_v24  ;;  %v8407_v10 = vld [vmem:[%s8259_s15 + $0x3a] sm:$0xff]  ;;  %v8415_v19 = vld [vmem:[%s8259_s15 + $0x4a] sm:$0xff]  ;;  %v8418_v20 = vld [vmem:[%s8259_s15 + $0x52] sm:$0xff] }
  0xe5   : > { %6567 = vmatpush3.bf16.msra.mxu0 %v6564_v24  ;;  %v861_v24 = vld [vmem:[#allocation6 + $0x150] sm:$0xff] }
  0xe6   : > { %6569 = vmatprep.subr.bf16.mxu0 %v6568_v27  ;;  %v6620_v28 = vpack.c.bf16 %v862_v25, %v861_v24  ;;  %v1057_v24 = vld [vmem:[#allocation6 + $0x1e0] sm:$0xff]  ;;  %v1058_v25 = vld [vmem:[#allocation6 + $0x1e8] sm:$0xff] }
  0xe8   : > { %5338 = vmatmul.mubr.f32.vlgmr.msra.gmra.mrb[0].mxu0 %v512_v30  ;;  %v864_v30 = vld [vmem:[#allocation6 + $0x168] sm:$0xff] }
  0xe9   : > { %6571 = vmatpush3.bf16.msra.mxu0 %v6568_v27  ;;  %5340 = vmatprep.mubr.f32.mxu0 %v513_v31  ;;  %v8363_v27 = vld [vmem:[%s8259_s15 + $0x50] sm:$0xff]  ;;  %v8368_v31 = vld [vmem:[%s8259_s15 + $0x58] sm:$0xff]  ;;  %v6624_v33 = vpack.c.bf16 %v864_v30, %v863_v29  ;;  %v8426_v29 = vld [vmem:[%s8259_s15 + $0x62] sm:$0xff]  ;;  %v6656_v30 = vpack.c.bf16 %v1058_v25, %v1057_v24 }
  0xea   : > { %6573 = vmatprep.subr.bf16.mxu0 %v6572_v32  ;;  %v1247_v24 = vld [vmem:[#allocation6 + $0x240] sm:$0xff]  ;;  %v1248_v25 = vld [vmem:[#allocation6 + $0x248] sm:$0xff] }
  0xec   : > { %5341 = vmatmul.mubr.f32.gmra.mrb[2].mxu0 %v8281_v35 }
  0xed   : > { %6575 = vmatpush3.bf16.msra.mxu0 %v6572_v32  ;;  %5343 = vmatprep.mubr.f32.mxu0 %v8284_v36  ;;  %v8371_v32 = vld [vmem:[%s8259_s15 + $0x60] sm:$0xff] }
  0xee   : > { %6577 = vmatprep.subr.bf16.mxu0 %v6576_v37 }
  0xf0   : > { %5344 = vmatmul.mubr.f32.gmra.mrb[4].mxu0 %v8289_v40 }
  0xf1   : > { %6579 = vmatpush3.bf16.msra.mxu0 %v6576_v37  ;;  %5346 = vmatprep.mubr.f32.mxu0 %v8292_v41  ;;  %v866_v37 = vld [vmem:[#allocation6 + $0x178] sm:$0xff] }
  0xf2   : > { %6581 = vmatprep.subr.bf16.mxu0 %v6580_v42 }
  0xf4   : > { %5347 = vmatmul.mubr.f32.gmra.mrb[6].mxu0 %v8297_v45 }
  0xf5   : > { %6583 = vmatpush3.bf16.msra.mxu0 %v6580_v42  ;;  %5349 = vmatprep.mubr.f32.mxu0 %v8300_v46  ;;  %v6628_v42 = vpack.c.bf16 %v866_v37, %v865_v34  ;;  %v1060_v34 = vld [vmem:[#allocation6 + $0x1f8] sm:$0xff]  ;;  %v8431_v37 = vld [vmem:[%s8259_s15 + $0x6a] sm:$0xff] }
  0xf6   : > { %6585 = vmatprep.subr.bf16.mxu0 %v6584_v47 }
  0xf8   : > { %5350 = vmatmul.mubr.f32.gmra.mrb[8].mxu0 %v8305_v50 }
  0xf9   : > { %6587 = vmatpush3.bf16.msra.mxu0 %v6584_v47  ;;  %5352 = vmatprep.mubr.f32.mxu0 %v8308_v51  ;;  %v8384_v47 = vld [vmem:[%s8259_s15 + $0x78] sm:$0xff] }
  0xfa   : > { %6589 = vmatprep.subr.bf16.mxu0 %v6588_v52 }
  0xfc   : > { %5353 = vmatmul.mubr.f32.gmra.mrb[10].mxu0 %v8313_v55 }
  0xfd   : > { %6591 = vmatpush3.bf16.msra.mxu0 %v6588_v52  ;;  %5355 = vmatprep.mubr.f32.mxu0 %v8316_v56  ;;  %v1047_v52 = vld [vmem:[#allocation6 + $0x190] sm:$0xff] }
  0xfe   : > { %6593 = vmatprep.subr.bf16.mxu0 %v6592_v57  ;;  %v6636_v58 = vpack.c.bf16 %v1048_v53, %v1047_v52  ;;  %v1028_v52 = vld [vmem:[%s8259_s15 + $0xc] sm:$0xff] }
 0x100   : > { %5356 = vmatmul.mubr.f32.gmra.mrb[12].mxu0 %v8321_v60 }
 0x101   : > { %6595 = vmatpush3.bf16.msra.mxu0 %v6592_v57  ;;  %5358 = vmatprep.mubr.f32.mxu0 %v8324_v61  ;;  %v836_v57 = vld [vmem:[%s8259_s15 + $0x12] sm:$0xff] }
 0x102   : > { %6597 = vmatprep.subr.bf16.mxu0 %v6596_v62 }
 0x104   : > { %5359 = vmatmul.mubr.f32.gmra.mrb[14].mxu0 %v8329_v1 }
 0x105   : > { %6599 = vmatpush3.bf16.msra.mxu0 %v6596_v62  ;;  %5393 = vmatprep.mubr.f32.mxu0 %v479_v2  ;;  %v1050_v62 = vld [vmem:[#allocation6 + $0x1a8] sm:$0xff] }
 0x106   : > { %6601 = vmatprep.subr.bf16.mxu0 %v6600_v3  ;;  %v6640_v2 = vpack.c.bf16 %v1050_v62, %v1049_v59  ;;  %v1030_v59 = vld [vmem:[%s8259_s15 + $0x1c] sm:$0xff] }
 0x108   : > { %5394 = vmatmul.mubr.f32.vlgmr.msra.gmra.mrb[0].mxu0 %v480_v6  ;;  %v8402_v6 = vld [vmem:[%s8259_s15 + $0x32] sm:$0xff] }
 0x109   : > { %6603 = vmatpush3.bf16.msra.mxu0 %v6600_v3  ;;  %5396 = vmatprep.mubr.f32.mxu0 %v481_v7  ;;  %v1051_v3 = vld [vmem:[#allocation6 + $0x1b0] sm:$0xff] }
 0x10a   : > { %6605 = vmatprep.subr.bf16.mxu0 %v6604_v8  ;;  %v6644_v7 = vpack.c.bf16 %v1052_v4, %v1051_v3  ;;  %v1244_v3 = vld [vmem:[#allocation6 + $0x228] sm:$0xff] }
 0x10b   : > { %v1031_v4 = vld [vmem:[%s8259_s15 + $0x24] sm:$0xff] }
 0x10c   : > { %5397 = vmatmul.mubr.f32.gmra.mrb[2].mxu0 %v8336_v11 }
 0x10d   : > { %6607 = vmatpush3.bf16.msra.mxu0 %v6604_v8  ;;  %5399 = vmatprep.mubr.f32.mxu0 %v8339_v12  ;;  %v1053_v8 = vld [vmem:[#allocation6 + $0x1c0] sm:$0xff] }
 0x10e   : > { %6609 = vmatprep.subr.bf16.mxu0 %v6608_v13  ;;  %v6648_v14 = vpack.c.bf16 %v1054_v9, %v1053_v8  ;;  %v1245_v9 = vld [vmem:[#allocation6 + $0x230] sm:$0xff] }
 0x110   : > { %5400 = vmatmul.mubr.f32.gmra.mrb[4].mxu0 %v8344_v16 }
 0x111   : > { %6611 = vmatpush3.bf16.msra.mxu0 %v6608_v13  ;;  %5402 = vmatprep.mubr.f32.mxu0 %v8347_v17  ;;  %v8410_v13 = vld [vmem:[%s8259_s15 + $0x42] sm:$0xff] }
 0x112   : > { %6613 = vmatprep.subr.bf16.mxu0 %v6612_v18 }
 0x114   : > { %5403 = vmatmul.mubr.f32.gmra.mrb[6].mxu0 %v8352_v21 }
 0x115   : > { %6615 = vmatpush3.bf16.msra.mxu0 %v6612_v18  ;;  %5405 = vmatprep.mubr.f32.mxu0 %v8355_v22  ;;  %v1056_v18 = vld [vmem:[#allocation6 + $0x1d8] sm:$0xff] }
 0x116   : > { %6617 = vmatprep.subr.bf16.mxu0 %v6616_v23 }
 0x118   : > { %5406 = vmatmul.mubr.f32.gmra.mrb[8].mxu0 %v8360_v26 }
 0x119   : > { %6619 = vmatpush3.bf16.msra.mxu0 %v6616_v23  ;;  %5408 = vmatprep.mubr.f32.mxu0 %v8363_v27  ;;  %v6652_v23 = vpack.c.bf16 %v1056_v18, %v1055_v15  ;;  %v1033_v15 = vld [vmem:[%s8259_s15 + $0x34] sm:$0xff]  ;;  %v1034_v18 = vld [vmem:[%s8259_s15 + $0x3c] sm:$0xff] }
 0x11a   : > { %6621 = vmatprep.subr.bf16.mxu0 %v6620_v28 }
 0x11c   : > { %5409 = vmatmul.mubr.f32.gmra.mrb[10].mxu0 %v8368_v31 }
 0x11d   : > { %6623 = vmatpush3.bf16.msra.mxu0 %v6620_v28  ;;  %5411 = vmatprep.mubr.f32.mxu0 %v8371_v32  ;;  %v8423_v28 = vld [vmem:[%s8259_s15 + $0x5a] sm:$0xff] }
 0x11e   : > { %6625 = vmatprep.subr.bf16.mxu0 %v6624_v33 }
 0x120   : > { %5412 = vmatmul.mubr.f32.gmra.mrb[12].mxu0 %v8376_v38 }
 0x121   : > { %6627 = vmatpush3.bf16.msra.mxu0 %v6624_v33  ;;  %5414 = vmatprep.mubr.f32.mxu0 %v8379_v39  ;;  %v1059_v33 = vld [vmem:[#allocation6 + $0x1f0] sm:$0xff] }
 0x122   : > { %6629 = vmatprep.subr.bf16.mxu0 %v6628_v42  ;;  %v6660_v43 = vpack.c.bf16 %v1060_v34, %v1059_v33  ;;  %v1036_v33 = vld [vmem:[%s8259_s15 + $0x4c] sm:$0xff]  ;;  %v6680_v34 = vpack.c.bf16 %v1248_v25, %v1247_v24  ;;  %v1436_v25 = vld [vmem:[#allocation6 + $0x298] sm:$0xff] }
 0x123   : > { %v1435_v24 = vld [vmem:[#allocation6 + $0x290] sm:$0xff] }
 0x124   : > { %5415 = vmatmul.mubr.f32.gmra.mrb[14].mxu0 %v8384_v47 }
 0x125   : > { %6631 = vmatpush3.bf16.msra.mxu0 %v6628_v42  ;;  %5449 = vmatprep.mubr.f32.mxu0 %v834_v48  ;;  %v8434_v42 = vld [vmem:[%s8259_s15 + $0x72] sm:$0xff]  ;;  %v1240_v48 = vld [vmem:[#allocation6 + $0x208] sm:$0xff] }
 0x126   : > { %6633 = vmatprep.subr.bf16.mxu0 %v6632_v49  ;;  %v6664_v53 = vpack.c.bf16 %v1240_v48, %v1239_v44  ;;  %v1250_v44 = vld [vmem:[#allocation6 + $0x258] sm:$0xff] }
 0x127   : > { %v1037_v48 = vld [vmem:[%s8259_s15 + $0x54] sm:$0xff] }
 0x128   : > { %5450 = vmatmul.mubr.f32.vlgmr.msra.gmra.mrb[0].mxu0 %v835_v54  ;;  %v1241_v54 = vld [vmem:[#allocation6 + $0x210] sm:$0xff] }
 0x129   : > { %6635 = vmatpush3.bf16.msra.mxu0 %v6632_v49  ;;  %5452 = vmatprep.mubr.f32.mxu0 %v836_v57  ;;  %v8439_v49 = vld [vmem:[%s8259_s15 + $0x7a] sm:$0xff] }
 0x12a   : > { %6637 = vmatprep.subr.bf16.mxu0 %v6636_v58  ;;  %v1242_v57 = vld [vmem:[#allocation6 + $0x218] sm:$0xff] }
 0x12b   : > { %v6668_v62 = vpack.c.bf16 %v1242_v57, %v1241_v54  ;;  %v1251_v54 = vld [vmem:[#allocation6 + $0x260] sm:$0xff]  ;;  %v1252_v57 = vld [vmem:[#allocation6 + $0x268] sm:$0xff] }
 0x12c   : > { %5453 = vmatmul.mubr.f32.gmra.mrb[2].mxu0 %v8391_v63 }
 0x12d   : > { %6639 = vmatpush3.bf16.msra.mxu0 %v6636_v58  ;;  %5455 = vmatprep.mubr.f32.mxu0 %v8394_v0  ;;  %v1029_v58 = vld [vmem:[%s8259_s15 + $0x14] sm:$0xff] }
 0x12e   : > { %6641 = vmatprep.subr.bf16.mxu0 %v6640_v2 }
 0x130   : > { %5456 = vmatmul.mubr.f32.gmra.mrb[4].mxu0 %v8399_v5 }
 0x131   : > { %6643 = vmatpush3.bf16.msra.mxu0 %v6640_v2  ;;  %5458 = vmatprep.mubr.f32.mxu0 %v8402_v6  ;;  %v1243_v2 = vld [vmem:[#allocation6 + $0x220] sm:$0xff] }
 0x132   : > { %6645 = vmatprep.subr.bf16.mxu0 %v6644_v7  ;;  %v6672_v8 = vpack.c.bf16 %v1244_v3, %v1243_v2  ;;  %v1253_v2 = vld [vmem:[#allocation6 + $0x270] sm:$0xff]  ;;  %v1254_v3 = vld [vmem:[#allocation6 + $0x278] sm:$0xff] }
 0x134   : > { %5459 = vmatmul.mubr.f32.gmra.mrb[6].mxu0 %v8407_v10 }
 0x135   : > { %6647 = vmatpush3.bf16.msra.mxu0 %v6644_v7  ;;  %5461 = vmatprep.mubr.f32.mxu0 %v8410_v13  ;;  %v1032_v7 = vld [vmem:[%s8259_s15 + $0x2c] sm:$0xff] }
 0x136   : > { %6649 = vmatprep.subr.bf16.mxu0 %v6648_v14 }
 0x138   : > { %5462 = vmatmul.mubr.f32.gmra.mrb[8].mxu0 %v8415_v19 }
 0x139   : > { %6651 = vmatpush3.bf16.msra.mxu0 %v6648_v14  ;;  %5464 = vmatprep.mubr.f32.mxu0 %v8418_v20  ;;  %v1246_v14 = vld [vmem:[#allocation6 + $0x238] sm:$0xff] }
 0x13a   : > { %6653 = vmatprep.subr.bf16.mxu0 %v6652_v23 }
 0x13c   : > { %5465 = vmatmul.mubr.f32.gmra.mrb[10].mxu0 %v8423_v28 }
 0x13d   : > { %6655 = vmatpush3.bf16.msra.mxu0 %v6652_v23  ;;  %5467 = vmatprep.mubr.f32.mxu0 %v8426_v29  ;;  %v6676_v23 = vpack.c.bf16 %v1246_v14, %v1245_v9  ;;  %v1433_v9 = vld [vmem:[#allocation6 + $0x280] sm:$0xff]  ;;  %v1434_v14 = vld [vmem:[#allocation6 + $0x288] sm:$0xff] }
 0x13e   : > { %6657 = vmatprep.subr.bf16.mxu0 %v6656_v30 }
 0x140   : > { %5468 = vmatmul.mubr.f32.gmra.mrb[12].mxu0 %v8431_v37 }
 0x141   : > { %6659 = vmatpush3.bf16.msra.mxu0 %v6656_v30  ;;  %5470 = vmatprep.mubr.f32.mxu0 %v8434_v42  ;;  %v1035_v30 = vld [vmem:[%s8259_s15 + $0x44] sm:$0xff] }
 0x142   : > { %6661 = vmatprep.subr.bf16.mxu0 %v6660_v43 }
 0x144   : > { %5471 = vmatmul.mubr.f32.gmra.mrb[14].mxu0 %v8439_v49 }
 0x145   : > { %6663 = vmatpush3.bf16.msra.mxu0 %v6660_v43  ;;  %5505 = vmatprep.mubr.f32.mxu0 %v1028_v52  ;;  %v1249_v43 = vld [vmem:[#allocation6 + $0x250] sm:$0xff]  ;;  %v1038_v52 = vld [vmem:[%s8259_s15 + $0x5c] sm:$0xff] }
 0x146   : > { %6665 = vmatprep.subr.bf16.mxu0 %v6664_v53 }
 0x148   : > { %5506 = vmatmul.mubr.f32.vlgmr.msra.gmra.mrb[0].mxu0 %v1029_v58  ;;  %v1039_v58 = vld [vmem:[%s8259_s15 + $0x64] sm:$0xff] }
 0x149   : > { %6667 = vmatpush3.bf16.msra.mxu0 %v6664_v53  ;;  %5508 = vmatprep.mubr.f32.mxu0 %v1030_v59  ;;  %v6684_v53 = vpack.c.bf16 %v1250_v44, %v1249_v43  ;;  %v1040_v59 = vld [vmem:[%s8259_s15 + $0x6c] sm:$0xff]  ;;  %v1437_v43 = vld [vmem:[#allocation6 + $0x2a0] sm:$0xff] }
 0x14a   : > { %6669 = vmatprep.subr.bf16.mxu0 %v6668_v62  ;;  %v1438_v44 = vld [vmem:[#allocation6 + $0x2a8] sm:$0xff] }
 0x14c   : > { %5509 = vmatmul.mubr.f32.gmra.mrb[2].mxu0 %v1031_v4  ;;  %v1041_v4 = vld [vmem:[%s8259_s15 + $0x74] sm:$0xff] }
 0x14d   : > { %6671 = vmatpush3.bf16.msra.mxu0 %v6668_v62  ;;  %5511 = vmatprep.mubr.f32.mxu0 %v1032_v7  ;;  %v6688_v62 = vpack.c.bf16 %v1252_v57, %v1251_v54  ;;  %v1042_v7 = vld [vmem:[%s8259_s15 + $0x7c] sm:$0xff]  ;;  %v1439_v54 = vld [vmem:[#allocation6 + $0x2b0] sm:$0xff] }
 0x14e   : > { %6673 = vmatprep.subr.bf16.mxu0 %v6672_v8  ;;  %v1440_v57 = vld [vmem:[#allocation6 + $0x2b8] sm:$0xff] }
 0x150   : > { %5512 = vmatmul.mubr.f32.gmra.mrb[4].mxu0 %v1033_v15  ;;  %v1043_v15 = vld [vmem:[%s8259_s15 + $0x84] sm:$0xff] }
 0x151   : > { %6675 = vmatpush3.bf16.msra.mxu0 %v6672_v8  ;;  %5514 = vmatprep.mubr.f32.mxu0 %v1034_v18  ;;  %v6692_v8 = vpack.c.bf16 %v1254_v3, %v1253_v2  ;;  %v1222_v18 = vld [vmem:[%s8259_s15 + $0xd] sm:$0xff]  ;;  %v1441_v2 = vld [vmem:[#allocation6 + $0x2c0] sm:$0xff] }
 0x152   : > { %6677 = vmatprep.subr.bf16.mxu0 %v6676_v23  ;;  %v1442_v3 = vld [vmem:[#allocation6 + $0x2c8] sm:$0xff] }
 0x154   : > { %5515 = vmatmul.mubr.f32.gmra.mrb[6].mxu0 %v1035_v30  ;;  %v1223_v30 = vld [vmem:[%s8259_s15 + $0x15] sm:$0xff] }
 0x155   : > { %6679 = vmatpush3.bf16.msra.mxu0 %v6676_v23  ;;  %5517 = vmatprep.mubr.f32.mxu0 %v1036_v33  ;;  %v6696_v23 = vpack.c.bf16 %v1434_v14, %v1433_v9  ;;  %v1224_v33 = vld [vmem:[%s8259_s15 + $0x1d] sm:$0xff]  ;;  %v1443_v9 = vld [vmem:[#allocation6 + $0x2d0] sm:$0xff] }
 0x156   : > { %6681 = vmatprep.subr.bf16.mxu0 %v6680_v34  ;;  %v1444_v14 = vld [vmem:[#allocation6 + $0x2d8] sm:$0xff] }
 0x158   : > { %5518 = vmatmul.mubr.f32.gmra.mrb[8].mxu0 %v1037_v48  ;;  %v1225_v48 = vld [vmem:[%s8259_s15 + $0x25] sm:$0xff] }
 0x159   : > { %6683 = vmatpush3.bf16.msra.mxu0 %v6680_v34  ;;  %5520 = vmatprep.mubr.f32.mxu0 %v1038_v52  ;;  %v6700_v34 = vpack.c.bf16 %v1436_v25, %v1435_v24  ;;  %v1226_v52 = vld [vmem:[%s8259_s15 + $0x2d] sm:$0xff]  ;;  %v1445_v24 = vld [vmem:[#allocation6 + $0x2e0] sm:$0xff] }
 0x15a   : > { %6685 = vmatprep.subr.bf16.mxu0 %v6684_v53  ;;  %v1446_v25 = vld [vmem:[#allocation6 + $0x2e8] sm:$0xff] }
 0x15c   : > { %5521 = vmatmul.mubr.f32.gmra.mrb[10].mxu0 %v1039_v58  ;;  %v1227_v58 = vld [vmem:[%s8259_s15 + $0x35] sm:$0xff] }
 0x15d   : > { %6687 = vmatpush3.bf16.msra.mxu0 %v6684_v53  ;;  %5523 = vmatprep.mubr.f32.mxu0 %v1040_v59  ;;  %v6704_v53 = vpack.c.bf16 %v1438_v44, %v1437_v43  ;;  %v1228_v59 = vld [vmem:[%s8259_s15 + $0x3d] sm:$0xff]  ;;  %v1447_v43 = vld [vmem:[#allocation6 + $0x2f0] sm:$0xff] }
 0x15e   : > { %6689 = vmatprep.subr.bf16.mxu0 %v6688_v62  ;;  %v1448_v44 = vld [vmem:[#allocation6 + $0x2f8] sm:$0xff] }
 0x160   : > { %5524 = vmatmul.mubr.f32.gmra.mrb[12].mxu0 %v1041_v4  ;;  %v1229_v4 = vld [vmem:[%s8259_s15 + $0x45] sm:$0xff] }
 0x161   : > { %6691 = vmatpush3.bf16.msra.mxu0 %v6688_v62  ;;  %5526 = vmatprep.mubr.f32.mxu0 %v1042_v7  ;;  %v6708_v62 = vpack.c.bf16 %v1440_v57, %v1439_v54  ;;  %v1230_v7 = vld [vmem:[%s8259_s15 + $0x4d] sm:$0xff]  ;;  %v1627_v54 = vld [vmem:[#allocation6 + $0x300] sm:$0xff] }
 0x162   : > { %6693 = vmatprep.subr.bf16.mxu0 %v6692_v8  ;;  %v1628_v57 = vld [vmem:[#allocation6 + $0x308] sm:$0xff] }
 0x164   : > { %5527 = vmatmul.mubr.f32.gmra.mrb[14].mxu0 %v1043_v15  ;;  %v1231_v15 = vld [vmem:[%s8259_s15 + $0x55] sm:$0xff] }
 0x165   : > { %6695 = vmatpush3.bf16.msra.mxu0 %v6692_v8  ;;  %5561 = vmatprep.mubr.f32.mxu0 %v1222_v18  ;;  %v6712_v8 = vpack.c.bf16 %v1442_v3, %v1441_v2  ;;  %v1232_v18 = vld [vmem:[%s8259_s15 + $0x5d] sm:$0xff]  ;;  %v1629_v2 = vld [vmem:[#allocation6 + $0x310] sm:$0xff] }
 0x166   : > { %6697 = vmatprep.subr.bf16.mxu0 %v6696_v23  ;;  %v1630_v3 = vld [vmem:[#allocation6 + $0x318] sm:$0xff] }
 0x168   : > { %5562 = vmatmul.mubr.f32.vlgmr.msra.gmra.mrb[0].mxu0 %v1223_v30  ;;  %v1233_v30 = vld [vmem:[%s8259_s15 + $0x65] sm:$0xff] }
 0x169   : > { %6699 = vmatpush3.bf16.msra.mxu0 %v6696_v23  ;;  %5564 = vmatprep.mubr.f32.mxu0 %v1224_v33  ;;  %v6716_v23 = vpack.c.bf16 %v1444_v14, %v1443_v9  ;;  %v1234_v33 = vld [vmem:[%s8259_s15 + $0x6d] sm:$0xff]  ;;  %v1631_v9 = vld [vmem:[#allocation6 + $0x320] sm:$0xff] }
 0x16a   : > { %6701 = vmatprep.subr.bf16.mxu0 %v6700_v34  ;;  %v1632_v14 = vld [vmem:[#allocation6 + $0x328] sm:$0xff] }
 0x16c   : > { %5565 = vmatmul.mubr.f32.gmra.mrb[2].mxu0 %v1225_v48  ;;  %v1235_v48 = vld [vmem:[%s8259_s15 + $0x75] sm:$0xff] }
 0x16d   : > { %6703 = vmatpush3.bf16.msra.mxu0 %v6700_v34  ;;  %5567 = vmatprep.mubr.f32.mxu0 %v1226_v52  ;;  %v6720_v34 = vpack.c.bf16 %v1446_v25, %v1445_v24  ;;  %v1236_v52 = vld [vmem:[%s8259_s15 + $0x7d] sm:$0xff]  ;;  %v1633_v24 = vld [vmem:[#allocation6 + $0x330] sm:$0xff] }
 0x16e   : > { %6705 = vmatprep.subr.bf16.mxu0 %v6704_v53  ;;  %v1634_v25 = vld [vmem:[#allocation6 + $0x338] sm:$0xff] }
 0x170   : > { %5568 = vmatmul.mubr.f32.gmra.mrb[4].mxu0 %v1227_v58  ;;  %v1237_v58 = vld [vmem:[%s8259_s15 + $0x85] sm:$0xff] }
 0x171   : > { %6707 = vmatpush3.bf16.msra.mxu0 %v6704_v53  ;;  %5570 = vmatprep.mubr.f32.mxu0 %v1228_v59  ;;  %v6724_v53 = vpack.c.bf16 %v1448_v44, %v1447_v43  ;;  %v1416_v59 = vld [vmem:[%s8259_s15 + $0xe] sm:$0xff]  ;;  %v1635_v43 = vld [vmem:[#allocation6 + $0x340] sm:$0xff] }
 0x172   : > { %6709 = vmatprep.subr.bf16.mxu0 %v6708_v62  ;;  %v1636_v44 = vld [vmem:[#allocation6 + $0x348] sm:$0xff] }
 0x174   : > { %5571 = vmatmul.mubr.f32.gmra.mrb[6].mxu0 %v1229_v4  ;;  %v1417_v4 = vld [vmem:[%s8259_s15 + $0x16] sm:$0xff] }
 0x175   : > { %6711 = vmatpush3.bf16.msra.mxu0 %v6708_v62  ;;  %5573 = vmatprep.mubr.f32.mxu0 %v1230_v7  ;;  %v6728_v62 = vpack.c.bf16 %v1628_v57, %v1627_v54  ;;  %v1418_v7 = vld [vmem:[%s8259_s15 + $0x1e] sm:$0xff]  ;;  %v1637_v54 = vld [vmem:[#allocation6 + $0x350] sm:$0xff] }
 0x176   : > { %6713 = vmatprep.subr.bf16.mxu0 %v6712_v8  ;;  %v1638_v57 = vld [vmem:[#allocation6 + $0x358] sm:$0xff] }
 0x178   : > { %5574 = vmatmul.mubr.f32.gmra.mrb[8].mxu0 %v1231_v15  ;;  %v1419_v15 = vld [vmem:[%s8259_s15 + $0x26] sm:$0xff] }
 0x179   : > { %6715 = vmatpush3.bf16.msra.mxu0 %v6712_v8  ;;  %5576 = vmatprep.mubr.f32.mxu0 %v1232_v18  ;;  %v6732_v8 = vpack.c.bf16 %v1630_v3, %v1629_v2  ;;  %v1420_v18 = vld [vmem:[%s8259_s15 + $0x2e] sm:$0xff]  ;;  %v1639_v2 = vld [vmem:[#allocation6 + $0x360] sm:$0xff] }
 0x17a   : > { %6717 = vmatprep.subr.bf16.mxu0 %v6716_v23  ;;  %v1640_v3 = vld [vmem:[#allocation6 + $0x368] sm:$0xff] }
 0x17c   : > { %5577 = vmatmul.mubr.f32.gmra.mrb[10].mxu0 %v1233_v30  ;;  %v1421_v30 = vld [vmem:[%s8259_s15 + $0x36] sm:$0xff] }
 0x17d   : > { %6719 = vmatpush3.bf16.msra.mxu0 %v6716_v23  ;;  %5579 = vmatprep.mubr.f32.mxu0 %v1234_v33  ;;  %v6736_v23 = vpack.c.bf16 %v1632_v14, %v1631_v9  ;;  %v1422_v33 = vld [vmem:[%s8259_s15 + $0x3e] sm:$0xff]  ;;  %v1641_v9 = vld [vmem:[#allocation6 + $0x370] sm:$0xff] }
 0x17e   : > { %6721 = vmatprep.subr.bf16.mxu0 %v6720_v34  ;;  %v1642_v14 = vld [vmem:[#allocation6 + $0x378] sm:$0xff] }
 0x180   : > { %5580 = vmatmul.mubr.f32.gmra.mrb[12].mxu0 %v1235_v48  ;;  %v1423_v48 = vld [vmem:[%s8259_s15 + $0x46] sm:$0xff] }
 0x181   : > { %6723 = vmatpush3.bf16.msra.mxu0 %v6720_v34  ;;  %5582 = vmatprep.mubr.f32.mxu0 %v1236_v52  ;;  %v6740_v34 = vpack.c.bf16 %v1634_v25, %v1633_v24  ;;  %v1424_v52 = vld [vmem:[%s8259_s15 + $0x4e] sm:$0xff]  ;;  %v1821_v24 = vld [vmem:[#allocation6 + $0x380] sm:$0xff] }
 0x182   : > { %6725 = vmatprep.subr.bf16.mxu0 %v6724_v53  ;;  %v1822_v25 = vld [vmem:[#allocation6 + $0x388] sm:$0xff] }
 0x184   : > { %5583 = vmatmul.mubr.f32.gmra.mrb[14].mxu0 %v1237_v58  ;;  %v1425_v58 = vld [vmem:[%s8259_s15 + $0x56] sm:$0xff] }
 0x185   : > { %6727 = vmatpush3.bf16.msra.mxu0 %v6724_v53  ;;  %5617 = vmatprep.mubr.f32.mxu0 %v1416_v59  ;;  %v6744_v53 = vpack.c.bf16 %v1636_v44, %v1635_v43  ;;  %v1426_v59 = vld [vmem:[%s8259_s15 + $0x5e] sm:$0xff] }
 0x186   : > { %6729 = vmatprep.subr.bf16.mxu0 %v6728_v62  ;;  %v1824_v43 = vld [vmem:[#allocation6 + $0x398] sm:$0xff] }
 0x188   : > { %5618 = vmatmul.mubr.f32.vlgmr.msra.gmra.mrb[0].mxu0 %v1417_v4  ;;  %v1427_v4 = vld [vmem:[%s8259_s15 + $0x66] sm:$0xff] }
 0x189   : > { %6731 = vmatpush3.bf16.msra.mxu0 %v6728_v62  ;;  %5620 = vmatprep.mubr.f32.mxu0 %v1418_v7  ;;  %v6748_v62 = vpack.c.bf16 %v1638_v57, %v1637_v54  ;;  %v1428_v7 = vld [vmem:[%s8259_s15 + $0x6e] sm:$0xff]  ;;  %v1828_v57 = vld [vmem:[#allocation6 + $0x3b8] sm:$0xff] }
 0x18a   : > { %6733 = vmatprep.subr.bf16.mxu0 %v6732_v8  ;;  %v1827_v54 = vld [vmem:[#allocation6 + $0x3b0] sm:$0xff] }
 0x18c   : > { %5621 = vmatmul.mubr.f32.gmra.mrb[2].mxu0 %v1419_v15  ;;  %v1429_v15 = vld [vmem:[%s8259_s15 + $0x76] sm:$0xff] }
 0x18d   : > { %6735 = vmatpush3.bf16.msra.mxu0 %v6732_v8  ;;  %5623 = vmatprep.mubr.f32.mxu0 %v1420_v18  ;;  %v6752_v8 = vpack.c.bf16 %v1640_v3, %v1639_v2  ;;  %v1430_v18 = vld [vmem:[%s8259_s15 + $0x7e] sm:$0xff]  ;;  %v1834_v2 = vld [vmem:[#allocation6 + $0x3e8] sm:$0xff] }
 0x18e   : > { %6737 = vmatprep.subr.bf16.mxu0 %v6736_v23  ;;  %v1836_v3 = vld [vmem:[#allocation6 + $0x3f8] sm:$0xff] }
 0x190   : > { %5624 = vmatmul.mubr.f32.gmra.mrb[4].mxu0 %v1421_v30  ;;  %v1431_v30 = vld [vmem:[%s8259_s15 + $0x86] sm:$0xff] }
 0x191   : > { %6739 = vmatpush3.bf16.msra.mxu0 %v6736_v23  ;;  %5626 = vmatprep.mubr.f32.mxu0 %v1422_v33  ;;  %v6756_v23 = vpack.c.bf16 %v1642_v14, %v1641_v9  ;;  %v6760_v33 = vpack.c.bf16 %v1822_v25, %v1821_v24  ;;  %v2017_v9 = vld [vmem:[#allocation6 + $0x410] sm:$0xff]  ;;  %v2018_v14 = vld [vmem:[#allocation6 + $0x418] sm:$0xff]  ;;  %v2023_v25 = vld [vmem:[#allocation6 + $0x440] sm:$0xff] }
 0x192   : > { %6741 = vmatprep.subr.bf16.mxu0 %v6740_v34  ;;  %v2022_v24 = vld [vmem:[#allocation6 + $0x438] sm:$0xff] }
 0x194   : > { %5627 = vmatmul.mubr.f32.gmra.mrb[6].mxu0 %v1423_v48  ;;  %v1825_v48 = vld [vmem:[#allocation6 + $0x3a0] sm:$0xff] }
 0x195   : > { %6743 = vmatpush3.bf16.msra.mxu0 %v6740_v34  ;;  %5629 = vmatprep.mubr.f32.mxu0 %v1424_v52  ;;  %v1823_v34 = vld [vmem:[#allocation6 + $0x390] sm:$0xff]  ;;  %v1826_v52 = vld [vmem:[#allocation6 + $0x3a8] sm:$0xff] }
 0x196   : > { %6745 = vmatprep.subr.bf16.mxu0 %v6744_v53  ;;  %v6764_v44 = vpack.c.bf16 %v1824_v43, %v1823_v34  ;;  %v2028_v34 = vld [vmem:[#allocation6 + $0x468] sm:$0xff]  ;;  %v2030_v43 = vld [vmem:[#allocation6 + $0x478] sm:$0xff] }
 0x198   : > { %5630 = vmatmul.mubr.f32.gmra.mrb[8].mxu0 %v1425_v58  ;;  %v1829_v58 = vld [vmem:[#allocation6 + $0x3c0] sm:$0xff] }
 0x199   : > { %6747 = vmatpush3.bf16.msra.mxu0 %v6744_v53  ;;  %5632 = vmatprep.mubr.f32.mxu0 %v1426_v59  ;;  %v6768_v53 = vpack.c.bf16 %v1826_v52, %v1825_v48  ;;  %v1830_v59 = vld [vmem:[#allocation6 + $0x3c8] sm:$0xff] }
 0x19a   : > { %6749 = vmatprep.subr.bf16.mxu0 %v6748_v62  ;;  %v2458_v48 = vld [vmem:[#allocation8 + $0xc8] sm:$0xff] }
 0x19c   : > { %5633 = vmatmul.mubr.f32.gmra.mrb[10].mxu0 %v1427_v4 }
 0x19d   : > { %6751 = vmatpush3.bf16.msra.mxu0 %v6748_v62  ;;  %5635 = vmatprep.mubr.f32.mxu0 %v1428_v7  ;;  %v1832_v62 = vld [vmem:[#allocation6 + $0x3d8] sm:$0xff]  ;;  %v2015_v7 = vld [vmem:[#allocation6 + $0x400] sm:$0xff] }
 0x19e   : > { %6753 = vmatprep.subr.bf16.mxu0 %v6752_v8 }
 0x1a0   : > { %5636 = vmatmul.mubr.f32.gmra.mrb[12].mxu0 %v1429_v15  ;;  %v2020_v15 = vld [vmem:[#allocation6 + $0x428] sm:$0xff] }
 0x1a1   : > { %6755 = vmatpush3.bf16.msra.mxu0 %v6752_v8  ;;  %5638 = vmatprep.mubr.f32.mxu0 %v1430_v18  ;;  %v2016_v8 = vld [vmem:[#allocation6 + $0x408] sm:$0xff] }
 0x1a2   : > { %6757 = vmatprep.subr.bf16.mxu0 %v6756_v23 }
 0x1a4   : > { %5639 = vmatmul.mubr.f32.gmra.mrb[14].mxu0 %v1431_v30  ;;  %v2024_v30 = vld [vmem:[#allocation6 + $0x448] sm:$0xff] }
 0x1a5   : > { %6759 = vmatpush3.bf16.msra.mxu0 %v6756_v23  ;;  %5673 = vmatprep.mubr.f32.mxu0 %v8336_v11  ;;  %v6772_v11 = vpack.c.bf16 %v1828_v57, %v1827_v54  ;;  %v2021_v23 = vld [vmem:[#allocation6 + $0x430] sm:$0xff]  ;;  %v2460_v54 = vld [vmem:[#allocation8 + $0xd8] sm:$0xff] }
 0x1a6   : > { %6761 = vmatprep.subr.bf16.mxu0 %v6760_v33 }
 0x1a8   : > { %5674 = vmatmul.mubr.f32.vlgmr.msra.gmra.mrb[0].mxu0 %v8339_v12  ;;  %v6776_v12 = vpack.c.bf16 %v1830_v59, %v1829_v58  ;;  %v2462_v58 = vld [vmem:[#allocation8 + $0xe8] sm:$0xff] }
 0x1a9   : > { %6763 = vmatpush3.bf16.msra.mxu0 %v6760_v33  ;;  %5676 = vmatprep.mubr.f32.mxu0 %v8344_v16  ;;  %v1831_v16 = vld [vmem:[#allocation6 + $0x3d0] sm:$0xff]  ;;  %v2026_v33 = vld [vmem:[#allocation6 + $0x458] sm:$0xff] }
 0x1aa   : > { %6765 = vmatprep.subr.bf16.mxu0 %v6764_v44 }
 0x1ac   : > { %5677 = vmatmul.mubr.f32.gmra.mrb[2].mxu0 %v8347_v17  ;;  %v6780_v17 = vpack.c.bf16 %v1832_v62, %v1831_v16  ;;  %v2464_v16 = vld [vmem:[#allocation8 + $0xf8] sm:$0xff] }
 0x1ad   : > { %6767 = vmatpush3.bf16.msra.mxu0 %v6764_v44  ;;  %5679 = vmatprep.mubr.f32.mxu0 %v8352_v21  ;;  %v1833_v21 = vld [vmem:[#allocation6 + $0x3e0] sm:$0xff] }
 0x1ae   : > { %6769 = vmatprep.subr.bf16.mxu0 %v6768_v53 }
 0x1b0   : > { %5680 = vmatmul.mubr.f32.gmra.mrb[4].mxu0 %v8355_v22  ;;  %v6784_v22 = vpack.c.bf16 %v1834_v2, %v1833_v21  ;;  %v2433_v21 = vld [vmem:[#allocation8 + $0x8] sm:$0xff] }
 0x1b1   : > { %6771 = vmatpush3.bf16.msra.mxu0 %v6768_v53  ;;  %5682 = vmatprep.mubr.f32.mxu0 %v8360_v26  ;;  %v1835_v26 = vld [vmem:[#allocation6 + $0x3f0] sm:$0xff] }
 0x1b2   : > { %6773 = vmatprep.subr.bf16.mxu0 %v6772_v11  ;;  %v6788_v4 = vpack.c.bf16 %v1836_v3, %v1835_v26  ;;  %v2459_v53 = vld [vmem:[#allocation8 + $0xd0] sm:$0xff] }
 0x1b3   : > { %v6844_v57 = vpack.c.bf16 %v2460_v54, %v2459_v53 }
 0x1b4   : > { %5683 = vmatmul.mubr.f32.gmra.mrb[6].mxu0 %v8363_v27  ;;  %v1623_v27 = vld [vmem:[%s8259_s15 + $0x80] sm:$0xff] }
 0x1b5   : > { %6775 = vmatpush3.bf16.msra.mxu0 %v6772_v11  ;;  %5685 = vmatprep.mubr.f32.mxu0 %v8368_v31  ;;  %v1624_v31 = vld [vmem:[%s8259_s15 + $0x88] sm:$0xff]  ;;  %v2461_v11 = vld [vmem:[#allocation8 + $0xe0] sm:$0xff] }
 0x1b6   : > { %6777 = vmatprep.subr.bf16.mxu0 %v6776_v12  ;;  %v6848_v59 = vpack.c.bf16 %v2462_v58, %v2461_v11 }
 0x1b8   : > { %5686 = vmatmul.mubr.f32.gmra.mrb[8].mxu0 %v8371_v32  ;;  %v1625_v32 = vld [vmem:[%s8259_s15 + $0x90] sm:$0xff] }
 0x1b9   : > { %6779 = vmatpush3.bf16.msra.mxu0 %v6776_v12  ;;  %5688 = vmatprep.mubr.f32.mxu0 %v8376_v38  ;;  %v6792_v38 = vpack.c.bf16 %v2016_v8, %v2015_v7  ;;  %v2463_v12 = vld [vmem:[#allocation8 + $0xf0] sm:$0xff] }
 0x1ba   : > { %6781 = vmatprep.subr.bf16.mxu0 %v6780_v17  ;;  %v6852_v62 = vpack.c.bf16 %v2464_v16, %v2463_v12 }
 0x1bc   : > { %5689 = vmatmul.mubr.f32.gmra.mrb[10].mxu0 %v8379_v39  ;;  %v6796_v39 = vpack.c.bf16 %v2018_v14, %v2017_v9 }
 0x1bd   : > { %6783 = vmatpush3.bf16.msra.mxu0 %v6780_v17  ;;  %5691 = vmatprep.mubr.f32.mxu0 %v8384_v47  ;;  %v2019_v47 = vld [vmem:[#allocation6 + $0x420] sm:$0xff] }
 0x1be   : > { %6785 = vmatprep.subr.bf16.mxu0 %v6784_v22  ;;  %v6800_v18 = vpack.c.bf16 %v2020_v15, %v2019_v47  ;;  %v2432_v17 = vld [vmem:[#allocation8] sm:$0xff] }
 0x1bf   : > { %v8538_v2 = vpack.c.bf16 %v2433_v21, %v2432_v17 }
 0x1c0   : > { %5692 = vmatmul.mubr.f32.gmra.mrb[12].mxu0 %v1623_v27 }
 0x1c1   : > { %6787 = vmatpush3.bf16.msra.mxu0 %v6784_v22  ;;  %5694 = vmatprep.mubr.f32.mxu0 %v1624_v31  ;;  %v8544_v22 = vld [vmem:[%s8974_s2] ss:$0 sm:$0xff] }
 0x1c2   : > { %6789 = vmatprep.subr.bf16.mxu0 %v6788_v4 }
 0x1c4   : > { %5695 = vmatmul.mubr.f32.gmra.mrb[14].mxu0 %v1625_v32 }
 0x1c5   : > { %6791 = vmatpush3.bf16.msra.mxu0 %v6788_v4  ;;  %5729 = vmatprep.mubr.f32.mxu0 %v8281_v35  ;;  %v6804_v35 = vpack.c.bf16 %v2022_v24, %v2021_v23 }
 0x1c6   : > { %6793 = vmatprep.subr.bf16.mxu0 %v6792_v38 }
 0x1c8   : > { %5730 = vmatmul.mubr.f32.vlgmr.msra.gmra.mrb[0].mxu0 %v8284_v36  ;;  %v6808_v36 = vpack.c.bf16 %v2024_v30, %v2023_v25 }
 0x1c9   : > { %6795 = vmatpush3.bf16.msra.mxu0 %v6792_v38  ;;  %5732 = vmatprep.mubr.f32.mxu0 %v8289_v40  ;;  %v2025_v40 = vld [vmem:[#allocation6 + $0x450] sm:$0xff] }
 0x1ca   : > { %6797 = vmatprep.subr.bf16.mxu0 %v6796_v39 }
 0x1cc   : > { %5733 = vmatmul.mubr.f32.gmra.mrb[2].mxu0 %v8292_v41  ;;  %v6812_v41 = vpack.c.bf16 %v2026_v33, %v2025_v40 }
 0x1cd   : > { %6799 = vmatpush3.bf16.msra.mxu0 %v6796_v39  ;;  %5735 = vmatprep.mubr.f32.mxu0 %v8297_v45  ;;  %v2027_v45 = vld [vmem:[#allocation6 + $0x460] sm:$0xff] }
 0x1ce   : > { %6801 = vmatprep.subr.bf16.mxu0 %v6800_v18 }
 0x1d0   : > { %5736 = vmatmul.mubr.f32.gmra.mrb[4].mxu0 %v8300_v46  ;;  %v6816_v46 = vpack.c.bf16 %v2028_v34, %v2027_v45 }
 0x1d1   : > { %6803 = vmatpush3.bf16.msra.mxu0 %v6800_v18  ;;  %5738 = vmatprep.mubr.f32.mxu0 %v8305_v50  ;;  %v2029_v50 = vld [vmem:[#allocation6 + $0x470] sm:$0xff] }
 0x1d2   : > { %6805 = vmatprep.subr.bf16.mxu0 %v6804_v35  ;;  %v6820_v44 = vpack.c.bf16 %v2030_v43, %v2029_v50 }
 0x1d4   : > { %5739 = vmatmul.mubr.f32.gmra.mrb[6].mxu0 %v8308_v51  ;;  %v1817_v51 = vld [vmem:[%s8259_s15 + $0x81] sm:$0xff] }
 0x1d5   : > { %6807 = vmatpush3.bf16.msra.mxu0 %v6804_v35  ;;  %5741 = vmatprep.mubr.f32.mxu0 %v8313_v55  ;;  %v1818_v55 = vld [vmem:[%s8259_s15 + $0x89] sm:$0xff] }
 0x1d6   : > { %6809 = vmatprep.subr.bf16.mxu0 %v6808_v36 }
 0x1d8   : > { %5742 = vmatmul.mubr.f32.gmra.mrb[8].mxu0 %v8316_v56  ;;  %v1819_v56 = vld [vmem:[%s8259_s15 + $0x91] sm:$0xff] }
 0x1d9   : > { %6811 = vmatpush3.bf16.msra.mxu0 %v6808_v36  ;;  %5744 = vmatprep.mubr.f32.mxu0 %v8321_v60  ;;  %v2011_v60 = vld [vmem:[%s8259_s15 + $0x82] sm:$0xff] }
 0x1da   : > { %6813 = vmatprep.subr.bf16.mxu0 %v6812_v41 }
 0x1dc   : > { %5745 = vmatmul.mubr.f32.gmra.mrb[10].mxu0 %v8324_v61  ;;  %v2012_v61 = vld [vmem:[%s8259_s15 + $0x8a] sm:$0xff] }
 0x1dd   : > { %6815 = vmatpush3.bf16.msra.mxu0 %v6812_v41  ;;  %5747 = vmatprep.mubr.f32.mxu0 %v8329_v1  ;;  %v2013_v1 = vld [vmem:[%s8259_s15 + $0x92] sm:$0xff]  ;;  %s4646_s15 = sshll.u32 %s8027_s23, 7  ;;  %s7945_s23 = smov [#allocation14]  }
 0x1de   : > { %6817 = vmatprep.subr.bf16.mxu0 %v6816_v46  ;;  %s8928_s8 = scalar_lea.hbm %s9016_s1, %s4646_s15 }
 0x1e0   : > { %5748 = vmatmul.mubr.f32.gmra.mrb[12].mxu0 %v1817_v51 }
 0x1e1   : > { %6819 = vmatpush3.bf16.msra.mxu0 %v6816_v46  ;;  %5750 = vmatprep.mubr.f32.mxu0 %v1818_v55 }
 0x1e2   : > { %6821 = vmatprep.subr.bf16.mxu0 %v6820_v44 }
 0x1e4   : > { %5751 = vmatmul.mubr.f32.gmra.mrb[14].mxu0 %v1819_v56 }
 0x1e5   : > { %6823 = vmatpush3.bf16.msra.mxu0 %v6820_v44  ;;  %5785 = vmatprep.mubr.f32.mxu0 %v8391_v63  ;;  %v2449_v63 = vld [vmem:[#allocation8 + $0x80] sm:$0xff] }
 0x1e8   : > { %5786 = vmatmul.mubr.f32.vlgmr.msra.gmra.mrb[0].mxu0 %v8394_v0  ;;  %v2450_v0 = vld [vmem:[#allocation8 + $0x88] sm:$0xff] }
 0x1e9   : > { %5788 = vmatprep.mubr.f32.mxu0 %v8399_v5  ;;  %v6824_v5 = vpack.c.bf16 %v2450_v0, %v2449_v63 }
 0x1eb   : > { %6825 = vmatprep.subr.bf16.mxu1 %v6824_v5 }
 0x1ec   : > { %5789 = vmatmul.mubr.f32.gmra.mrb[2].mxu0 %v8402_v6  ;;  %6827 = vmatpush3.bf16.msra.mxu1 %v6824_v5  ;;  %v2451_v6 = vld [vmem:[#allocation8 + $0x90] sm:$0xff] }
 0x1ed   : > { %5791 = vmatprep.mubr.f32.mxu0 %v8407_v10  ;;  %v2452_v10 = vld [vmem:[#allocation8 + $0x98] sm:$0xff] }
 0x1f0   : > { %5792 = vmatmul.mubr.f32.gmra.mrb[4].mxu0 %v8410_v13  ;;  %v6828_v13 = vpack.c.bf16 %v2452_v10, %v2451_v6 }
 0x1f1   : > { %5794 = vmatprep.mubr.f32.mxu0 %v8415_v19  ;;  %v2453_v19 = vld [vmem:[#allocation8 + $0xa0] sm:$0xff] }
 0x1f2   : > { %6829 = vmatprep.subr.bf16.mxu1 %v6828_v13 }
 0x1f3   : > { %6831 = vmatpush3.bf16.msra.mxu1 %v6828_v13 }
 0x1f4   : > { %5795 = vmatmul.mubr.f32.gmra.mrb[6].mxu0 %v8418_v20  ;;  %v2454_v20 = vld [vmem:[#allocation8 + $0xa8] sm:$0xff] }
 0x1f5   : > { %5797 = vmatprep.mubr.f32.mxu0 %v8423_v28  ;;  %v6832_v28 = vpack.c.bf16 %v2454_v20, %v2453_v19 }
 0x1f7   : > { %6833 = vmatprep.subr.bf16.mxu1 %v6832_v28 }
 0x1f8   : > { %5798 = vmatmul.mubr.f32.gmra.mrb[8].mxu0 %v8426_v29  ;;  %6835 = vmatpush3.bf16.msra.mxu1 %v6832_v28  ;;  %v2455_v29 = vld [vmem:[#allocation8 + $0xb0] sm:$0xff] }
 0x1f9   : > { %5800 = vmatprep.mubr.f32.mxu0 %v8431_v37  ;;  %v2456_v37 = vld [vmem:[#allocation8 + $0xb8] sm:$0xff] }
 0x1fc   : > { %5801 = vmatmul.mubr.f32.gmra.mrb[10].mxu0 %v8434_v42  ;;  %v6836_v42 = vpack.c.bf16 %v2456_v37, %v2455_v29 }
 0x1fd   : > { %5803 = vmatprep.mubr.f32.mxu0 %v8439_v49  ;;  %v2457_v49 = vld [vmem:[#allocation8 + $0xc0] sm:$0xff] }
 0x1fe   : > { %6837 = vmatprep.subr.bf16.mxu1 %v6836_v42  ;;  %v6840_v52 = vpack.c.bf16 %v2458_v48, %v2457_v49 }
 0x1ff   : > { %6839 = vmatpush3.bf16.msra.mxu1 %v6836_v42 }
 0x200   : > { %5804 = vmatmul.mubr.f32.gmra.mrb[12].mxu0 %v2011_v60  ;;  %6841 = vmatprep.subr.bf16.mxu1 %v6840_v52 }
 0x201   : > { %5806 = vmatprep.mubr.f32.mxu0 %v2012_v61 }
 0x203   : > { %6843 = vmatpush3.bf16.msra.mxu1 %v6840_v52 }
 0x204   : > { %5807 = vmatmul.mubr.f32.gmra.mrb[14].mxu0 %v2013_v1  ;;  %6845 = vmatprep.subr.bf16.mxu1 %v6844_v57 }
 0x207   : > { %6847 = vmatpush3.bf16.msra.mxu1 %v6844_v57 }
 0x208   : > { %6849 = vmatprep.subr.bf16.mxu1 %v6848_v59 }
 0x20b   : > { %6851 = vmatpush3.bf16.msra.mxu1 %v6848_v59 }
 0x20c   : > { %6853 = vmatprep.subr.bf16.mxu1 %v6852_v62 }
 0x20f   : > { %6855 = vmatpush3.bf16.msra.mxu1 %v6852_v62 }
 0x210   : > { %6857 = vmatprep.subr.bf16.mxu1 %v8538_v2 }
 0x2bb   : > { %v5787_v26 = vpop.f32.mrb[0].mxu0 }
 0x2bc   : > { %v2200_v3 = vadd.f32 %v5787_v26, %v8544_v22  ;;  %v2097_v27 = vpop.f32.mrb[1].mxu0 }
 0x2bd   : > { %v2199_v31 = vadd.f32 %v8544_v22, %v2097_v27 }
 0x2be   : > { %v2233_v4 = vmul.f32 1.442695, %v2200_v3  ;;  %vm2216_vm0 = vcmp.gt.f32.partialorder %v2200_v3, 0.0 }
 0x2bf   : > { %v2231_v7 = vmul.f32 1.442695, %v2199_v31  ;;  %v5790_v8 = vpop.f32.mrb[2].mxu0  ;;  %vm2215_vm1 = vcmp.gt.f32.partialorder %v2199_v31, 0.0 }
 0x2c0   : > { %7640 = vpow2.f32 %v2233_v4  ;;  %v2202_v32 = vadd.f32 %v5790_v8, %v8544_v22  ;;  %v2107_v38 = vpop.f32.mrb[3].mxu0 }
 0x2c1   : > { %7642 = vpow2.f32 %v2231_v7  ;;  %v2201_v9 = vadd.f32 %v8544_v22, %v2107_v38 }
 0x2c2   : > { %v2237_v14 = vmul.f32 1.442695, %v2202_v32  ;;  %vm2218_vm2 = vcmp.gt.f32.partialorder %v2202_v32, 0.0 }
 0x2c3   : > { %v2235_v39 = vmul.f32 1.442695, %v2201_v9  ;;  %v5793_v47 = vpop.f32.mrb[4].mxu0  ;;  %vm2217_vm3 = vcmp.gt.f32.partialorder %v2201_v9, 0.0 }
 0x2c4   : > { %7644 = vpow2.f32 %v2237_v14  ;;  %v2204_v15 = vadd.f32 %v5793_v47, %v8544_v22  ;;  %v2117_v18 = vpop.f32.mrb[5].mxu0 }
 0x2c5   : > { %7646 = vpow2.f32 %v2235_v39  ;;  %v8552_v23 = vadd.f32 %v8544_v22, %v2117_v18 }
 0x2c6   : > { %v2241_v24 = vmul.f32 1.442695, %v2204_v15  ;;  %vm2220_vm4 = vcmp.gt.f32.partialorder %v2204_v15, 0.0 }
 0x2c7   : > { %v2239_v35 = vmul.f32 1.442695, %v8552_v23  ;;  %v5796_v25 = vpop.f32.mrb[6].mxu0  ;;  %vm2219_vm5 = vcmp.gt.f32.partialorder %v8552_v23, 0.0 }
 0x2c8   : > { %7648 = vpow2.f32 %v2241_v24  ;;  %v8556_v30 = vadd.f32 %v5796_v25, %v8544_v22  ;;  %v2127_v36 = vpop.f32.mrb[7].mxu0 }
 0x2c9   : > { %7650 = vpow2.f32 %v2239_v35  ;;  %v8559_v40 = vadd.f32 %v8544_v22, %v2127_v36 }
 0x2ca   : > { %v7641_v33 = vpop.eup %7640  ;;  %v2245_v41 = vmul.f32 1.442695, %v8556_v30  ;;  %vm2222_vm6 = vcmp.gt.f32.partialorder %v8556_v30, 0.0 }
 0x2cb   : > { %v7643_v45 = vpop.eup %7642  ;;  %v4620_v34 = vadd.f32 -1.0, %v7641_v33  ;;  %v2243_v46 = vmul.f32 1.442695, %v8559_v40  ;;  %v5799_v50 = vpop.f32.mrb[8].mxu0  ;;  %vm2221_vm7 = vcmp.gt.f32.partialorder %v8559_v40, 0.0 }
 0x2cc   : > { %v4619_v43 = vadd.f32 -1.0, %v7643_v45  ;;  %7652 = vpow2.f32 %v2245_v41  ;;  %v8564_v51 = vadd.f32 %v5799_v50, %v8544_v22  ;;  %v2137_v55 = vpop.f32.mrb[9].mxu0 }
 0x2cd   : > { %v8566_v44 = vsel %vm2216_vm0, %v2200_v3, %v4620_v34  ;;  %7654 = vpow2.f32 %v2243_v46  ;;  %v8569_v56 = vadd.f32 %v8544_v22, %v2137_v55  ;;  %vm2470_vm0 = vcmask 1046528  }
 0x2ce   : > { %v7645_v60 = vpop.eup %7644  ;;  %2296 = vst [vmem:[#allocation2 + $0x8] sm:$0xff] %v8566_v44  ;;  %v8572_v61 = vsel %vm2215_vm1, %v2199_v31, %v4619_v43  ;;  %v2249_v1 = vmul.f32 1.442695, %v8564_v51  ;;  %vm2224_vm8 = vcmp.gt.f32.partialorder %v8564_v51, 0.0  ;;  %vm2671_vm1 = vcmask 1045504  }
 0x2cf   : > { %v7647_v63 = vpop.eup %7646  ;;  %2295 = vst [vmem:[#allocation2] sm:$0xff] %v8572_v61  ;;  %v4622_v0 = vadd.f32 -1.0, %v7645_v60  ;;  %v2247_v5 = vmul.f32 1.442695, %v8569_v56  ;;  %v5802_v6 = vpop.f32.mrb[10].mxu0  ;;  %vm2223_vm9 = vcmp.gt.f32.partialorder %v8569_v56, 0.0 }
 0x2d0   : > { %v4621_v10 = vadd.f32 -1.0, %v7647_v63  ;;  %7656 = vpow2.f32 %v2249_v1  ;;  %v8578_v13 = vadd.f32 %v5802_v6, %v8544_v22  ;;  %v2147_v19 = vpop.f32.mrb[11].mxu0 }
 0x2d1   : > { %v8580_v20 = vsel %vm2218_vm2, %v2202_v32, %v4622_v0  ;;  %7658 = vpow2.f32 %v2247_v5  ;;  %v8583_v28 = vadd.f32 %v8544_v22, %v2147_v19  ;;  %vm7944_vm2 = vmmov 0  }
 0x2d2   : > { %v7649_v29 = vpop.eup %7648  ;;  %2298 = vst [vmem:[#allocation2 + $0x18] sm:$0xff] %v8580_v20  ;;  %v8586_v37 = vsel %vm2217_vm3, %v2201_v9, %v4621_v10  ;;  %v2253_v42 = vmul.f32 1.442695, %v8578_v13  ;;  %vm2226_vm10 = vcmp.gt.f32.partialorder %v8578_v13, 0.0 }
 0x2d3   : > { %v7651_v49 = vpop.eup %7650  ;;  %2297 = vst [vmem:[#allocation2 + $0x10] sm:$0xff] %v8586_v37  ;;  %v4624_v48 = vadd.f32 -1.0, %v7649_v29  ;;  %v2251_v52 = vmul.f32 1.442695, %v8583_v28  ;;  %v5805_v53 = vpop.f32.mrb[12].mxu0  ;;  %vm2225_vm11 = vcmp.gt.f32.partialorder %v8583_v28, 0.0 }
 0x2d4   : > { %v4623_v54 = vadd.f32 -1.0, %v7651_v49  ;;  %7660 = vpow2.f32 %v2253_v42  ;;  %v8592_v57 = vadd.f32 %v5805_v53, %v8544_v22  ;;  %v2157_v11 = vpop.f32.mrb[13].mxu0 }
 0x2d5   : > { %v8594_v58 = vsel %vm2220_vm4, %v2204_v15, %v4624_v48  ;;  %7662 = vpow2.f32 %v2251_v52  ;;  %v8598_v59 = vadd.f32 %v8544_v22, %v2157_v11 }
 0x2d6   : > { %v7653_v12 = vpop.eup %7652  ;;  %v2325_v16 = vld [vmem:[#allocation2 + $0x1] sm:$0xff]  ;;  %2300 = vst [vmem:[#allocation2 + $0x28] sm:$0xff] %v8594_v58  ;;  %v8602_v62 = vsel %vm2219_vm5, %v8552_v23, %v4623_v54  ;;  %v2257_v17 = vmul.f32 1.442695, %v8592_v57  ;;  %vm2228_vm12 = vcmp.gt.f32.partialorder %v8592_v57, 0.0 }
 0x2d7   : > { %v7655_v21 = vpop.eup %7654  ;;  %2299 = vst [vmem:[#allocation2 + $0x20] sm:$0xff] %v8602_v62  ;;  %v4626_v26 = vadd.f32 -1.0, %v7653_v12  ;;  %v2255_v3 = vmul.f32 1.442695, %v8598_v59  ;;  %v5808_v27 = vpop.f32.mrb[14].mxu0  ;;  %v2339_v8 = vmax.f32 %v8572_v61, %v2325_v16  ;;  %vm2227_vm13 = vcmp.gt.f32.partialorder %v8598_v59, 0.0 }
 0x2d8   : > { %v4625_v31 = vadd.f32 -1.0, %v7655_v21  ;;  %7664 = vpow2.f32 %v2257_v17  ;;  %v8610_v4 = vadd.f32 %v5808_v27, %v8544_v22  ;;  %v2167_v7 = vpop.f32.mrb[15].mxu0 }
 0x2d9   : > { %v8614_v32 = vsel %vm2222_vm6, %v8556_v30, %v4626_v26  ;;  %7666 = vpow2.f32 %v2255_v3  ;;  %v8617_v38 = vadd.f32 %v8544_v22, %v2167_v7 }
 0x2da   : > { %v7657_v9 = vpop.eup %7656  ;;  %v2326_v14 = vld [vmem:[#allocation2 + $0x9] sm:$0xff]  ;;  %v2327_v39 = vld [vmem:[#allocation2 + $0x11] sm:$0xff]  ;;  %2302 = vst [vmem:[#allocation2 + $0x38] sm:$0xff] %v8614_v32  ;;  %v8621_v15 = vsel %vm2221_vm7, %v8559_v40, %v4625_v31  ;;  %v2261_v18 = vmul.f32 1.442695, %v8610_v4  ;;  %vm2230_vm14 = vcmp.gt.f32.partialorder %v8610_v4, 0.0 }
 0x2db   : > { %v2353_v47 = vld [vmem:[#allocation2 + $0xc] sm:$0xff]  ;;  %v7659_v23 = vpop.eup %7658  ;;  %v2340_v24 = vmax.f32 %v8566_v44, %v2326_v14  ;;  %2301 = vst [vmem:[#allocation2 + $0x30] sm:$0xff] %v8621_v15  ;;  %v4628_v22 = vadd.f32 -1.0, %v7657_v9  ;;  %v2354_v25 = vld [vmem:[#allocation2 + $0x14] sm:$0xff]  ;;  %v2259_v40 = vmul.f32 1.442695, %v8617_v38  ;;  %v2341_v33 = vmax.f32 %v8586_v37, %v2327_v39 }
 0x2dc   : > { %v2367_v35 = vmax.f32 %v2339_v8, %v2353_v47  ;;  %v2381_v30 = vld [vmem:[#allocation2 + $0xd] sm:$0xff]  ;;  %v4627_v36 = vadd.f32 -1.0, %v7659_v23  ;;  %7668 = vpow2.f32 %v2261_v18  ;;  %v2382_v45 = vld [vmem:[#allocation2 + $0x15] sm:$0xff]  ;;  %vm2229_vm15 = vcmp.gt.f32.partialorder %v8617_v38, 0.0 }
 0x2dd   : > { %v2368_v41 = vmax.f32 %v2340_v24, %v2354_v25  ;;  %v8631_v46 = vsel %vm2224_vm8, %v8564_v51, %v4628_v22  ;;  %7670 = vpow2.f32 %v2259_v40 }
 0x2de   : > { %v2395_v34 = vmax.f32 %v2367_v35, %v2381_v30  ;;  %v7661_v50 = vpop.eup %7660  ;;  %v2328_v43 = vld [vmem:[#allocation2 + $0x19] sm:$0xff]  ;;  %v2329_v55 = vld [vmem:[#allocation2 + $0x21] sm:$0xff]  ;;  %2304 = vst [vmem:[#allocation2 + $0x48] sm:$0xff] %v8631_v46  ;;  %v8635_v60 = vsel %vm2223_vm9, %v8569_v56, %v4627_v36 }
 0x2df   : > { %v2355_v44 = vld [vmem:[#allocation2 + $0x1c] sm:$0xff]  ;;  %v7663_v61 = vpop.eup %7662  ;;  %v2396_v1 = vmax.f32 %v2368_v41, %v2382_v45  ;;  %v2342_v63 = vmax.f32 %v8580_v20, %v2328_v43  ;;  %2303 = vst [vmem:[#allocation2 + $0x40] sm:$0xff] %v8635_v60  ;;  %v2356_v51 = vld [vmem:[#allocation2 + $0x24] sm:$0xff]  ;;  %v4630_v6 = vadd.f32 -1.0, %v7661_v50  ;;  %v2343_v19 = vmax.f32 %v8602_v62, %v2329_v55 }
 0x2e0   : > { %2409 = vst [vmem:[#allocation2] sm:$0xff] %v2395_v34  ;;  %v2369_v0 = vmax.f32 %v2341_v33, %v2355_v44  ;;  %v2383_v5 = vld [vmem:[#allocation2 + $0x1d] sm:$0xff]  ;;  %v4629_v10 = vadd.f32 -1.0, %v7663_v61  ;;  %v2384_v29 = vld [vmem:[#allocation2 + $0x25] sm:$0xff] }
 0x2e1   : > { %2410 = vst [vmem:[#allocation2 + $0x8] sm:$0xff] %v2396_v1  ;;  %v2370_v56 = vmax.f32 %v2342_v63, %v2356_v51  ;;  %v8643_v52 = vsel %vm2226_vm10, %v8578_v13, %v4630_v6 }
 0x2e2   : > { %v2397_v37 = vmax.f32 %v2369_v0, %v2383_v5  ;;  %v7665_v42 = vpop.eup %7664  ;;  %v2330_v49 = vld [vmem:[#allocation2 + $0x29] sm:$0xff]  ;;  %v2331_v20 = vld [vmem:[#allocation2 + $0x31] sm:$0xff]  ;;  %v8646_v53 = vsel %vm2225_vm11, %v8583_v28, %v4629_v10  ;;  %2306 = vst [vmem:[#allocation2 + $0x58] sm:$0xff] %v8643_v52 }
 0x2e3   : > { %v2357_v48 = vld [vmem:[#allocation2 + $0x2c] sm:$0xff]  ;;  %v7667_v54 = vpop.eup %7666  ;;  %v2398_v11 = vmax.f32 %v2370_v56, %v2384_v29  ;;  %v2344_v12 = vmax.f32 %v8594_v58, %v2330_v49  ;;  %2305 = vst [vmem:[#allocation2 + $0x50] sm:$0xff] %v8646_v53  ;;  %v2358_v62 = vld [vmem:[#allocation2 + $0x34] sm:$0xff]  ;;  %v4632_v21 = vadd.f32 -1.0, %v7665_v42  ;;  %v2345_v28 = vmax.f32 %v8621_v15, %v2331_v20 }
 0x2e4   : > { %2411 = vst [vmem:[#allocation2 + $0x10] sm:$0xff] %v2397_v37  ;;  %v2371_v16 = vmax.f32 %v2343_v19, %v2357_v48  ;;  %v2385_v17 = vld [vmem:[#allocation2 + $0x2d] sm:$0xff]  ;;  %v4631_v13 = vadd.f32 -1.0, %v7667_v54  ;;  %v2386_v3 = vld [vmem:[#allocation2 + $0x35] sm:$0xff] }
 0x2e5   : > { %2412 = vst [vmem:[#allocation2 + $0x18] sm:$0xff] %v2398_v11  ;;  %v2372_v26 = vmax.f32 %v2344_v12, %v2358_v62  ;;  %v8655_v9 = vsel %vm2228_vm12, %v8592_v57, %v4632_v21  ;;  %v2435_v12 = vld [vmem:[#allocation8 + $0x18] sm:$0xff] }
 0x2e6   : > { %v2399_v27 = vmax.f32 %v2371_v16, %v2385_v17  ;;  %v7669_v58 = vpop.eup %7668  ;;  %v2332_v31 = vld [vmem:[#allocation2 + $0x39] sm:$0xff]  ;;  %v2333_v7 = vld [vmem:[#allocation2 + $0x41] sm:$0xff]  ;;  %v8658_v14 = vsel %vm2227_vm13, %v8598_v59, %v4631_v13  ;;  %2308 = vst [vmem:[#allocation2 + $0x68] sm:$0xff] %v8655_v9 }
 0x2e7   : > { %v2359_v8 = vld [vmem:[#allocation2 + $0x3c] sm:$0xff]  ;;  %v2400_v39 = vmax.f32 %v2372_v26, %v2386_v3  ;;  %v2346_v47 = vmax.f32 %v8614_v32, %v2332_v31  ;;  %2307 = vst [vmem:[#allocation2 + $0x60] sm:$0xff] %v8658_v14  ;;  %v7671_v18 = vpop.eup %7670  ;;  %v2360_v23 = vld [vmem:[#allocation2 + $0x44] sm:$0xff]  ;;  %v4634_v35 = vadd.f32 -1.0, %v7669_v58  ;;  %v2347_v57 = vmax.f32 %v8635_v60, %v2333_v7 }
 0x2e8   : > { %2413 = vst [vmem:[#allocation2 + $0x20] sm:$0xff] %v2399_v27  ;;  %v2373_v15 = vmax.f32 %v2345_v28, %v2359_v8  ;;  %v2387_v24 = vld [vmem:[#allocation2 + $0x3d] sm:$0xff]  ;;  %v2388_v22 = vld [vmem:[#allocation2 + $0x45] sm:$0xff]  ;;  %v4633_v30 = vadd.f32 -1.0, %v7671_v18 }
 0x2e9   : > { %2414 = vst [vmem:[#allocation2 + $0x28] sm:$0xff] %v2400_v39  ;;  %v2374_v59 = vmax.f32 %v2346_v47, %v2360_v23  ;;  %v2294_v33 = vsel %vm2230_vm14, %v8610_v4, %v4634_v35  ;;  %v8670_v1 = vld [vmem:[#allocation2] ss:$2 sm:$0xff]  ;;  %v2439_v18 = vld [vmem:[#allocation8 + $0x38] sm:$0xff] }
 0x2ea   : > { %v2401_v25 = vmax.f32 %v2373_v15, %v2387_v24  ;;  %v2334_v36 = vld [vmem:[#allocation2 + $0x49] sm:$0xff]  ;;  %v2335_v32 = vld [vmem:[#allocation2 + $0x51] sm:$0xff]  ;;  %2310 = vst [vmem:[#allocation2 + $0x78] sm:$0xff] %v2294_v33  ;;  %v2293_v55 = vsel %vm2229_vm15, %v8617_v38, %v4633_v30  ;;  %v2471_v37 = vrot.slane %v8670_v1, 1  ;;  %v2436_v7 = vld [vmem:[#allocation8 + $0x20] sm:$0xff] }
 0x2eb   : > { %v2361_v40 = vld [vmem:[#allocation2 + $0x4c] sm:$0xff]  ;;  %v2402_v41 = vmax.f32 %v2374_v59, %v2388_v22  ;;  %v2348_v45 = vmax.f32 %v8631_v46, %v2334_v36  ;;  %v2362_v50 = vld [vmem:[#allocation2 + $0x54] sm:$0xff]  ;;  %v2349_v44 = vmax.f32 %v8646_v53, %v2335_v32  ;;  %2309 = vst [vmem:[#allocation2 + $0x70] sm:$0xff] %v2293_v55  ;;  %v2440_v35 = vld [vmem:[#allocation8 + $0x40] sm:$0xff] }
 0x2ec   : > { %2415 = vst [vmem:[#allocation2 + $0x30] sm:$0xff] %v2401_v25  ;;  %v2375_v34 = vmax.f32 %v2347_v57, %v2361_v40  ;;  %v2389_v43 = vld [vmem:[#allocation2 + $0x4d] sm:$0xff]  ;;  %v2390_v4 = vld [vmem:[#allocation2 + $0x55] sm:$0xff]  ;;  %v2444_v40 = vld [vmem:[#allocation8 + $0x60] sm:$0xff] }
 0x2ed   : > { %2416 = vst [vmem:[#allocation2 + $0x38] sm:$0xff] %v2402_v41  ;;  %v2376_v60 = vmax.f32 %v2348_v45, %v2362_v50  ;;  %v2434_v53 = vld [vmem:[#allocation8 + $0x10] sm:$0xff]  ;;  %v2437_v8 = vld [vmem:[#allocation8 + $0x28] sm:$0xff]  ;;  %v2443_v36 = vld [vmem:[#allocation8 + $0x58] sm:$0xff] }
 0x2ee   : > { %v2403_v61 = vmax.f32 %v2375_v34, %v2389_v43  ;;  %v2336_v63 = vld [vmem:[#allocation2 + $0x59] sm:$0xff]  ;;  %v2337_v51 = vld [vmem:[#allocation2 + $0x61] sm:$0xff]  ;;  %v6860_v27 = vpack.c.bf16 %v2435_v12, %v2434_v53  ;;  %v6864_v47 = vpack.c.bf16 %v2437_v8, %v2436_v7  ;;  %v2438_v15 = vld [vmem:[#allocation8 + $0x30] sm:$0xff] }
 0x2ef   : > { %v2363_v0 = vld [vmem:[#allocation2 + $0x5c] sm:$0xff]  ;;  %v2404_v46 = vmax.f32 %v2376_v60, %v2390_v4  ;;  %v2350_v5 = vmax.f32 %v8643_v52, %v2336_v63  ;;  %v2364_v10 = vld [vmem:[#allocation2 + $0x64] sm:$0xff]  ;;  %v2351_v20 = vmax.f32 %v8658_v14, %v2337_v51  ;;  %v6868_v24 = vpack.c.bf16 %v2439_v18, %v2438_v15  ;;  %v2442_v30 = vld [vmem:[#allocation8 + $0x50] sm:$0xff] }
 0x2f0   : > { %2417 = vst [vmem:[#allocation2 + $0x40] sm:$0xff] %v2403_v61  ;;  %v2377_v6 = vmax.f32 %v2349_v44, %v2363_v0  ;;  %v2391_v19 = vld [vmem:[#allocation2 + $0x5d] sm:$0xff]  ;;  %v2392_v49 = vld [vmem:[#allocation2 + $0x65] sm:$0xff]  ;;  %v6876_v32 = vpack.c.bf16 %v2443_v36, %v2442_v30  ;;  %v2446_v45 = vld [vmem:[#allocation8 + $0x70] sm:$0xff]  ;;  %v2672_v51 = vrot.slane %v8670_v1, 2 }
 0x2f1   : > { %v8673_v38 = vld [vmem:[#allocation2 + $0x18] ss:$2 sm:$0xff]  ;;  %2418 = vst [vmem:[#allocation2 + $0x48] sm:$0xff] %v2404_v46  ;;  %v2378_v56 = vmax.f32 %v2350_v5, %v2364_v10  ;;  %v2441_v57 = vld [vmem:[#allocation8 + $0x48] sm:$0xff]  ;;  %v2657_v60 = vld [vmem:[#allocation8 + $0x110] sm:$0xff] }
 0x2f2   : > { %v2405_v29 = vmax.f32 %v2377_v6, %v2391_v19  ;;  %v2472_v42 = vrot.slane %v8673_v38, 1  ;;  %v2338_v54 = vld [vmem:[#allocation2 + $0x69] sm:$0xff]  ;;  %v2366_v21 = vld [vmem:[#allocation2 + $0x74] sm:$0xff]  ;;  %v6872_v22 = vpack.c.bf16 %v2441_v57, %v2440_v35  ;;  %v2655_v43 = vld [vmem:[#allocation8 + $0x100] sm:$0xff]  ;;  %v2673_v46 = vrot.slane %v8673_v38, 2 }
 0x2f3   : > { %v2406_v48 = vmax.f32 %v2378_v56, %v2392_v49  ;;  %v2365_v11 = vld [vmem:[#allocation2 + $0x6c] sm:$0xff]  ;;  %v2352_v16 = vmax.f32 %v8655_v9, %v2338_v54  ;;  %v2394_v58 = vld [vmem:[#allocation2 + $0x75] sm:$0xff]  ;;  %v2659_v63 = vld [vmem:[#allocation8 + $0x120] sm:$0xff] }
 0x2f4   : > { %2419 = vst [vmem:[#allocation2 + $0x50] sm:$0xff] %v2405_v29  ;;  %v2473_v52 = vsel %vm2470_vm0, %v2471_v37, %v2472_v42  ;;  %v2379_v62 = vmax.f32 %v2351_v20, %v2365_v11  ;;  %v8680_v17 = vld [vmem:[#allocation2 + $0x30] ss:$2 sm:$0xff]  ;;  %v2445_v33 = vld [vmem:[#allocation8 + $0x68] sm:$0xff]  ;;  %v2674_v19 = vsel %vm2671_vm1, %v2672_v51, %v2673_v46  ;;  %v2663_v29 = vld [vmem:[#allocation8 + $0x140] sm:$0xff] }
 0x2f5   : > { %5841 = vmatprep.mubr.f32.mxu1 %v2473_v52  ;;  %2420 = vst [vmem:[#allocation2 + $0x58] sm:$0xff] %v2406_v48  ;;  %v2393_v13 = vld [vmem:[#allocation2 + $0x6d] sm:$0xff]  ;;  %v2474_v28 = vrot.slane %v8680_v17, 1  ;;  %v2380_v26 = vmax.f32 %v2352_v16, %v2366_v21  ;;  %v6880_v41 = vpack.c.bf16 %v2445_v33, %v2444_v40  ;;  %v2447_v34 = vld [vmem:[#allocation8 + $0x78] sm:$0xff]  ;;  %v2667_v48 = vld [vmem:[#allocation8 + $0x160] sm:$0xff] }
 0x2f6   : > { %v2407_v3 = vmax.f32 %v2379_v62, %v2393_v13  ;;  %v6884_v50 = vpack.c.bf16 %v2447_v34, %v2446_v45  ;;  %v2656_v55 = vld [vmem:[#allocation8 + $0x108] sm:$0xff]  ;;  %v2658_v61 = vld [vmem:[#allocation8 + $0x118] sm:$0xff]  ;;  %v2661_v6 = vld [vmem:[#allocation8 + $0x130] sm:$0xff]  ;;  %v2675_v13 = vrot.slane %v8680_v17, 2 }
 0x2f7   : > { %v8684_v31 = vsel %vm2470_vm0, %v2472_v42, %v2474_v28  ;;  %v2408_v14 = vmax.f32 %v2380_v26, %v2394_v58  ;;  %v6888_v44 = vpack.c.bf16 %v2656_v55, %v2655_v43  ;;  %v6892_v4 = vpack.c.bf16 %v2658_v61, %v2657_v60  ;;  %v2660_v0 = vld [vmem:[#allocation8 + $0x128] sm:$0xff]  ;;  %v2662_v10 = vld [vmem:[#allocation8 + $0x138] sm:$0xff]  ;;  %v2665_v49 = vld [vmem:[#allocation8 + $0x150] sm:$0xff] }
 0x2f8   : > { %2421 = vst [vmem:[#allocation2 + $0x60] sm:$0xff] %v2407_v3  ;;  %5842 = vmatmul.mubr.f32.vlgmr.msra.gmra.mrb[0].mxu1 %v8684_v31  ;;  %v6896_v5 = vpack.c.bf16 %v2660_v0, %v2659_v63  ;;  %v6900_v56 = vpack.c.bf16 %v2662_v10, %v2661_v6  ;;  %v2664_v37 = vld [vmem:[#allocation8 + $0x148] sm:$0xff]  ;;  %v2666_v20 = vld [vmem:[#allocation8 + $0x158] sm:$0xff]  ;;  %v2669_v54 = vld [vmem:[#allocation8 + $0x170] sm:$0xff]  ;;  %v8714_v58 = vsel %vm2671_vm1, %v2673_v46, %v2675_v13 }
 0x2f9   : > { %6859 = vmatpush3.bf16.msra.mxu1 %v8538_v2  ;;  %2422 = vst [vmem:[#allocation2 + $0x68] sm:$0xff] %v2408_v14  ;;  %v6904_v42 = vpack.c.bf16 %v2664_v37, %v2663_v29  ;;  %v2668_v52 = vld [vmem:[#allocation8 + $0x168] sm:$0xff]  ;;  %v2670_v11 = vld [vmem:[#allocation8 + $0x178] sm:$0xff]  ;;  %v2775_v16 = vld [vmem:[#allocation8 + $0x180] sm:$0xff] }
 0x2fa   : > { %6861 = vmatprep.subr.bf16.mxu1 %v6860_v27  ;;  %v6912_v53 = vpack.c.bf16 %v2668_v52, %v2667_v48  ;;  %v6916_v12 = vpack.c.bf16 %v2670_v11, %v2669_v54  ;;  %v2776_v62 = vld [vmem:[#allocation8 + $0x188] sm:$0xff]  ;;  %v2778_v26 = vld [vmem:[#allocation8 + $0x198] sm:$0xff]  ;;  %v2779_v8 = vld [vmem:[#allocation8 + $0x1a0] sm:$0xff] }
 0x2fb   : > { %v8688_v9 = vld [vmem:[#allocation2 + $0x48] ss:$2 sm:$0xff]  ;;  %v6920_v21 = vpack.c.bf16 %v2776_v62, %v2775_v16  ;;  %v2783_v57 = vld [vmem:[#allocation8 + $0x1c0] sm:$0xff]  ;;  %v2884_v61 = vld [vmem:[#allocation8 + $0x218] sm:$0xff] }
 0x2fc   : > { %v2476_v39 = vrot.slane %v8688_v9, 1  ;;  %v2677_v3 = vrot.slane %v8688_v9, 2  ;;  %v2780_v14 = vld [vmem:[#allocation8 + $0x1a8] sm:$0xff]  ;;  %v2781_v18 = vld [vmem:[#allocation8 + $0x1b0] sm:$0xff]  ;;  %v2787_v33 = vld [vmem:[#allocation8 + $0x1e0] sm:$0xff] }
 0x2fd   : > { %6863 = vmatpush3.bf16.msra.mxu1 %v6860_v27  ;;  %v2785_v36 = vld [vmem:[#allocation8 + $0x1d0] sm:$0xff]  ;;  %v2881_v43 = vld [vmem:[#allocation8 + $0x200] sm:$0xff]  ;;  %v2882_v55 = vld [vmem:[#allocation8 + $0x208] sm:$0xff] }
 0x2fe   : > { %v8692_v23 = vsel %vm2470_vm0, %v2474_v28, %v2476_v39  ;;  %6865 = vmatprep.subr.bf16.mxu1 %v6864_v47  ;;  %v2777_v28 = vld [vmem:[#allocation8 + $0x190] sm:$0xff]  ;;  %v2885_v63 = vld [vmem:[#allocation8 + $0x220] sm:$0xff]  ;;  %v2886_v0 = vld [vmem:[#allocation8 + $0x228] sm:$0xff] }
 0x2ff   : > { %5844 = vmatprep.mubr.f32.mxu1 %v8692_v23  ;;  %v6924_v27 = vpack.c.bf16 %v2778_v26, %v2777_v28  ;;  %v2789_v34 = vld [vmem:[#allocation8 + $0x1f0] sm:$0xff]  ;;  %v6960_v46 = vpack.c.bf16 %v2886_v0, %v2885_v63  ;;  %v2889_v10 = vld [vmem:[#allocation8 + $0x240] sm:$0xff]  ;;  %v2892_v37 = vld [vmem:[#allocation8 + $0x258] sm:$0xff] }
 0x300   : > { %v8695_v2 = vld [vmem:[#allocation2 + $0x60] ss:$2 sm:$0xff]  ;;  %v2883_v60 = vld [vmem:[#allocation8 + $0x210] sm:$0xff]  ;;  %v2896_v52 = vld [vmem:[#allocation8 + $0x278] sm:$0xff] }
 0x301   : > { %6867 = vmatpush3.bf16.msra.mxu1 %v6864_v47  ;;  %v2478_v59 = vrot.slane %v8695_v2, 1  ;;  %v2679_v7 = vrot.slane %v8695_v2, 2  ;;  %v6928_v47 = vpack.c.bf16 %v2780_v14, %v2779_v8  ;;  %v2887_v51 = vld [vmem:[#allocation8 + $0x230] sm:$0xff]  ;;  %v2992_v54 = vld [vmem:[#allocation8 + $0x288] sm:$0xff]  ;;  %v2994_v16 = vld [vmem:[#allocation8 + $0x298] sm:$0xff] }
 0x302   : > { %6869 = vmatprep.subr.bf16.mxu1 %v6868_v24  ;;  %v2891_v29 = vld [vmem:[#allocation8 + $0x250] sm:$0xff]  ;;  %v2995_v28 = vld [vmem:[#allocation8 + $0x2a0] sm:$0xff]  ;;  %v2996_v26 = vld [vmem:[#allocation8 + $0x2a8] sm:$0xff] }
 0x303   : > { %v8701_v25 = vsel %vm2470_vm0, %v2476_v39, %v2478_v59  ;;  %v8719_v39 = vsel %vm2671_vm1, %v2675_v13, %v2677_v3  ;;  %v8725_v15 = vsel %vm2671_vm1, %v2677_v3, %v2679_v7  ;;  %v2895_v48 = vld [vmem:[#allocation8 + $0x270] sm:$0xff]  ;;  %v6992_v3 = vpack.c.bf16 %v2996_v26, %v2995_v28  ;;  %v2998_v14 = vld [vmem:[#allocation8 + $0x2b8] sm:$0xff]  ;;  %v3101_v63 = vld [vmem:[#allocation8 + $0x308] sm:$0xff] }
 0x304   : > { %5845 = vmatmul.mubr.f32.gmra.mrb[2].mxu1 %v8701_v25  ;;  %v2997_v8 = vld [vmem:[#allocation8 + $0x2b0] sm:$0xff]  ;;  %v3207_v28 = vld [vmem:[#allocation8 + $0x388] sm:$0xff] }
 0x305   : > { %6871 = vmatpush3.bf16.msra.mxu1 %v6868_v24  ;;  %5879 = vmatprep.mubr.f32.mxu1 %v8670_v1  ;;  %v6908_v1 = vpack.c.bf16 %v2666_v20, %v2665_v49  ;;  %v2782_v24 = vld [vmem:[#allocation8 + $0x1b8] sm:$0xff]  ;;  %v2893_v49 = vld [vmem:[#allocation8 + $0x260] sm:$0xff]  ;;  %v2894_v20 = vld [vmem:[#allocation8 + $0x268] sm:$0xff] }
 0x306   : > { %6873 = vmatprep.subr.bf16.mxu1 %v6872_v22  ;;  %v6932_v35 = vpack.c.bf16 %v2782_v24, %v2781_v18  ;;  %v3470_v18 = vld [vmem:[#allocation9 + $0x88] sm:$0xff]  ;;  %v6996_v24 = vpack.c.bf16 %v2998_v14, %v2997_v8  ;;  %v3209_v8 = vld [vmem:[#allocation8 + $0x398] sm:$0xff] }
 0x309   : > { %6875 = vmatpush3.bf16.msra.mxu1 %v6872_v22  ;;  %v2784_v22 = vld [vmem:[#allocation8 + $0x1c8] sm:$0xff] }
 0x30a   : > { %6877 = vmatprep.subr.bf16.mxu1 %v6876_v32  ;;  %v6936_v30 = vpack.c.bf16 %v2784_v22, %v2783_v57  ;;  %v3471_v22 = vld [vmem:[#allocation9 + $0x90] sm:$0xff] }
 0x30d   : > { %6879 = vmatpush3.bf16.msra.mxu1 %v6876_v32  ;;  %v2786_v32 = vld [vmem:[#allocation8 + $0x1d8] sm:$0xff] }
 0x30e   : > { %6881 = vmatprep.subr.bf16.mxu1 %v6880_v41  ;;  %v6940_v40 = vpack.c.bf16 %v2786_v32, %v2785_v36  ;;  %v2999_v36 = vld [vmem:[#allocation8 + $0x2c0] sm:$0xff] }
 0x311   : > { %6883 = vmatpush3.bf16.msra.mxu1 %v6880_v41  ;;  %v2788_v41 = vld [vmem:[#allocation8 + $0x1e8] sm:$0xff] }
 0x312   : > { %6885 = vmatprep.subr.bf16.mxu1 %v6884_v50  ;;  %v6944_v45 = vpack.c.bf16 %v2788_v41, %v2787_v33  ;;  %v3474_v33 = vld [vmem:[#allocation9 + $0xa8] sm:$0xff]  ;;  %v3001_v41 = vld [vmem:[#allocation8 + $0x2d0] sm:$0xff] }
 0x315   : > { %6887 = vmatpush3.bf16.msra.mxu1 %v6884_v50  ;;  %v2790_v50 = vld [vmem:[#allocation8 + $0x1f8] sm:$0xff] }
 0x316   : > { %6889 = vmatprep.subr.bf16.mxu1 %v6888_v44 }
 0x318   : > { %5880 = vmatmul.mubr.f32.vlgmr.msra.gmra.mrb[0].mxu1 %v8673_v38 }
 0x319   : > { %5882 = vmatprep.mubr.f32.mxu1 %v8680_v17  ;;  %6891 = vmatpush3.bf16.msra.mxu1 %v6888_v44  ;;  %v6952_v44 = vpack.c.bf16 %v2882_v55, %v2881_v43  ;;  %v3004_v43 = vld [vmem:[#allocation8 + $0x2e8] sm:$0xff] }
 0x31a   : > { %6893 = vmatprep.subr.bf16.mxu1 %v6892_v4 }
 0x31c   : > { %5883 = vmatmul.mubr.f32.gmra.mrb[2].mxu1 %v8688_v9 }
 0x31d   : > { %6895 = vmatpush3.bf16.msra.mxu1 %v6892_v4  ;;  %5917 = vmatprep.mubr.f32.mxu1 %v2674_v19  ;;  %v6956_v4 = vpack.c.bf16 %v2884_v61, %v2883_v60  ;;  %v2890_v19 = vld [vmem:[#allocation8 + $0x248] sm:$0xff]  ;;  %v3006_v60 = vld [vmem:[#allocation8 + $0x2f8] sm:$0xff] }
 0x31e   : > { %6897 = vmatprep.subr.bf16.mxu1 %v6896_v5 }
 0x321   : > { %6899 = vmatpush3.bf16.msra.mxu1 %v6896_v5  ;;  %v2888_v5 = vld [vmem:[#allocation8 + $0x238] sm:$0xff] }
 0x322   : > { %6901 = vmatprep.subr.bf16.mxu1 %v6900_v56  ;;  %v6964_v6 = vpack.c.bf16 %v2888_v5, %v2887_v51  ;;  %v3103_v51 = vld [vmem:[#allocation8 + $0x318] sm:$0xff] }
 0x325   : > { %6903 = vmatpush3.bf16.msra.mxu1 %v6900_v56  ;;  %v6968_v56 = vpack.c.bf16 %v2890_v19, %v2889_v10  ;;  %v3104_v10 = vld [vmem:[#allocation8 + $0x320] sm:$0xff]  ;;  %v3105_v19 = vld [vmem:[#allocation8 + $0x328] sm:$0xff] }
 0x326   : > { %6905 = vmatprep.subr.bf16.mxu1 %v6904_v42 }
 0x329   : > { %6907 = vmatpush3.bf16.msra.mxu1 %v6904_v42  ;;  %v6972_v42 = vpack.c.bf16 %v2892_v37, %v2891_v29  ;;  %v3106_v37 = vld [vmem:[#allocation8 + $0x330] sm:$0xff] }
 0x32a   : > { %6909 = vmatprep.subr.bf16.mxu1 %v6908_v1 }
 0x32d   : > { %6911 = vmatpush3.bf16.msra.mxu1 %v6908_v1  ;;  %v6976_v1 = vpack.c.bf16 %v2894_v20, %v2893_v49  ;;  %v3108_v20 = vld [vmem:[#allocation8 + $0x340] sm:$0xff] }
 0x32e   : > { %6913 = vmatprep.subr.bf16.mxu1 %v6912_v53 }
 0x331   : > { %6915 = vmatpush3.bf16.msra.mxu1 %v6912_v53  ;;  %v2991_v53 = vld [vmem:[#allocation8 + $0x280] sm:$0xff] }
 0x332   : > { %6917 = vmatprep.subr.bf16.mxu1 %v6916_v12  ;;  %v6984_v11 = vpack.c.bf16 %v2992_v54, %v2991_v53  ;;  %v3112_v53 = vld [vmem:[#allocation8 + $0x360] sm:$0xff]  ;;  %v3113_v54 = vld [vmem:[#allocation8 + $0x368] sm:$0xff] }
 0x335   : > { %6919 = vmatpush3.bf16.msra.mxu1 %v6916_v12  ;;  %v2993_v12 = vld [vmem:[#allocation8 + $0x290] sm:$0xff] }
 0x336   : > { %6921 = vmatprep.subr.bf16.mxu1 %v6920_v21  ;;  %v6988_v62 = vpack.c.bf16 %v2994_v16, %v2993_v12  ;;  %v3114_v12 = vld [vmem:[#allocation8 + $0x370] sm:$0xff]  ;;  %v3115_v16 = vld [vmem:[#allocation8 + $0x378] sm:$0xff] }
 0x338   : > { %5918 = vmatmul.mubr.f32.vlgmr.msra.gmra.mrb[0].mxu1 %v8714_v58 }
 0x339   : > { %5920 = vmatprep.mubr.f32.mxu1 %v8719_v39  ;;  %6923 = vmatpush3.bf16.msra.mxu1 %v6920_v21  ;;  %v7942_v21 = vmov 0.0  }
 0x33a   : > { %6925 = vmatprep.subr.bf16.mxu1 %v6924_v27  ;;  %v8734_v13 = vrot.slane %v7942_v21, 1  ;;  %6183 = vmatprep.mubr.msk.f32.mxu0 %vm7944_vm2, %v7942_v21 }
 0x33c   : > { %5921 = vmatmul.mubr.f32.gmra.mrb[2].mxu1 %v8725_v15 }
 0x33d   : > { %6927 = vmatpush3.bf16.msra.mxu1 %v6924_v27  ;;  %5955 = vmatprep.mubr.f32.mxu1 %v8673_v38  ;;  %v6948_v38 = vpack.c.bf16 %v2790_v50, %v2789_v34  ;;  %v8742_v27 = vsel %vm2470_vm0, %v2478_v59, %v8734_v13  ;;  %v3000_v59 = vld [vmem:[#allocation8 + $0x2c8] sm:$0xff] }
 0x33e   : > { %6929 = vmatprep.subr.bf16.mxu1 %v6928_v47 }
 0x341   : > { %6931 = vmatpush3.bf16.msra.mxu1 %v6928_v47  ;;  %v3469_v47 = vld [vmem:[#allocation9 + $0x80] sm:$0xff] }
 0x342   : > { %6933 = vmatprep.subr.bf16.mxu1 %v6932_v35  ;;  %v7113_v57 = vpack.c.bf16 %v3470_v18, %v3469_v47  ;;  %v3210_v47 = vld [vmem:[#allocation8 + $0x3a0] sm:$0xff]  ;;  %v3211_v18 = vld [vmem:[#allocation8 + $0x3a8] sm:$0xff] }
 0x345   : > { %6935 = vmatpush3.bf16.msra.mxu1 %v6932_v35  ;;  %v7943_v35 = vmov 0.0|0.0  }
 0x346   : > { %6937 = vmatprep.subr.bf16.mxu1 %v6936_v30  ;;  %7112 = vmatprep.subr.bf16.mxu0 %v7943_v35 }
 0x347   : > { %7114 = vmatpush3.bf16.msra.mxu0 %v7113_v57  ;;  %v3212_v57 = vld [vmem:[#allocation8 + $0x3b0] sm:$0xff] }
 0x348   : > { %7115 = vmatprep.subr.bf16.mxu0 %v7943_v35 }
 0x349   : > { %6939 = vmatpush3.bf16.msra.mxu1 %v6936_v30  ;;  %v3472_v30 = vld [vmem:[#allocation9 + $0x98] sm:$0xff] }
 0x34a   : > { %6941 = vmatprep.subr.bf16.mxu1 %v6940_v40  ;;  %v7116_v32 = vpack.c.bf16 %v3472_v30, %v3471_v22  ;;  %v3213_v22 = vld [vmem:[#allocation8 + $0x3b8] sm:$0xff] }
 0x34b   : > { %v7060_v30 = vpack.c.bf16 %v3213_v22, %v3212_v57  ;;  %v3479_v22 = vld [vmem:[#allocation9 + $0xd0] sm:$0xff] }
 0x34c   : > { %7117 = vmatpush3.bf16.msra.mxu0 %v7116_v32 }
 0x34d   : > { %6943 = vmatpush3.bf16.msra.mxu1 %v6940_v40  ;;  %v3473_v40 = vld [vmem:[#allocation9 + $0xa0] sm:$0xff]  ;;  %7118 = vmatprep.subr.bf16.mxu0 %v7943_v35 }
 0x34e   : > { %6945 = vmatprep.subr.bf16.mxu1 %v6944_v45  ;;  %v7119_v34 = vpack.c.bf16 %v3474_v33, %v3473_v40  ;;  %v3217_v40 = vld [vmem:[#allocation8 + $0x3d8] sm:$0xff]  ;;  %v3218_v33 = vld [vmem:[#allocation8 + $0x3e0] sm:$0xff] }
 0x350   : > { %7120 = vmatpush3.bf16.msra.mxu0 %v7119_v34  ;;  %v3221_v34 = vld [vmem:[#allocation8 + $0x3f8] sm:$0xff] }
 0x351   : > { %6947 = vmatpush3.bf16.msra.mxu1 %v6944_v45  ;;  %v3002_v45 = vld [vmem:[#allocation8 + $0x2d8] sm:$0xff]  ;;  %7121 = vmatprep.subr.bf16.mxu0 %v7943_v35 }
 0x352   : > { %6949 = vmatprep.subr.bf16.mxu1 %v6948_v38  ;;  %v7004_v50 = vpack.c.bf16 %v3002_v45, %v3001_v41  ;;  %v3220_v45 = vld [vmem:[#allocation8 + $0x3f0] sm:$0xff] }
 0x355   : > { %6951 = vmatpush3.bf16.msra.mxu1 %v6948_v38  ;;  %v3003_v38 = vld [vmem:[#allocation8 + $0x2e0] sm:$0xff] }
 0x356   : > { %6953 = vmatprep.subr.bf16.mxu1 %v6952_v44  ;;  %v7008_v55 = vpack.c.bf16 %v3004_v43, %v3003_v38  ;;  %v3315_v38 = vld [vmem:[#allocation8 + $0x408] sm:$0xff] }
 0x358   : > { %5956 = vmatmul.mubr.f32.vlgmr.msra.gmra.mrb[0].mxu1 %v8680_v17 }
 0x359   : > { %5958 = vmatprep.mubr.f32.mxu1 %v8688_v9  ;;  %6955 = vmatpush3.bf16.msra.mxu1 %v6952_v44  ;;  %v3005_v44 = vld [vmem:[#allocation8 + $0x2f0] sm:$0xff] }
 0x35a   : > { %6957 = vmatprep.subr.bf16.mxu1 %v6956_v4  ;;  %v7012_v61 = vpack.c.bf16 %v3006_v60, %v3005_v44  ;;  %v3317_v44 = vld [vmem:[#allocation8 + $0x418] sm:$0xff] }
 0x35c   : > { %5959 = vmatmul.mubr.f32.gmra.mrb[2].mxu1 %v8695_v2 }
 0x35d   : > { %6959 = vmatpush3.bf16.msra.mxu1 %v6956_v4  ;;  %5993 = vmatprep.mubr.f32.mxu1 %v8684_v31  ;;  %v6980_v31 = vpack.c.bf16 %v2896_v52, %v2895_v48  ;;  %v3100_v4 = vld [vmem:[#allocation8 + $0x300] sm:$0xff]  ;;  %v3110_v52 = vld [vmem:[#allocation8 + $0x350] sm:$0xff] }
 0x35e   : > { %6961 = vmatprep.subr.bf16.mxu1 %v6960_v46  ;;  %v7016_v0 = vpack.c.bf16 %v3101_v63, %v3100_v4  ;;  %v3319_v4 = vld [vmem:[#allocation8 + $0x428] sm:$0xff] }
 0x361   : > { %6963 = vmatpush3.bf16.msra.mxu1 %v6960_v46  ;;  %v3102_v46 = vld [vmem:[#allocation8 + $0x310] sm:$0xff] }
 0x362   : > { %6965 = vmatprep.subr.bf16.mxu1 %v6964_v6  ;;  %v7020_v5 = vpack.c.bf16 %v3103_v51, %v3102_v46  ;;  %v3321_v46 = vld [vmem:[#allocation8 + $0x438] sm:$0xff] }
 0x365   : > { %6967 = vmatpush3.bf16.msra.mxu1 %v6964_v6  ;;  %v8751_v6 = vrot.slane %v7942_v21, 2 }
 0x366   : > { %6969 = vmatprep.subr.bf16.mxu1 %v6968_v56 }
 0x367   : > { %v8759_v29 = vsel %vm2671_vm1, %v2679_v7, %v8751_v6 }
 0x369   : > { %6971 = vmatpush3.bf16.msra.mxu1 %v6968_v56  ;;  %v7024_v56 = vpack.c.bf16 %v3105_v19, %v3104_v10  ;;  %v3323_v10 = vld [vmem:[#allocation8 + $0x448] sm:$0xff] }
 0x36a   : > { %6973 = vmatprep.subr.bf16.mxu1 %v6972_v42 }
 0x36d   : > { %6975 = vmatpush3.bf16.msra.mxu1 %v6972_v42  ;;  %v3107_v42 = vld [vmem:[#allocation8 + $0x338] sm:$0xff] }
 0x36e   : > { %6977 = vmatprep.subr.bf16.mxu1 %v6976_v1  ;;  %v7028_v49 = vpack.c.bf16 %v3107_v42, %v3106_v37  ;;  %v3326_v37 = vld [vmem:[#allocation8 + $0x460] sm:$0xff]  ;;  %v3327_v42 = vld [vmem:[#allocation8 + $0x468] sm:$0xff] }
 0x371   : > { %6979 = vmatpush3.bf16.msra.mxu1 %v6976_v1  ;;  %v3109_v1 = vld [vmem:[#allocation8 + $0x348] sm:$0xff] }
 0x372   : > { %6981 = vmatprep.subr.bf16.mxu1 %v6980_v31  ;;  %v7032_v48 = vpack.c.bf16 %v3109_v1, %v3108_v20  ;;  %v3329_v20 = vld [vmem:[#allocation8 + $0x478] sm:$0xff]  ;;  %v3452_v1 = vld [vmem:[#allocation9] sm:$0xff] }
 0x375   : > { %6983 = vmatpush3.bf16.msra.mxu1 %v6980_v31  ;;  %v3111_v31 = vld [vmem:[#allocation8 + $0x358] sm:$0xff] }
 0x376   : > { %6985 = vmatprep.subr.bf16.mxu1 %v6984_v11  ;;  %v7036_v7 = vpack.c.bf16 %v3111_v31, %v3110_v52  ;;  %v3454_v31 = vld [vmem:[#allocation9 + $0x10] sm:$0xff] }
 0x378   : > { %5994 = vmatmul.mubr.f32.vlgmr.msra.gmra.mrb[0].mxu1 %v8692_v23 }
 0x379   : > { %5996 = vmatprep.mubr.f32.mxu1 %v8701_v25  ;;  %6987 = vmatpush3.bf16.msra.mxu1 %v6984_v11  ;;  %v7040_v11 = vpack.c.bf16 %v3113_v54, %v3112_v53  ;;  %v3456_v54 = vld [vmem:[#allocation9 + $0x20] sm:$0xff] }
 0x37a   : > { %6989 = vmatprep.subr.bf16.mxu1 %v6988_v62 }
 0x37c   : > { %5997 = vmatmul.mubr.f32.gmra.mrb[2].mxu1 %v8742_v27 }
 0x37d   : > { %6991 = vmatpush3.bf16.msra.mxu1 %v6988_v62  ;;  %6031 = vmatprep.mubr.f32.mxu1 %v8714_v58  ;;  %v7000_v58 = vpack.c.bf16 %v3000_v59, %v2999_v36  ;;  %v3206_v62 = vld [vmem:[#allocation8 + $0x380] sm:$0xff]  ;;  %v3215_v59 = vld [vmem:[#allocation8 + $0x3c8] sm:$0xff] }
 0x37e   : > { %6993 = vmatprep.subr.bf16.mxu1 %v6992_v3  ;;  %v7048_v26 = vpack.c.bf16 %v3207_v28, %v3206_v62  ;;  %v3214_v36 = vld [vmem:[#allocation8 + $0x3c0] sm:$0xff]  ;;  %v3476_v62 = vld [vmem:[#allocation9 + $0xb8] sm:$0xff] }
 0x37f   : > { %v7064_v32 = vpack.c.bf16 %v3215_v59, %v3214_v36  ;;  %v3464_v59 = vld [vmem:[#allocation9 + $0x60] sm:$0xff] }
 0x381   : > { %6995 = vmatpush3.bf16.msra.mxu1 %v6992_v3  ;;  %v3208_v3 = vld [vmem:[#allocation8 + $0x390] sm:$0xff] }
 0x382   : > { %6997 = vmatprep.subr.bf16.mxu1 %v6996_v24  ;;  %v7052_v14 = vpack.c.bf16 %v3209_v8, %v3208_v3  ;;  %v3461_v3 = vld [vmem:[#allocation9 + $0x48] sm:$0xff] }
 0x385   : > { %6999 = vmatpush3.bf16.msra.mxu1 %v6996_v24  ;;  %v7056_v24 = vpack.c.bf16 %v3211_v18, %v3210_v47  ;;  %v3462_v18 = vld [vmem:[#allocation9 + $0x50] sm:$0xff] }
 0x386   : > { %7001 = vmatprep.subr.bf16.mxu1 %v7000_v58 }
 0x389   : > { %7003 = vmatpush3.bf16.msra.mxu1 %v7000_v58  ;;  %v3219_v58 = vld [vmem:[#allocation8 + $0x3e8] sm:$0xff] }
 0x38a   : > { %7005 = vmatprep.subr.bf16.mxu1 %v7004_v50  ;;  %v7072_v41 = vpack.c.bf16 %v3219_v58, %v3218_v33  ;;  %v3466_v58 = vld [vmem:[#allocation9 + $0x70] sm:$0xff] }
 0x38d   : > { %7007 = vmatpush3.bf16.msra.mxu1 %v7004_v50  ;;  %v3314_v50 = vld [vmem:[#allocation8 + $0x400] sm:$0xff] }
 0x38e   : > { %7009 = vmatprep.subr.bf16.mxu1 %v7008_v55  ;;  %v7080_v43 = vpack.c.bf16 %v3315_v38, %v3314_v50  ;;  %v4635_v38 = vld [vmem:[%s8976_s4] ss:$0 sm:$0xff] }
 0x391   : > { %7011 = vmatpush3.bf16.msra.mxu1 %v7008_v55  ;;  %v3316_v55 = vld [vmem:[#allocation8 + $0x410] sm:$0xff] }
 0x392   : > { %7013 = vmatprep.subr.bf16.mxu1 %v7012_v61  ;;  %v7084_v60 = vpack.c.bf16 %v3317_v44, %v3316_v55 }
 0x395   : > { %7015 = vmatpush3.bf16.msra.mxu1 %v7012_v61  ;;  %v3318_v61 = vld [vmem:[#allocation8 + $0x420] sm:$0xff] }
 0x396   : > { %7017 = vmatprep.subr.bf16.mxu1 %v7016_v0  ;;  %v7088_v63 = vpack.c.bf16 %v3319_v4, %v3318_v61 }
 0x398   : > { %6032 = vmatmul.mubr.f32.vlgmr.msra.gmra.mrb[0].mxu1 %v8719_v39 }
 0x399   : > { %6034 = vmatprep.mubr.f32.mxu1 %v8725_v15  ;;  %7019 = vmatpush3.bf16.msra.mxu1 %v7016_v0  ;;  %v3320_v0 = vld [vmem:[#allocation8 + $0x430] sm:$0xff] }
 0x39a   : > { %7021 = vmatprep.subr.bf16.mxu1 %v7020_v5  ;;  %v7092_v51 = vpack.c.bf16 %v3321_v46, %v3320_v0 }
 0x39c   : > { %6035 = vmatmul.mubr.f32.gmra.mrb[2].mxu1 %v8759_v29 }
 0x39d   : > { %7023 = vmatpush3.bf16.msra.mxu1 %v7020_v5  ;;  %6069 = vmatprep.mubr.f32.mxu1 %v8680_v17  ;;  %v7044_v17 = vpack.c.bf16 %v3115_v16, %v3114_v12  ;;  %v3322_v5 = vld [vmem:[#allocation8 + $0x440] sm:$0xff]  ;;  %v3458_v16 = vld [vmem:[#allocation9 + $0x30] sm:$0xff] }
 0x39e   : > { %7025 = vmatprep.subr.bf16.mxu1 %v7024_v56  ;;  %v7096_v19 = vpack.c.bf16 %v3323_v10, %v3322_v5 }
 0x3a1   : > { %7027 = vmatpush3.bf16.msra.mxu1 %v7024_v56  ;;  %v3325_v56 = vld [vmem:[#allocation8 + $0x458] sm:$0xff] }
 0x3a2   : > { %7029 = vmatprep.subr.bf16.mxu1 %v7028_v49 }
 0x3a5   : > { %7031 = vmatpush3.bf16.msra.mxu1 %v7028_v49  ;;  %v3328_v49 = vld [vmem:[#allocation8 + $0x470] sm:$0xff] }
 0x3a6   : > { %7033 = vmatprep.subr.bf16.mxu1 %v7032_v48 }
 0x3a9   : > { %7035 = vmatpush3.bf16.msra.mxu1 %v7032_v48  ;;  %v3453_v48 = vld [vmem:[#allocation9 + $0x8] sm:$0xff] }
 0x3aa   : > { %7037 = vmatprep.subr.bf16.mxu1 %v7036_v7  ;;  %v7137_v52 = vpack.c.bf16 %v3453_v48, %v3452_v1  ;;  %v3726_v1 = vld [vmem:[#allocation9 + $0x190] sm:$0xff]  ;;  %v3727_v48 = vld [vmem:[#allocation9 + $0x198] sm:$0xff] }
 0x3ad   : > { %7039 = vmatpush3.bf16.msra.mxu1 %v7036_v7  ;;  %v3455_v7 = vld [vmem:[#allocation9 + $0x18] sm:$0xff] }
 0x3ae   : > { %7041 = vmatprep.subr.bf16.mxu1 %v7040_v11  ;;  %v7140_v53 = vpack.c.bf16 %v3455_v7, %v3454_v31 }
 0x3b1   : > { %7043 = vmatpush3.bf16.msra.mxu1 %v7040_v11  ;;  %v3457_v11 = vld [vmem:[#allocation9 + $0x28] sm:$0xff] }
 0x3b2   : > { %7045 = vmatprep.subr.bf16.mxu1 %v7044_v17  ;;  %v7143_v12 = vpack.c.bf16 %v3457_v11, %v3456_v54 }
 0x3b5   : > { %7047 = vmatpush3.bf16.msra.mxu1 %v7044_v17  ;;  %v3459_v17 = vld [vmem:[#allocation9 + $0x38] sm:$0xff] }
 0x3b6   : > { %7049 = vmatprep.subr.bf16.mxu1 %v7048_v26 }
 0x3b8   : > { %6070 = vmatmul.mubr.f32.vlgmr.msra.gmra.mrb[0].mxu1 %v8688_v9  ;;  %v3216_v9 = vld [vmem:[#allocation8 + $0x3d0] sm:$0xff] }
 0x3b9   : > { %6072 = vmatprep.mubr.f32.mxu1 %v8695_v2  ;;  %7051 = vmatpush3.bf16.msra.mxu1 %v7048_v26  ;;  %v7068_v2 = vpack.c.bf16 %v3217_v40, %v3216_v9  ;;  %v3460_v26 = vld [vmem:[#allocation9 + $0x40] sm:$0xff] }
 0x3ba   : > { %7053 = vmatprep.subr.bf16.mxu1 %v7052_v14  ;;  %v7149_v8 = vpack.c.bf16 %v3461_v3, %v3460_v26  ;;  %v3481_v40 = vld [vmem:[#allocation9 + $0xe0] sm:$0xff] }
 0x3bc   : > { %6073 = vmatmul.mubr.f32.gmra.mrb[2].mxu1 %v7942_v21 }
 0x3bd   : > { %7055 = vmatpush3.bf16.msra.mxu1 %v7052_v14  ;;  %6107 = vmatprep.mubr.f32.mxu1 %v8692_v23  ;;  %v7076_v23 = vpack.c.bf16 %v3221_v34, %v3220_v45  ;;  %v3478_v14 = vld [vmem:[#allocation9 + $0xc8] sm:$0xff]  ;;  %v3483_v34 = vld [vmem:[#allocation9 + $0xf0] sm:$0xff] }
 0x3be   : > { %7057 = vmatprep.subr.bf16.mxu1 %v7056_v24 }
 0x3c1   : > { %7059 = vmatpush3.bf16.msra.mxu1 %v7056_v24  ;;  %v3463_v24 = vld [vmem:[#allocation9 + $0x58] sm:$0xff] }
 0x3c2   : > { %7061 = vmatprep.subr.bf16.mxu1 %v7060_v30  ;;  %v7152_v57 = vpack.c.bf16 %v3463_v24, %v3462_v18 }
 0x3c5   : > { %7063 = vmatpush3.bf16.msra.mxu1 %v7060_v30  ;;  %v3480_v30 = vld [vmem:[#allocation9 + $0xd8] sm:$0xff] }
 0x3c6   : > { %7065 = vmatprep.subr.bf16.mxu1 %v7064_v32  ;;  %v7128_v36 = vpack.c.bf16 %v3480_v30, %v3479_v22 }
 0x3c9   : > { %7067 = vmatpush3.bf16.msra.mxu1 %v7064_v32  ;;  %v3465_v32 = vld [vmem:[#allocation9 + $0x68] sm:$0xff] }
 0x3ca   : > { %7069 = vmatprep.subr.bf16.mxu1 %v7068_v2  ;;  %v7155_v9 = vpack.c.bf16 %v3465_v32, %v3464_v59  ;;  %v3636_v59 = vld [vmem:[#allocation9 + $0x120] sm:$0xff]  ;;  %v3637_v32 = vld [vmem:[#allocation9 + $0x128] sm:$0xff] }
 0x3cd   : > { %7071 = vmatpush3.bf16.msra.mxu1 %v7068_v2  ;;  %v3482_v2 = vld [vmem:[#allocation9 + $0xe8] sm:$0xff] }
 0x3ce   : > { %7073 = vmatprep.subr.bf16.mxu1 %v7072_v41  ;;  %v7131_v33 = vpack.c.bf16 %v3482_v2, %v3481_v40  ;;  %v3731_v40 = vld [vmem:[#allocation9 + $0x1b8] sm:$0xff] }
 0x3d1   : > { %7075 = vmatpush3.bf16.msra.mxu1 %v7072_v41  ;;  %v3467_v41 = vld [vmem:[#allocation9 + $0x78] sm:$0xff] }
 0x3d2   : > { %7077 = vmatprep.subr.bf16.mxu1 %v7076_v23  ;;  %v7158_v45 = vpack.c.bf16 %v3467_v41, %v3466_v58 }
 0x3d5   : > { %7079 = vmatpush3.bf16.msra.mxu1 %v7076_v23  ;;  %v3484_v23 = vld [vmem:[#allocation9 + $0xf8] sm:$0xff] }
 0x3d6   : > { %7081 = vmatprep.subr.bf16.mxu1 %v7080_v43  ;;  %v7134_v50 = vpack.c.bf16 %v3484_v23, %v3483_v34  ;;  %v3638_v23 = vld [vmem:[#allocation9 + $0x130] sm:$0xff] }
 0x3d8   : > { %6108 = vmatmul.mubr.f32.vlgmr.msra.gmra.mrb[0].mxu1 %v8701_v25  ;;  %v3324_v25 = vld [vmem:[#allocation8 + $0x450] sm:$0xff] }
 0x3d9   : > { %6110 = vmatprep.mubr.f32.mxu1 %v8742_v27  ;;  %7083 = vmatpush3.bf16.msra.mxu1 %v7080_v43  ;;  %v7100_v27 = vpack.c.bf16 %v3325_v56, %v3324_v25  ;;  %v3725_v25 = vld [vmem:[#allocation9 + $0x188] sm:$0xff] }
 0x3da   : > { %7085 = vmatprep.subr.bf16.mxu1 %v7084_v60 }
 0x3dc   : > { %6111 = vmatmul.mubr.f32.gmra.mrb[2].mxu1 %v8734_v13  ;;  %v7104_v13 = vpack.c.bf16 %v3327_v42, %v3326_v37 }
 0x3dd   : > { %7087 = vmatpush3.bf16.msra.mxu1 %v7084_v60  ;;  %6145 = vmatprep.mubr.f32.mxu1 %v8719_v39  ;;  %v7108_v39 = vpack.c.bf16 %v3329_v20, %v3328_v49  ;;  %v3632_v49 = vld [vmem:[#allocation9 + $0x100] sm:$0xff]  ;;  %v3633_v20 = vld [vmem:[#allocation9 + $0x108] sm:$0xff] }
 0x3de   : > { %7089 = vmatprep.subr.bf16.mxu1 %v7088_v63 }
 0x3e1   : > { %7091 = vmatpush3.bf16.msra.mxu1 %v7088_v63 }
 0x3e2   : > { %7093 = vmatprep.subr.bf16.mxu1 %v7092_v51 }
 0x3e5   : > { %7095 = vmatpush3.bf16.msra.mxu1 %v7092_v51 }
 0x3e6   : > { %7097 = vmatprep.subr.bf16.mxu1 %v7096_v19 }
 0x3e9   : > { %7099 = vmatpush3.bf16.msra.mxu1 %v7096_v19  ;;  %v3724_v19 = vld [vmem:[#allocation9 + $0x180] sm:$0xff] }
 0x3ea   : > { %7101 = vmatprep.subr.bf16.mxu1 %v7100_v27 }
 0x3ed   : > { %7103 = vmatpush3.bf16.msra.mxu1 %v7100_v27 }
 0x3ee   : > { %7105 = vmatprep.subr.bf16.mxu1 %v7104_v13 }
 0x3f1   : > { %7107 = vmatpush3.bf16.msra.mxu1 %v7104_v13  ;;  %v7185_v13 = vpack.c.bf16 %v3725_v25, %v3724_v19  ;;  %v3737_v19 = vld [vmem:[#allocation9 + $0x1e8] sm:$0xff] }
 0x3f2   : > { %7109 = vmatprep.subr.bf16.mxu1 %v7108_v39 }
 0x3f5   : > { %7111 = vmatpush3.bf16.msra.mxu1 %v7108_v39 }
 0x3f6   : > { %7136 = vmatprep.subr.bf16.mxu1 %v7943_v35 }
 0x3f8   : > { %6146 = vmatmul.mubr.f32.vlgmr.msra.gmra.mrb[0].mxu1 %v8725_v15  ;;  %v7146_v15 = vpack.c.bf16 %v3459_v17, %v3458_v16  ;;  %v7161_v17 = vpack.c.bf16 %v3633_v20, %v3632_v49 }
 0x3f9   : > { %6148 = vmatprep.mubr.f32.mxu1 %v8759_v29  ;;  %7138 = vmatpush3.bf16.msra.mxu1 %v7137_v52  ;;  %v3475_v29 = vld [vmem:[#allocation9 + $0xb0] sm:$0xff] }
 0x3fa   : > { %7139 = vmatprep.subr.bf16.mxu1 %v7943_v35  ;;  %v7122_v28 = vpack.c.bf16 %v3476_v62, %v3475_v29  ;;  %v7188_v29 = vpack.c.bf16 %v3727_v48, %v3726_v1  ;;  %v3634_v62 = vld [vmem:[#allocation9 + $0x110] sm:$0xff]  ;;  %v3647_v48 = vld [vmem:[#allocation9 + $0x178] sm:$0xff] }
 0x3fb   : > { %v3646_v1 = vld [vmem:[#allocation9 + $0x170] sm:$0xff] }
 0x3fc   : > { %6149 = vmatmul.mubr.f32.gmra.mrb[2].mxu1 %v8751_v6  ;;  %7123 = vmatpush3.bf16.msra.mxu0 %v7122_v28  ;;  %v3477_v6 = vld [vmem:[#allocation9 + $0xc0] sm:$0xff]  ;;  %v3635_v28 = vld [vmem:[#allocation9 + $0x118] sm:$0xff] }
 0x3fd   : > { %7141 = vmatpush3.bf16.msra.mxu1 %v7140_v53  ;;  %7124 = vmatprep.subr.bf16.mxu0 %v7943_v35  ;;  %v7125_v47 = vpack.c.bf16 %v3478_v14, %v3477_v6  ;;  %v3729_v6 = vld [vmem:[#allocation9 + $0x1a8] sm:$0xff]  ;;  %v7164_v30 = vpack.c.bf16 %v3635_v28, %v3634_v62  ;;  %v3815_v62 = vld [vmem:[#allocation9 + $0x218] sm:$0xff]  ;;  %v3908_v28 = vld [vmem:[#allocation9 + $0x2a0] sm:$0xff] }
 0x3fe   : > { %7142 = vmatprep.subr.bf16.mxu1 %v7943_v35  ;;  %6218 = vmatprep.mubr.msk.f32.mxu1 %vm7944_vm2, %v7942_v21 }
 0x400   : > { %7126 = vmatpush3.bf16.msra.mxu0 %v7125_v47 }
 0x401   : > { %7144 = vmatpush3.bf16.msra.mxu1 %v7143_v12  ;;  %7127 = vmatprep.subr.bf16.mxu0 %v7943_v35 }
 0x402   : > { %7145 = vmatprep.subr.bf16.mxu1 %v7943_v35 }
 0x404   : > { %7129 = vmatpush3.bf16.msra.mxu0 %v7128_v36 }
 0x405   : > { %7147 = vmatpush3.bf16.msra.mxu1 %v7146_v15  ;;  %7130 = vmatprep.subr.bf16.mxu0 %v7943_v35 }
 0x406   : > { %7148 = vmatprep.subr.bf16.mxu1 %v7943_v35 }
 0x408   : > { %7132 = vmatpush3.bf16.msra.mxu0 %v7131_v33 }
 0x409   : > { %7150 = vmatpush3.bf16.msra.mxu1 %v7149_v8  ;;  %7133 = vmatprep.subr.bf16.mxu0 %v7943_v35  ;;  %v3728_v8 = vld [vmem:[#allocation9 + $0x1a0] sm:$0xff] }
 0x40a   : > { %7151 = vmatprep.subr.bf16.mxu1 %v7943_v35  ;;  %v7191_v36 = vpack.c.bf16 %v3729_v6, %v3728_v8  ;;  %v3816_v8 = vld [vmem:[#allocation9 + $0x220] sm:$0xff]  ;;  %v3817_v6 = vld [vmem:[#allocation9 + $0x228] sm:$0xff] }
 0x40c   : > { %7135 = vmatpush3.bf16.msra.mxu0 %v7134_v50  ;;  %v3639_v50 = vld [vmem:[#allocation9 + $0x138] sm:$0xff] }
 0x40d   : > { %7153 = vmatpush3.bf16.msra.mxu1 %v7152_v57  ;;  %7160 = vmatprep.subr.bf16.mxu0 %v7943_v35 }
 0x40e   : > { %7154 = vmatprep.subr.bf16.mxu1 %v7943_v35 }
 0x411   : > { %7156 = vmatpush3.bf16.msra.mxu1 %v7155_v9  ;;  %v3730_v9 = vld [vmem:[#allocation9 + $0x1b0] sm:$0xff] }
 0x412   : > { %7157 = vmatprep.subr.bf16.mxu1 %v7943_v35  ;;  %v7194_v34 = vpack.c.bf16 %v3731_v40, %v3730_v9  ;;  %v3820_v40 = vld [vmem:[#allocation9 + $0x240] sm:$0xff] }
 0x415   : > { %7159 = vmatpush3.bf16.msra.mxu1 %v7158_v45  ;;  %v7167_v45 = vpack.c.bf16 %v3637_v32, %v3636_v59  ;;  %v3913_v59 = vld [vmem:[#allocation9 + $0x2c8] sm:$0xff] }
 0x416   : > { %7184 = vmatprep.subr.bf16.mxu1 %v7943_v35 }
 0x4cb   : > { %v6147_v43 = vpop.f32.mrb[0].mxu1 }
 0x4cc   : > { %v3429_v55 = vadd.f32 %v6147_v43, %v4635_v38  ;;  %v3398_v44 = vpop.f32.mrb[1].mxu1  ;;  %v3733_v43 = vld [vmem:[#allocation9 + $0x1c8] sm:$0xff] }
 0x4cd   : > { %v3428_v60 = vadd.f32 %v4635_v38, %v3398_v44 }
 0x4ce   : > { %v3438_v61 = vmul.f32 1.442695, %v3429_v55  ;;  %vm3433_vm3 = vcmp.gt.f32.partialorder %v3429_v55, 0.0 }
 0x4cf   : > { %v3436_v4 = vmul.f32 1.442695, %v3428_v60  ;;  %v6150_v63 = vpop.f32.mrb[2].mxu1  ;;  %vm3432_vm4 = vcmp.gt.f32.partialorder %v3428_v60, 0.0 }
 0x4d0   : > { %7672 = vpow2.f32 %v3438_v61  ;;  %v3431_v0 = vadd.f32 %v6150_v63, %v4635_v38  ;;  %v3408_v46 = vpop.f32.mrb[3].mxu1  ;;  %v3641_v61 = vld [vmem:[#allocation9 + $0x148] sm:$0xff]  ;;  %v3735_v63 = vld [vmem:[#allocation9 + $0x1d8] sm:$0xff] }
 0x4d1   : > { %7674 = vpow2.f32 %v3436_v4  ;;  %v3430_v51 = vadd.f32 %v4635_v38, %v3408_v46  ;;  %v3732_v38 = vld [vmem:[#allocation9 + $0x1c0] sm:$0xff]  ;;  %v3734_v4 = vld [vmem:[#allocation9 + $0x1d0] sm:$0xff] }
 0x4d2   : > { %v3442_v5 = vmul.f32 1.442695, %v3431_v0  ;;  %vm3435_vm5 = vcmp.gt.f32.partialorder %v3431_v0, 0.0  ;;  %v7197_v44 = vpack.c.bf16 %v3733_v43, %v3732_v38  ;;  %v7200_v46 = vpack.c.bf16 %v3735_v63, %v3734_v4  ;;  %v3822_v43 = vld [vmem:[#allocation9 + $0x250] sm:$0xff]  ;;  %v3824_v63 = vld [vmem:[#allocation9 + $0x260] sm:$0xff] }
 0x4d3   : > { %v3440_v10 = vmul.f32 1.442695, %v3430_v51  ;;  %vm3434_vm6 = vcmp.gt.f32.partialorder %v3430_v51, 0.0 }
 0x4d4   : > { %7676 = vpow2.f32 %v3442_v5  ;;  %v3643_v5 = vld [vmem:[#allocation9 + $0x158] sm:$0xff] }
 0x4d5   : > { %7678 = vpow2.f32 %v3440_v10  ;;  %v3736_v10 = vld [vmem:[#allocation9 + $0x1e0] sm:$0xff] }
 0x4da   : > { %v7673_v56 = vpop.eup %7672 }
 0x4db   : > { %v7675_v27 = vpop.eup %7674  ;;  %v4637_v37 = vadd.f32 -1.0, %v7673_v56  ;;  %v7203_v56 = vpack.c.bf16 %v3737_v19, %v3736_v10  ;;  %v3826_v19 = vld [vmem:[#allocation9 + $0x270] sm:$0xff] }
 0x4dc   : > { %v4636_v42 = vadd.f32 -1.0, %v7675_v27  ;;  %v3644_v27 = vld [vmem:[#allocation9 + $0x160] sm:$0xff] }
 0x4dd   : > { %v8795_v39 = vsel %vm3433_vm3, %v3429_v55, %v4637_v37  ;;  %v7170_v55 = vpack.c.bf16 %v3639_v50, %v3638_v23  ;;  %v3645_v37 = vld [vmem:[#allocation9 + $0x168] sm:$0xff]  ;;  %v3915_v23 = vld [vmem:[#allocation9 + $0x2d8] sm:$0xff] }
 0x4de   : > { %v7677_v52 = vpop.eup %7676  ;;  %v3488_v31 = vrot.slane %v8795_v39, 1  ;;  %v3649_v7 = vrot.slane %v8795_v39, 2  ;;  %v3448_v53 = vsel %vm3432_vm4, %v3428_v60, %v4636_v42  ;;  %v3640_v60 = vld [vmem:[#allocation9 + $0x140] sm:$0xff]  ;;  %v3738_v42 = vld [vmem:[#allocation9 + $0x1f0] sm:$0xff]  ;;  %v7179_v49 = vpack.c.bf16 %v3645_v37, %v3644_v27  ;;  %v4084_v27 = vld [vmem:[#allocation9 + $0x388] sm:$0xff] }
 0x4df   : > { %v7679_v54 = vpop.eup %7678  ;;  %v3487_v11 = vrot.slane %v3448_v53, 1  ;;  %v3648_v12 = vrot.slane %v3448_v53, 2  ;;  %v4639_v16 = vadd.f32 -1.0, %v7677_v52  ;;  %6219 = vmatmul.mubr.f32.vlgmr.msra.gmra.mrb[4].mxu1 %v3448_v53  ;;  %v3904_v52 = vld [vmem:[#allocation9 + $0x280] sm:$0xff] }
 0x4e0   : > { %v4638_v15 = vadd.f32 -1.0, %v7679_v54  ;;  %7186 = vmatpush3.bf16.msra.mxu1 %v7185_v13  ;;  %6288 = vmatprep.mubr.msk.f32.mxu1 %vm7944_vm2, %v7942_v21  ;;  %v3739_v13 = vld [vmem:[#allocation9 + $0x1f8] sm:$0xff]  ;;  %v3812_v54 = vld [vmem:[#allocation9 + $0x200] sm:$0xff] }
 0x4e1   : > { %v3451_v26 = vsel %vm3435_vm5, %v3431_v0, %v4639_v16  ;;  %v3489_v3 = vsel %vm2470_vm0, %v3487_v11, %v3488_v31  ;;  %7187 = vmatprep.subr.bf16.mxu1 %v7943_v35  ;;  %v8804_v14 = vsel %vm2671_vm1, %v3648_v12, %v3649_v7  ;;  %v7173_v0 = vpack.c.bf16 %v3641_v61, %v3640_v60  ;;  %v3813_v11 = vld [vmem:[#allocation9 + $0x208] sm:$0xff]  ;;  %v3906_v12 = vld [vmem:[#allocation9 + $0x290] sm:$0xff]  ;;  %v3907_v16 = vld [vmem:[#allocation9 + $0x298] sm:$0xff] }
 0x4e2   : > { %v4100_v47 = vrot.slane %v3451_v26, 1  ;;  %v4191_v18 = vrot.slane %v3451_v26, 2  ;;  %v8806_v24 = vsel %vm3434_vm6, %v3430_v51, %v4638_v15  ;;  %6184 = vmatmul.mubr.f32.vlgmr.msra.gmra.mrb[16].mxu0 %v3489_v3  ;;  %v3642_v51 = vld [vmem:[#allocation9 + $0x150] sm:$0xff]  ;;  %v7206_v20 = vpack.c.bf16 %v3739_v13, %v3738_v42  ;;  %v3909_v26 = vld [vmem:[#allocation9 + $0x2a8] sm:$0xff]  ;;  %v3995_v13 = vld [vmem:[#allocation9 + $0x300] sm:$0xff] }
 0x4e3   : > { %v3829_v57 = vrot.slane %v8806_v24, 1  ;;  %v3920_v22 = vrot.slane %v8806_v24, 2  ;;  %7162 = vmatpush3.bf16.msra.mxu0 %v7161_v17  ;;  %6253 = vmatprep.mubr.msk.f32.mxu0 %vm7944_vm2, %v7942_v21  ;;  %v7176_v25 = vpack.c.bf16 %v3643_v5, %v3642_v51  ;;  %v7209_v17 = vpack.c.bf16 %v3813_v11, %v3812_v54  ;;  %v3917_v60 = vld [vmem:[#allocation9 + $0x2e8] sm:$0xff]  ;;  %v3919_v51 = vld [vmem:[#allocation9 + $0x2f8] sm:$0xff] }
 0x4e4   : > { %7189 = vmatpush3.bf16.msra.mxu1 %v7188_v29  ;;  %7163 = vmatprep.subr.bf16.mxu0 %v7943_v35  ;;  %v7236_v15 = vpack.c.bf16 %v3907_v16, %v3906_v12  ;;  %v3814_v29 = vld [vmem:[#allocation9 + $0x210] sm:$0xff]  ;;  %v4088_v54 = vld [vmem:[#allocation9 + $0x3a8] sm:$0xff]  ;;  %v3999_v12 = vld [vmem:[#allocation9 + $0x320] sm:$0xff] }
 0x4e5   : > { %7190 = vmatprep.subr.bf16.mxu1 %v7943_v35  ;;  %v8815_v2 = vsel %vm2671_vm1, %v3649_v7, %v3920_v22  ;;  %v8818_v33 = vsel %vm2470_vm0, %v3488_v31, %v3829_v57  ;;  %v8821_v58 = vsel %vm2470_vm0, %v3829_v57, %v4100_v47  ;;  %v8824_v41 = vsel %vm2671_vm1, %v3920_v22, %v4191_v18  ;;  %v3905_v31 = vld [vmem:[#allocation9 + $0x288] sm:$0xff]  ;;  %v3910_v47 = vld [vmem:[#allocation9 + $0x2b0] sm:$0xff]  ;;  %v3911_v18 = vld [vmem:[#allocation9 + $0x2b8] sm:$0xff] }
 0x4e6   : > { %v7182_v7 = vpack.c.bf16 %v3647_v48, %v3646_v1  ;;  %v7233_v53 = vpack.c.bf16 %v3905_v31, %v3904_v52  ;;  %v7212_v3 = vpack.c.bf16 %v3815_v62, %v3814_v29  ;;  %v7215_v57 = vpack.c.bf16 %v3817_v6, %v3816_v8  ;;  %v3818_v22 = vld [vmem:[#allocation9 + $0x230] sm:$0xff]  ;;  %v4086_v1 = vld [vmem:[#allocation9 + $0x398] sm:$0xff]  ;;  %v4000_v16 = vld [vmem:[#allocation9 + $0x328] sm:$0xff] }
 0x4e7   : > { %7165 = vmatpush3.bf16.msra.mxu0 %v7164_v30  ;;  %v3819_v30 = vld [vmem:[#allocation9 + $0x238] sm:$0xff]  ;;  %v3997_v31 = vld [vmem:[#allocation9 + $0x310] sm:$0xff]  ;;  %v7263_v29 = vpack.c.bf16 %v4000_v16, %v3999_v12  ;;  %v4003_v6 = vld [vmem:[#allocation9 + $0x340] sm:$0xff] }
 0x4e8   : > { %7192 = vmatpush3.bf16.msra.mxu1 %v7191_v36  ;;  %7166 = vmatprep.subr.bf16.mxu0 %v7943_v35  ;;  %v3912_v36 = vld [vmem:[#allocation9 + $0x2c0] sm:$0xff]  ;;  %v7218_v32 = vpack.c.bf16 %v3819_v30, %v3818_v22  ;;  %v4001_v62 = vld [vmem:[#allocation9 + $0x330] sm:$0xff]  ;;  %v4281_v12 = vld [vmem:[#allocation11 + $0x18] sm:$0xff] }
 0x4e9   : > { %7193 = vmatprep.subr.bf16.mxu1 %v7943_v35  ;;  %v7245_v9 = vpack.c.bf16 %v3913_v59, %v3912_v36  ;;  %v4005_v30 = vld [vmem:[#allocation9 + $0x350] sm:$0xff]  ;;  %v4006_v36 = vld [vmem:[#allocation9 + $0x358] sm:$0xff]  ;;  %v4095_v59 = vld [vmem:[#allocation9 + $0x3e0] sm:$0xff] }
 0x4eb   : > { %7168 = vmatpush3.bf16.msra.mxu0 %v7167_v45  ;;  %v3821_v45 = vld [vmem:[#allocation9 + $0x248] sm:$0xff] }
 0x4ec   : > { %7195 = vmatpush3.bf16.msra.mxu1 %v7194_v34  ;;  %7169 = vmatprep.subr.bf16.mxu0 %v7943_v35  ;;  %v3914_v34 = vld [vmem:[#allocation9 + $0x2d0] sm:$0xff]  ;;  %v7221_v50 = vpack.c.bf16 %v3821_v45, %v3820_v40  ;;  %v4007_v45 = vld [vmem:[#allocation9 + $0x360] sm:$0xff] }
 0x4ed   : > { %7196 = vmatprep.subr.bf16.mxu1 %v7943_v35  ;;  %v7248_v38 = vpack.c.bf16 %v3915_v23, %v3914_v34  ;;  %v4008_v34 = vld [vmem:[#allocation9 + $0x368] sm:$0xff]  ;;  %v4097_v23 = vld [vmem:[#allocation9 + $0x3f0] sm:$0xff] }
 0x4ef   : > { %7171 = vmatpush3.bf16.msra.mxu0 %v7170_v55  ;;  %v3823_v55 = vld [vmem:[#allocation9 + $0x258] sm:$0xff] }
 0x4f0   : > { %7198 = vmatpush3.bf16.msra.mxu1 %v7197_v44  ;;  %7172 = vmatprep.subr.bf16.mxu0 %v7943_v35  ;;  %v3916_v44 = vld [vmem:[#allocation9 + $0x2e0] sm:$0xff]  ;;  %v7224_v61 = vpack.c.bf16 %v3823_v55, %v3822_v43  ;;  %v4009_v55 = vld [vmem:[#allocation9 + $0x370] sm:$0xff] }
 0x4f1   : > { %7199 = vmatprep.subr.bf16.mxu1 %v7943_v35  ;;  %v7251_v4 = vpack.c.bf16 %v3917_v60, %v3916_v44  ;;  %v4010_v44 = vld [vmem:[#allocation9 + $0x378] sm:$0xff] }
 0x4f2   : > { %v7278_v60 = vpack.c.bf16 %v4010_v44, %v4009_v55  ;;  %v4381_v55 = vld [vmem:[#allocation12 + $0x28] sm:$0xff] }
 0x4f3   : > { %7174 = vmatpush3.bf16.msra.mxu0 %v7173_v0  ;;  %v3825_v0 = vld [vmem:[#allocation9 + $0x268] sm:$0xff] }
 0x4f4   : > { %7201 = vmatpush3.bf16.msra.mxu1 %v7200_v46  ;;  %7175 = vmatprep.subr.bf16.mxu0 %v7943_v35  ;;  %v3918_v46 = vld [vmem:[#allocation9 + $0x2f0] sm:$0xff]  ;;  %v7227_v5 = vpack.c.bf16 %v3825_v0, %v3824_v63 }
 0x4f5   : > { %7202 = vmatprep.subr.bf16.mxu1 %v7943_v35  ;;  %v7254_v10 = vpack.c.bf16 %v3919_v51, %v3918_v46  ;;  %v4177_v0 = vld [vmem:[#allocation9 + $0x410] sm:$0xff]  ;;  %v4178_v46 = vld [vmem:[#allocation9 + $0x418] sm:$0xff] }
 0x4f6   : > { %v7308_v51 = vpack.c.bf16 %v4178_v46, %v4177_v0 }
 0x4f7   : > { %7177 = vmatpush3.bf16.msra.mxu0 %v7176_v25  ;;  %v3827_v25 = vld [vmem:[#allocation9 + $0x278] sm:$0xff] }
 0x4f8   : > { %7204 = vmatpush3.bf16.msra.mxu1 %v7203_v56  ;;  %7178 = vmatprep.subr.bf16.mxu0 %v7943_v35  ;;  %v4083_v56 = vld [vmem:[#allocation9 + $0x380] sm:$0xff]  ;;  %v7230_v37 = vpack.c.bf16 %v3827_v25, %v3826_v19  ;;  %v4181_v19 = vld [vmem:[#allocation9 + $0x430] sm:$0xff]  ;;  %v4182_v25 = vld [vmem:[#allocation9 + $0x438] sm:$0xff] }
 0x4f9   : > { %7205 = vmatprep.subr.bf16.mxu1 %v7943_v35  ;;  %v7281_v42 = vpack.c.bf16 %v4084_v27, %v4083_v56  ;;  %v7314_v56 = vpack.c.bf16 %v4182_v25, %v4181_v19  ;;  %v4184_v27 = vld [vmem:[#allocation9 + $0x448] sm:$0xff] }
 0x4fb   : > { %7180 = vmatpush3.bf16.msra.mxu0 %v7179_v49  ;;  %v3996_v49 = vld [vmem:[#allocation9 + $0x308] sm:$0xff] }
 0x4fc   : > { %7207 = vmatpush3.bf16.msra.mxu1 %v7206_v20  ;;  %7181 = vmatprep.subr.bf16.mxu0 %v7943_v35  ;;  %v4085_v20 = vld [vmem:[#allocation9 + $0x390] sm:$0xff]  ;;  %v7257_v48 = vpack.c.bf16 %v3996_v49, %v3995_v13  ;;  %v4186_v13 = vld [vmem:[#allocation9 + $0x458] sm:$0xff] }
 0x4fd   : > { %7232 = vmatprep.subr.bf16.mxu1 %v7943_v35  ;;  %v7284_v52 = vpack.c.bf16 %v4086_v1, %v4085_v20  ;;  %v4187_v20 = vld [vmem:[#allocation9 + $0x460] sm:$0xff]  ;;  %v4188_v1 = vld [vmem:[#allocation9 + $0x468] sm:$0xff] }
 0x4ff   : > { %7183 = vmatpush3.bf16.msra.mxu0 %v7182_v7  ;;  %6289 = vmatmul.mubr.f32.vlgmr.msra.gmra.mrb[6].mxu1 %v8795_v39  ;;  %v7239_v39 = vpack.c.bf16 %v3909_v26, %v3908_v28  ;;  %v3998_v7 = vld [vmem:[#allocation9 + $0x318] sm:$0xff]  ;;  %v4091_v26 = vld [vmem:[#allocation9 + $0x3c0] sm:$0xff] }
 0x500   : > { %7234 = vmatpush3.bf16.msra.mxu1 %v7233_v53  ;;  %7208 = vmatprep.subr.bf16.mxu0 %v7943_v35  ;;  %v4087_v53 = vld [vmem:[#allocation9 + $0x3a0] sm:$0xff]  ;;  %v7260_v11 = vpack.c.bf16 %v3998_v7, %v3997_v31  ;;  %v4002_v28 = vld [vmem:[#allocation9 + $0x338] sm:$0xff] }
 0x501   : > { %7235 = vmatprep.subr.bf16.mxu1 %v7943_v35  ;;  %6358 = vmatprep.mubr.msk.f32.mxu1 %vm7944_vm2, %v7942_v21  ;;  %v4190_v31 = vld [vmem:[#allocation9 + $0x478] sm:$0xff] }
 0x502   : > { %6254 = vmatmul.mubr.f32.vlgmr.msra.gmra.mrb[18].mxu0 %v8804_v14  ;;  %v7242_v14 = vpack.c.bf16 %v3911_v18, %v3910_v47  ;;  %v4004_v47 = vld [vmem:[#allocation9 + $0x348] sm:$0xff]  ;;  %v4093_v18 = vld [vmem:[#allocation9 + $0x3d0] sm:$0xff] }
 0x503   : > { %7210 = vmatpush3.bf16.msra.mxu0 %v7209_v17  ;;  %6323 = vmatprep.mubr.msk.f32.mxu0 %vm7944_vm2, %v7942_v21  ;;  %v4089_v17 = vld [vmem:[#allocation9 + $0x3b0] sm:$0xff] }
 0x504   : > { %7237 = vmatpush3.bf16.msra.mxu1 %v7236_v15  ;;  %7211 = vmatprep.subr.bf16.mxu0 %v7943_v35  ;;  %v4090_v15 = vld [vmem:[#allocation9 + $0x3b8] sm:$0xff] }
 0x505   : > { %7238 = vmatprep.subr.bf16.mxu1 %v7943_v35 }
 0x507   : > { %7213 = vmatpush3.bf16.msra.mxu0 %v7212_v3  ;;  %v4092_v3 = vld [vmem:[#allocation9 + $0x3c8] sm:$0xff] }
 0x508   : > { %7240 = vmatpush3.bf16.msra.mxu1 %v7239_v39  ;;  %7214 = vmatprep.subr.bf16.mxu0 %v7943_v35  ;;  %v7266_v39 = vpack.c.bf16 %v4002_v28, %v4001_v62  ;;  %v7293_v8 = vpack.c.bf16 %v4092_v3, %v4091_v26  ;;  %v4285_v62 = vld [vmem:[#allocation11 + $0x38] sm:$0xff] }
 0x509   : > { %7241 = vmatprep.subr.bf16.mxu1 %v7943_v35 }
 0x50b   : > { %7216 = vmatpush3.bf16.msra.mxu0 %v7215_v57  ;;  %v4094_v57 = vld [vmem:[#allocation9 + $0x3d8] sm:$0xff] }
 0x50c   : > { %7243 = vmatpush3.bf16.msra.mxu1 %v7242_v14  ;;  %7217 = vmatprep.subr.bf16.mxu0 %v7943_v35  ;;  %v7269_v14 = vpack.c.bf16 %v4004_v47, %v4003_v6  ;;  %v7296_v22 = vpack.c.bf16 %v4094_v57, %v4093_v18  ;;  %v4287_v6 = vld [vmem:[#allocation11 + $0x48] sm:$0xff]  ;;  %v4288_v18 = vld [vmem:[#allocation11 + $0x50] sm:$0xff]  ;;  %v4289_v57 = vld [vmem:[#allocation11 + $0x58] sm:$0xff] }
 0x50d   : > { %7244 = vmatprep.subr.bf16.mxu1 %v7943_v35 }
 0x50f   : > { %7219 = vmatpush3.bf16.msra.mxu0 %v7218_v32  ;;  %v4096_v32 = vld [vmem:[#allocation9 + $0x3e8] sm:$0xff] }
 0x510   : > { %7246 = vmatpush3.bf16.msra.mxu1 %v7245_v9  ;;  %7220 = vmatprep.subr.bf16.mxu0 %v7943_v35  ;;  %v7272_v9 = vpack.c.bf16 %v4006_v36, %v4005_v30  ;;  %v7299_v40 = vpack.c.bf16 %v4096_v32, %v4095_v59  ;;  %v4291_v30 = vld [vmem:[#allocation11 + $0x68] sm:$0xff]  ;;  %v4292_v59 = vld [vmem:[#allocation11 + $0x70] sm:$0xff]  ;;  %v4293_v32 = vld [vmem:[#allocation11 + $0x78] sm:$0xff] }
 0x511   : > { %7247 = vmatprep.subr.bf16.mxu1 %v7943_v35 }
 0x513   : > { %7222 = vmatpush3.bf16.msra.mxu0 %v7221_v50  ;;  %v4098_v50 = vld [vmem:[#allocation9 + $0x3f8] sm:$0xff] }
 0x514   : > { %7249 = vmatpush3.bf16.msra.mxu1 %v7248_v38  ;;  %7223 = vmatprep.subr.bf16.mxu0 %v7943_v35  ;;  %v7275_v38 = vpack.c.bf16 %v4008_v34, %v4007_v45  ;;  %v7302_v43 = vpack.c.bf16 %v4098_v50, %v4097_v23  ;;  %v4377_v45 = vld [vmem:[#allocation12 + $0x8] sm:$0xff]  ;;  %v4378_v34 = vld [vmem:[#allocation12 + $0x10] sm:$0xff]  ;;  %v4379_v50 = vld [vmem:[#allocation12 + $0x18] sm:$0xff] }
 0x515   : > { %7250 = vmatprep.subr.bf16.mxu1 %v7943_v35 }
 0x517   : > { %7225 = vmatpush3.bf16.msra.mxu0 %v7224_v61  ;;  %v4175_v61 = vld [vmem:[#allocation9 + $0x400] sm:$0xff] }
 0x518   : > { %7252 = vmatpush3.bf16.msra.mxu1 %v7251_v4  ;;  %7226 = vmatprep.subr.bf16.mxu0 %v7943_v35  ;;  %v4176_v4 = vld [vmem:[#allocation9 + $0x408] sm:$0xff] }
 0x519   : > { %7253 = vmatprep.subr.bf16.mxu1 %v7943_v35  ;;  %v7305_v63 = vpack.c.bf16 %v4176_v4, %v4175_v61 }
 0x51b   : > { %7228 = vmatpush3.bf16.msra.mxu0 %v7227_v5  ;;  %v4179_v5 = vld [vmem:[#allocation9 + $0x420] sm:$0xff] }
 0x51c   : > { %7255 = vmatpush3.bf16.msra.mxu1 %v7254_v10  ;;  %7229 = vmatprep.subr.bf16.mxu0 %v7943_v35  ;;  %v4180_v10 = vld [vmem:[#allocation9 + $0x428] sm:$0xff] }
 0x51d   : > { %7280 = vmatprep.subr.bf16.mxu1 %v7943_v35 }
 0x51f   : > { %7231 = vmatpush3.bf16.msra.mxu0 %v7230_v37  ;;  %6359 = vmatmul.mubr.f32.vlgmr.msra.gmra.mrb[8].mxu1 %v8815_v2  ;;  %v7287_v2 = vpack.c.bf16 %v4088_v54, %v4087_v53  ;;  %v4278_v53 = vld [vmem:[#allocation11] sm:$0xff]  ;;  %v4279_v54 = vld [vmem:[#allocation11 + $0x8] sm:$0xff] }
 0x520   : > { %7282 = vmatpush3.bf16.msra.mxu1 %v7281_v42  ;;  %7256 = vmatprep.subr.bf16.mxu0 %v7943_v35  ;;  %v4185_v42 = vld [vmem:[#allocation9 + $0x450] sm:$0xff] }
 0x521   : > { %7283 = vmatprep.subr.bf16.mxu1 %v7943_v35  ;;  %6428 = vmatprep.mubr.msk.f32.mxu1 %vm7944_vm2, %v7942_v21  ;;  %v7320_v49 = vpack.c.bf16 %v4186_v13, %v4185_v42 }
 0x522   : > { %6324 = vmatmul.mubr.f32.vlgmr.msra.gmra.mrb[20].mxu0 %v8818_v33  ;;  %v7290_v33 = vpack.c.bf16 %v4090_v15, %v4089_v17  ;;  %v4282_v17 = vld [vmem:[#allocation11 + $0x20] sm:$0xff]  ;;  %v4283_v15 = vld [vmem:[#allocation11 + $0x28] sm:$0xff] }
 0x523   : > { %7258 = vmatpush3.bf16.msra.mxu0 %v7257_v48  ;;  %6393 = vmatprep.mubr.msk.f32.mxu0 %vm7944_vm2, %v7942_v21  ;;  %v7323_v48 = vpack.c.bf16 %v4188_v1, %v4187_v20  ;;  %v4640_v20 = vld [vmem:[%s8978_s6] ss:$0 sm:$0xff] }
 0x524   : > { %7285 = vmatpush3.bf16.msra.mxu1 %v7284_v52  ;;  %7259 = vmatprep.subr.bf16.mxu0 %v7943_v35  ;;  %v4189_v52 = vld [vmem:[#allocation9 + $0x470] sm:$0xff] }
 0x525   : > { %7286 = vmatprep.subr.bf16.mxu1 %v7943_v35  ;;  %v7326_v7 = vpack.c.bf16 %v4190_v31, %v4189_v52 }
 0x527   : > { %7261 = vmatpush3.bf16.msra.mxu0 %v7260_v11  ;;  %v4280_v11 = vld [vmem:[#allocation11 + $0x10] sm:$0xff] }
 0x528   : > { %7288 = vmatpush3.bf16.msra.mxu1 %v7287_v2  ;;  %7262 = vmatprep.subr.bf16.mxu0 %v7943_v35  ;;  %v7329_v2 = vpack.c.bf16 %v4279_v54, %v4278_v53  ;;  %v7332_v16 = vpack.c.bf16 %v4281_v12, %v4280_v11  ;;  %v4382_v11 = vld [vmem:[#allocation12 + $0x30] sm:$0xff] }
 0x529   : > { %7289 = vmatprep.subr.bf16.mxu1 %v7943_v35 }
 0x52b   : > { %7264 = vmatpush3.bf16.msra.mxu0 %v7263_v29  ;;  %v7335_v29 = vpack.c.bf16 %v4283_v15, %v4282_v17  ;;  %v4385_v17 = vld [vmem:[#allocation12 + $0x48] sm:$0xff] }
 0x52c   : > { %7291 = vmatpush3.bf16.msra.mxu1 %v7290_v33  ;;  %7265 = vmatprep.subr.bf16.mxu0 %v7943_v35  ;;  %v4284_v33 = vld [vmem:[#allocation11 + $0x30] sm:$0xff] }
 0x52d   : > { %7292 = vmatprep.subr.bf16.mxu1 %v7943_v35  ;;  %v7338_v26 = vpack.c.bf16 %v4285_v62, %v4284_v33  ;;  %v4389_v62 = vld [vmem:[#allocation12 + $0x68] sm:$0xff] }
 0x52f   : > { %7267 = vmatpush3.bf16.msra.mxu0 %v7266_v39 }
 0x530   : > { %7294 = vmatpush3.bf16.msra.mxu1 %v7293_v8  ;;  %7268 = vmatprep.subr.bf16.mxu0 %v7943_v35  ;;  %v4286_v8 = vld [vmem:[#allocation11 + $0x40] sm:$0xff] }
 0x531   : > { %7295 = vmatprep.subr.bf16.mxu1 %v7943_v35  ;;  %v7341_v47 = vpack.c.bf16 %v4287_v6, %v4286_v8  ;;  %v4642_v8 = vld [vmem:[%s9014_s3] ss:$0 sm:$0xff]  ;;  %s7858_s3 = sshll.u32 %s7945_s23, 4  ;;  %s7859_s3 = int_to_ptr.vmem [resolvable:$false] %s7858_s3 }
 0x532   : > { %s7860_s30 = scalar_lea.vmem %s7859_s3, 256  ;;  %p7861_p13 = scmp.lt.s32.totalorder %s8930_s13, %s7859_s3 }
 0x533   : > { %7270 = vmatpush3.bf16.msra.mxu0 %v7269_v14  ;;  %v4290_v14 = vld [vmem:[#allocation11 + $0x60] sm:$0xff]  ;;  %p7862_p0 = scmp.lt.s32.totalorder %s7860_s30, %s7854_s27 }
 0x534   : > { %7297 = vmatpush3.bf16.msra.mxu1 %v7296_v22  ;;  %7271 = vmatprep.subr.bf16.mxu0 %v7943_v35  ;;  %v7344_v22 = vpack.c.bf16 %v4289_v57, %v4288_v18  ;;  %v7347_v36 = vpack.c.bf16 %v4291_v30, %v4290_v14 }
 0x535   : > { %7298 = vmatprep.subr.bf16.mxu1 %v7943_v35  ;;  %p7863_p2 = por %p7862_p0, %p7861_p13 }
 0x537   : > { %7273 = vmatpush3.bf16.msra.mxu0 %v7272_v9  ;;  %v7350_v9 = vpack.c.bf16 %v4293_v32, %v4292_v59  ;;  %p7864_p8 = pnand %p7863_p2, %p7857_p1 }
 0x538   : > { %7300 = vmatpush3.bf16.msra.mxu1 %v7299_v40  ;;  %7274 = vmatprep.subr.bf16.mxu0 %v7943_v35  ;;  %v4376_v40 = vld [vmem:[#allocation12] sm:$0xff] }
 0x539   : > { %7301 = vmatprep.subr.bf16.mxu1 %v7943_v35  ;;  %v7353_v23 = vpack.c.bf16 %v4377_v45, %v4376_v40 }
 0x53b   : > { %7276 = vmatpush3.bf16.msra.mxu0 %v7275_v38  ;;  %v7356_v38 = vpack.c.bf16 %v4379_v50, %v4378_v34 }
 0x53c   : > { %7303 = vmatpush3.bf16.msra.mxu1 %v7302_v43  ;;  %7277 = vmatprep.subr.bf16.mxu0 %v7943_v35  ;;  %v4380_v43 = vld [vmem:[#allocation12 + $0x20] sm:$0xff] }
 0x53d   : > { %7328 = vmatprep.subr.bf16.mxu1 %v7943_v35  ;;  %v7359_v44 = vpack.c.bf16 %v4381_v55, %v4380_v43 }
 0x53f   : > { %7279 = vmatpush3.bf16.msra.mxu0 %v7278_v60  ;;  %6429 = vmatmul.mubr.f32.vlgmr.msra.gmra.mrb[10].mxu1 %v8821_v58  ;;  %v7311_v58 = vpack.c.bf16 %v4180_v10, %v4179_v5 }
 0x540   : > { %7304 = vmatprep.subr.bf16.mxu0 %v7943_v35  ;;  %6498 = vmatprep.mubr.msk.f32.mxu1 %vm7944_vm2, %v7942_v21 }
 0x541   : > { %7330 = vmatpush3.bf16.msra.mxu1 %v7329_v2  ;;  %v4383_v2 = vld [vmem:[#allocation12 + $0x38] sm:$0xff] }
 0x542   : > { %6394 = vmatmul.mubr.f32.vlgmr.msra.gmra.mrb[22].mxu0 %v8806_v24  ;;  %v4183_v24 = vld [vmem:[#allocation9 + $0x440] sm:$0xff]  ;;  %7331 = vmatprep.subr.bf16.mxu1 %v7943_v35  ;;  %v7362_v12 = vpack.c.bf16 %v4383_v2, %v4382_v11 }
 0x543   : > { %7306 = vmatpush3.bf16.msra.mxu0 %v7305_v63  ;;  %6463 = vmatprep.mubr.msk.f32.mxu0 %vm7944_vm2, %v7942_v21  ;;  %v7317_v37 = vpack.c.bf16 %v4184_v27, %v4183_v24 }
 0x544   : > { %7307 = vmatprep.subr.bf16.mxu0 %v7943_v35 }
 0x545   : > { %7333 = vmatpush3.bf16.msra.mxu1 %v7332_v16  ;;  %v4384_v16 = vld [vmem:[#allocation12 + $0x40] sm:$0xff] }
 0x546   : > { %7334 = vmatprep.subr.bf16.mxu1 %v7943_v35  ;;  %v7365_v15 = vpack.c.bf16 %v4385_v17, %v4384_v16 }
 0x547   : > { %7309 = vmatpush3.bf16.msra.mxu0 %v7308_v51 }
 0x548   : > { %7310 = vmatprep.subr.bf16.mxu0 %v7943_v35 }
 0x549   : > { %7336 = vmatpush3.bf16.msra.mxu1 %v7335_v29  ;;  %v4386_v29 = vld [vmem:[#allocation12 + $0x50] sm:$0xff] }
 0x54a   : > { %7337 = vmatprep.subr.bf16.mxu1 %v7943_v35 }
 0x54b   : > { %7312 = vmatpush3.bf16.msra.mxu0 %v7311_v58 }
 0x54c   : > { %7313 = vmatprep.subr.bf16.mxu0 %v7943_v35 }
 0x54d   : > { %7339 = vmatpush3.bf16.msra.mxu1 %v7338_v26  ;;  %v4390_v26 = vld [vmem:[#allocation12 + $0x70] sm:$0xff] }
 0x54e   : > { %7340 = vmatprep.subr.bf16.mxu1 %v7943_v35 }
 0x54f   : > { %7315 = vmatpush3.bf16.msra.mxu0 %v7314_v56 }
 0x550   : > { %7316 = vmatprep.subr.bf16.mxu0 %v7943_v35 }
 0x551   : > { %7342 = vmatpush3.bf16.msra.mxu1 %v7341_v47 }
 0x552   : > { %7343 = vmatprep.subr.bf16.mxu1 %v7943_v35 }
 0x553   : > { %7318 = vmatpush3.bf16.msra.mxu0 %v7317_v37 }
 0x554   : > { %7319 = vmatprep.subr.bf16.mxu0 %v7943_v35 }
 0x555   : > { %7345 = vmatpush3.bf16.msra.mxu1 %v7344_v22 }
 0x556   : > { %7346 = vmatprep.subr.bf16.mxu1 %v7943_v35 }
 0x557   : > { %7321 = vmatpush3.bf16.msra.mxu0 %v7320_v49 }
 0x558   : > { %7322 = vmatprep.subr.bf16.mxu0 %v7943_v35 }
 0x559   : > { %7348 = vmatpush3.bf16.msra.mxu1 %v7347_v36 }
 0x55a   : > { %7349 = vmatprep.subr.bf16.mxu1 %v7943_v35 }
 0x55b   : > { %7324 = vmatpush3.bf16.msra.mxu0 %v7323_v48 }
 0x55c   : > { %7325 = vmatprep.subr.bf16.mxu0 %v7943_v35 }
 0x55d   : > { %7351 = vmatpush3.bf16.msra.mxu1 %v7350_v9 }
 0x55f   : > { %7327 = vmatpush3.bf16.msra.mxu0 %v7326_v7 }
 0x560   : > { %7352 = vmatprep.subr.bf16.mxu0 %v7943_v35 }
 0x562   : > { %6464 = vmatmul.mubr.f32.vlgmr.msra.gmra.mrb[24].mxu0 %v8824_v41 }
 0x563   : > { %6533 = vmatprep.mubr.msk.f32.mxu0 %vm7944_vm2, %v7942_v21  ;;  %7354 = vmatpush3.bf16.msra.mxu0 %v7353_v23 }
 0x564   : > { %7355 = vmatprep.subr.bf16.mxu0 %v7943_v35 }
 0x567   : > { %7357 = vmatpush3.bf16.msra.mxu0 %v7356_v38 }
 0x568   : > { %7358 = vmatprep.subr.bf16.mxu0 %v7943_v35 }
 0x56b   : > { %7360 = vmatpush3.bf16.msra.mxu0 %v7359_v44 }
 0x56c   : > { %7361 = vmatprep.subr.bf16.mxu0 %v7943_v35 }
 0x56f   : > { %7363 = vmatpush3.bf16.msra.mxu0 %v7362_v12 }
 0x570   : > { %7364 = vmatprep.subr.bf16.mxu0 %v7943_v35 }
 0x573   : > { %7366 = vmatpush3.bf16.msra.mxu0 %v7365_v15 }
 0x574   : > { %7367 = vmatprep.subr.bf16.mxu0 %v7943_v35 }
 0x5b2   : > { %v3627_v41 = vpop.f32.mrb[4].mxu1 }
 0x5b3   : > { %v6220_v21 = vpop.f32.mrb[5].mxu1 }
 0x5b4   : > { %v4388_v21 = vld [vmem:[#allocation12 + $0x60] sm:$0xff] }
 0x5b5   : > { %v3557_v28 = vpop.f32.mrb[16].mxu0 }
 0x5b6   : > { %v3628_v3 = vadd.f32 %v3627_v41, %v3557_v28  ;;  %v6185_v39 = vpop.f32.mrb[17].mxu0  ;;  %v4387_v41 = vld [vmem:[#allocation12 + $0x58] sm:$0xff]  ;;  %v7371_v28 = vpack.c.bf16 %v4389_v62, %v4388_v21 }
 0x5b7   : > { %v7368_v33 = vpack.c.bf16 %v4387_v41, %v4386_v29 }
 0x5b9   : > { %7369 = vmatpush3.bf16.msra.mxu0 %v7368_v33 }
 0x5ba   : > { %7370 = vmatprep.subr.bf16.mxu0 %v7943_v35 }
 0x5bd   : > { %7372 = vmatpush3.bf16.msra.mxu0 %v7371_v28 }
 0x5be   : > { %7373 = vmatprep.subr.bf16.mxu0 %v7943_v35  ;;  %v4644_v35 = vld [vmem:[%s9015_s11] ss:$0 sm:$0xff] }
 0x5d2   : > { %v3806_v60 = vpop.f32.mrb[6].mxu1 }
 0x5d3   : > { %v6290_v61 = vpop.f32.mrb[7].mxu1 }
 0x5d5   : > { %v3718_v4 = vpop.f32.mrb[18].mxu0 }
 0x5d6   : > { %v3722_v63 = vadd.f32 %v3718_v4, %v3628_v3  ;;  %v6255_v0 = vpop.f32.mrb[19].mxu0  ;;  %v4391_v3 = vld [vmem:[#allocation12 + $0x78] sm:$0xff] }
 0x5d7   : > { %v7374_v39 = vpack.c.bf16 %v4391_v3, %v4390_v26 }
 0x5d8   : > { %v3810_v46 = vadd.f32 %v3806_v60, %v3722_v63 }
 0x5d9   : > { %7375 = vmatpush3.bf16.msra.mxu0 %v7374_v39 }
 0x5f2   : > { %v3989_v51 = vpop.f32.mrb[8].mxu1 }
 0x5f3   : > { %v6360_v5 = vpop.f32.mrb[9].mxu1 }
 0x5f5   : > { %v3898_v10 = vpop.f32.mrb[20].mxu0 }
 0x5f6   : > { %v3902_v58 = vadd.f32 %v3898_v10, %v3810_v46  ;;  %v6325_v19 = vpop.f32.mrb[21].mxu0 }
 0x5f8   : > { %v3993_v25 = vadd.f32 %v3989_v51, %v3902_v58 }
 0x612   : > { %v4169_v56 = vpop.f32.mrb[10].mxu1 }
 0x613   : > { %v6430_v24 = vpop.f32.mrb[11].mxu1 }
 0x615   : > { %v4077_v27 = vpop.f32.mrb[22].mxu0 }
 0x616   : > { %v4081_v37 = vadd.f32 %v4077_v27, %v3993_v25  ;;  %v6395_v42 = vpop.f32.mrb[23].mxu0 }
 0x618   : > { %v4173_v13 = vadd.f32 %v4169_v56, %v4081_v37 }
 0x635   : > { %v4260_v49 = vpop.f32.mrb[24].mxu0 }
 0x636   : > { %v4264_v1 = vadd.f32 %v4260_v49, %v4173_v13  ;;  %v6465_v48 = vpop.f32.mrb[25].mxu0 }
 0x638   : > { %v4272_v52 = vadd.f32 %v4640_v20, %v4264_v1 }
 0x63a   : > { %v4274_v31 = vmul.f32 1.442695, %v4272_v52  ;;  %vm4273_vm7 = vcmp.gt.f32.partialorder %v4272_v52, 0.0 }
 0x63c   : > { %7680 = vpow2.f32 %v4274_v31 }
 0x646   : > { %v7681_v7 = vpop.eup %7680 }
 0x647   : > { %v4641_v53 = vadd.f32 -1.0, %v7681_v7 }
 0x649   : > { %v4277_v54 = vsel %vm4273_vm7, %v4272_v52, %v4641_v53 }
 0x64a   : > { %6499 = vmatmul.mubr.f32.vlgmr.msra.gmra.mrb[12].mxu1 %v4277_v54 }
 0x71d   : > { %v4367_v6 = vpop.f32.mrb[12].mxu1 }
 0x71e   : > { %v4368_v47 = vadd.f32 %v4642_v8, %v4367_v6  ;;  %v6500_v18 = vpop.f32.mrb[13].mxu1 }
 0x720   : > { %v4372_v57 = vmul.f32 1.442695, %v4368_v47  ;;  %vm4371_vm8 = vcmp.gt.f32.partialorder %v4368_v47, 0.0 }
 0x722   : > { %7682 = vpow2.f32 %v4372_v57 }
 0x72c   : > { %v7683_v14 = vpop.eup %7682 }
 0x72d   : > { %v4643_v22 = vadd.f32 -1.0, %v7683_v14 }
 0x72f   : > { %v4375_v30 = vsel %vm4371_vm8, %v4368_v47, %v4643_v22 }
 0x730   : > { %6534 = vmatmul.mubr.f32.vlgmr.msra.gmra.mrb[26].mxu0 %v4375_v30 }
 0x803   : > { %v4465_v36 = vpop.f32.mrb[26].mxu0 }
 0x804   : > { %v4466_v59 = vadd.f32 %v4644_v35, %v4465_v36  ;;  %v6535_v32 = vpop.f32.mrb[27].mxu0 }
 0x806   : > { %4469 = vst [vmem:[%s477_s24] sm:$0xff] %v4466_v59 }
 0x807   : > { %7867 = shalt.err (!%p7864_p8)
}
 0x808   : > { %s7868_s26 = scalar_lea.hbm %s8928_s8, 128  ;;  %s7872_s11 = scalar_lea.hbm %s9016_s1, 256 }
 0x809   : > { %p7869_p6 = scmp.ne.s32.totalorder %s8928_s8, %s7868_s26  ;;  %p7873_p3 = scmp.lt.u32.totalorder %s8928_s8, %s9016_s1 }
 0x80a   : > { %p7874_p5 = scmp.lt.u32.totalorder %s7872_s11, %s7868_s26  ;;  %p7876_p7 = scmp.lt.u32.totalorder %s7868_s26, %s8928_s8 }
 0x80b   : > { %p7870_p10 = pnand %p7869_p6, %p9017_p4 }
 0x80c   : > { %p7875_p9 = por %p7874_p5, %p7873_p3 }
 0x80d   : > { %p7871_p11 = pneg %p7870_p10 }
 0x80e   : > { %p7877_p12 = por %p7876_p7, %p7875_p9 }
 0x810   : > { %p7878_p1 = pnand %p7877_p12, %p7871_p11 }
 0x812   : > { %7881 = shalt.err (!%p7878_p1)
}
 0x813   : > { %7560 = dma.vmem_to_hbm [thread:$0]  (%p9017_p4), %s8930_s13, 128, %s8928_s8, %s4471_s25  }
 0x814 PF: > { %s4496_s28 = sand.u32 1, %s7920_s17   ;;  %p9018_p13 = scmp.ne.s32.totalorder %s9003_s21, 0 }
 0x815   : > { %p9019_p0 = scmp.ge.s32.totalorder %s7932_s20, 2  ;;  %s4497_s29 = scalar_lea.sflag [#allocation5], %s4496_s28 }
 0x817   : > { %p7583_p2 = pnand %p9019_p0, %p9018_p13 }
 0x819   : > { %7915 = dma.done.wait (!%p7583_p2), %s4497_s29, 128  }
 0x81a   : > { %7917 = vsyncadd (!%p7583_p2), %s4497_s29, 4294967168  ;;  %p27_p8 = scmp.ge.s32.totalorder %s8179_s16, 4   ;;  %s9020_s17 = smov %s7924_s18 }
 0x81b   : > { %s9021_s18 = smov %s7928_s19  ;;  %s9022_s19 = smov %s8191_s10 }
 0x81c   : > { %s9023_s20 = smov %s8179_s16  ;;  %29 = sbr.rel (!%p27_p8) target bundleno = 14 (0xe), region = 157 }
 0x823   :  { %4502 = vsyncpa [#allocation4], 1 }
 0x824   :  { %4504 = vsyncpa [#allocation4 + $0x1], 1 }
 0x825   :  { %4505 = vsyncpa [#allocation7], 1 }
 0x826   :  { %4506 = vsyncpa [#allocation10], 1 }
 0x827   :  { %4507 = vsyncpa [#allocation13], 1 }
 0x828   :  { %4508 = vsyncpa [#allocation5], 1 }
 0x829   :  { %4510 = vsyncpa [#allocation5 + $0x1], 1 }

</bundles_post_ra>
